<compile_context>
chip_gen: v7x
topology: tpu7x:2x2x1
jax: 0.10.0
libtpu: 0.0.40
codegen_flags: <defaults>
</compile_context>

<pallas_src>
import functools

import jax
import jax.numpy as jnp
from jax.experimental import pallas as pl
from jax.experimental.pallas import tpu as pltpu


def _round_up(x, m):
    return (x + m - 1) // m * m


# ----------------------------------------------------------------------------
# Pallas kernel: tiled batched matmul + bias + optional tanh
#   grid = (B, M_tiles, K_tiles); A:(B,Mp,Kp) bf16, W:(B,Kp,Coutp) bf16,
#   bias:(1,Coutp) f32, out:(B,Mp,Coutp) f32, acc scratch (TM,Coutp) f32.
# ----------------------------------------------------------------------------
def _mm_kernel(a_ref, w_ref, b_ref, o_ref, acc_ref, *, act_out):
    k = pl.program_id(2)

    @pl.when(k == 0)
    def _init():
        acc_ref[...] = jnp.zeros_like(acc_ref)

    acc_ref[...] += jnp.dot(a_ref[...], w_ref[...],
                            preferred_element_type=jnp.float32)

    @pl.when(k == pl.num_programs(2) - 1)
    def _finalize():
        out = acc_ref[...] + b_ref[...]
        if act_out == "tanh":
            out = jnp.tanh(out)
        o_ref[...] = out


def _mm_vmem_limit(tm, tk, coutp):
    need = (2 * (tm * tk * 2 + tk * coutp * 2 + tm * coutp * 4)
            + tm * coutp * 4 + 2 * coutp * 4 + (1 << 20))
    return int(min(max(2 * need, 8 << 20), 32 << 20))


def _matmul_bias_act(a3, w3, bias, act_out=None):
    """a3: (B, M, K) bf16; w3: (B, K, cout) bf16; bias: (cout,) f32 -> (B, M, cout) f32."""
    B, M, K = a3.shape
    cout = w3.shape[2]
    coutp = _round_up(cout, 128)
    TM = min(512, _round_up(M, 16))
    TK = min(512, _round_up(K, 128))
    Mp = _round_up(M, TM)
    Kp = _round_up(K, TK)

    a3 = jnp.pad(a3, ((0, 0), (0, Mp - M), (0, Kp - K)))
    w3 = jnp.pad(w3, ((0, 0), (0, Kp - K), (0, coutp - cout)))
    b2 = jnp.pad(bias.astype(jnp.float32).reshape(1, cout),
                 ((0, 0), (0, coutp - cout)))

    grid = (B, Mp // TM, Kp // TK)
    out = pl.pallas_call(
        functools.partial(_mm_kernel, act_out=act_out),
        out_shape=jax.ShapeDtypeStruct((B, Mp, coutp), jnp.float32),
        grid_spec=pltpu.PrefetchScalarGridSpec(
            num_scalar_prefetch=0,
            grid=grid,
            in_specs=[
                pl.BlockSpec((None, TM, TK), lambda b, i, k: (b, i, k)),
                pl.BlockSpec((None, TK, coutp), lambda b, i, k: (b, k, 0)),
                pl.BlockSpec((1, coutp), lambda b, i, k: (0, 0)),
            ],
            out_specs=pl.BlockSpec((None, TM, coutp), lambda b, i, k: (b, i, 0)),
            scratch_shapes=[pltpu.VMEM((TM, coutp), jnp.float32)],
        ),
        compiler_params=pltpu.CompilerParams(
            dimension_semantics=("parallel", "parallel", "arbitrary"),
            vmem_limit_bytes=_mm_vmem_limit(TM, TK, coutp),
        ),
    )(a3, w3, b2)
    return out[:, :M, :cout]


# ----------------------------------------------------------------------------
# Pallas kernels: two-pass tiled BatchNorm2d (training-mode, biased variance)
# ----------------------------------------------------------------------------
def _bn_stats_kernel(x_ref, s_ref):
    @pl.when(pl.program_id(0) == 0)
    def _init():
        s_ref[...] = jnp.zeros_like(s_ref)

    x = x_ref[...]
    part = jnp.concatenate(
        [jnp.sum(x, axis=0, keepdims=True),
         jnp.sum(x * x, axis=0, keepdims=True)], axis=0)
    s_ref[...] += part


def _bn_apply_kernel(x_ref, sc_ref, sh_ref, o_ref):
    o_ref[...] = x_ref[...] * sc_ref[...] + sh_ref[...]


def _batchnorm2d(x_nhwc, gamma, beta, eps=1e-5):
    n, h, w, c = x_nhwc.shape
    M = n * h * w
    x2d = x_nhwc.reshape(M, c)
    TM = min(1024, _round_up(M, 8))
    Mp = _round_up(M, TM)
    xp = jnp.pad(x2d, ((0, Mp - M), (0, 0)))

    stats = pl.pallas_call(
        _bn_stats_kernel,
        out_shape=jax.ShapeDtypeStruct((2, c), jnp.float32),
        grid_spec=pltpu.PrefetchScalarGridSpec(
            num_scalar_prefetch=0,
            grid=(Mp // TM,),
            in_specs=[pl.BlockSpec((TM, c), lambda i: (i, 0))],
            out_specs=pl.BlockSpec((2, c), lambda i: (0, 0)),
        ),
        compiler_params=pltpu.CompilerParams(
            dimension_semantics=("arbitrary",)),
    )(xp)

    mean = stats[0] / M
    var = stats[1] / M - mean * mean          # biased batch variance
    scale = gamma * jax.lax.rsqrt(var + eps)
    shift = beta - mean * scale

    y = pl.pallas_call(
        _bn_apply_kernel,
        out_shape=jax.ShapeDtypeStruct((Mp, c), jnp.float32),
        grid_spec=pltpu.PrefetchScalarGridSpec(
            num_scalar_prefetch=0,
            grid=(Mp // TM,),
            in_specs=[
                pl.BlockSpec((TM, c), lambda i: (i, 0)),
                pl.BlockSpec((1, c), lambda i: (0, 0)),
                pl.BlockSpec((1, c), lambda i: (0, 0)),
            ],
            out_specs=pl.BlockSpec((TM, c), lambda i: (i, 0)),
        ),
        compiler_params=pltpu.CompilerParams(
            dimension_semantics=("parallel",)),
    )(xp, scale.reshape(1, c).astype(jnp.float32),
      shift.reshape(1, c).astype(jnp.float32))
    return y[:M].reshape(n, h, w, c)


# ----------------------------------------------------------------------------
# Conv lowering glue (activations applied once, im2col, polyphase deconv)
# ----------------------------------------------------------------------------
def _leaky_relu(x):
    return jnp.where(x > 0, x, 0.2 * x)


def _relu(x):
    return jnp.maximum(x, 0.0)


def conv_down(x, w_oihw, act_in=None):
    """nn.Conv2d(k=4, s=2, p=1, bias=False), optional fused pre-activation."""
    n, h, w, cin = x.shape
    cout = w_oihw.shape[0]
    ho, wo = h // 2, w // 2
    if act_in == "leaky_relu":
        x = _leaky_relu(x)
    xb = x.astype(jnp.bfloat16)
    xp = jnp.pad(xb, ((0, 0), (1, 1), (1, 1), (0, 0)))

    cols = []
    for kh in range(4):
        for kw in range(4):
            cols.append(xp[:, kh:kh + 2 * ho - 1:2, kw:kw + 2 * wo - 1:2, :])
    a = jnp.stack(cols, axis=3).reshape(n * ho * wo, 16 * cin)       # bf16

    wm = (jnp.transpose(w_oihw, (2, 3, 1, 0))
          .reshape(16 * cin, cout).astype(jnp.bfloat16))
    bias = jnp.zeros((cout,), jnp.float32)
    y = _matmul_bias_act(a[None], wm[None], bias, act_out=None)[0]
    return y.reshape(n, ho, wo, cout)


# kernel-tap selection per output phase (derived from oh = 2*ih - 1 + kh)
_KSEL = ((3, 1), (2, 0))


def conv_up(x, w_iohw, bias, act_in=None, act_out=None):
    """nn.ConvTranspose2d(k=4, s=2, p=1) via polyphase (4 sub-convs, no zero-dilation)."""
    n, h, w, cin = x.shape
    cout = w_iohw.shape[1]
    if act_in == "relu":
        x = _relu(x)
    xb = x.astype(jnp.bfloat16)
    xp = jnp.pad(xb, ((0, 0), (1, 1), (1, 1), (0, 0)))

    a_list, w_list = [], []
    for pi in range(2):
        for pj in range(2):
            cols, taps = [], []
            for dh in range(2):
                for dw in range(2):
                    cols.append(xp[:, pi + dh:pi + dh + h, pj + dw:pj + dw + w, :])
                    taps.append(w_iohw[:, :, _KSEL[pi][dh], _KSEL[pj][dw]])
            a_list.append(jnp.stack(cols, axis=3).reshape(n * h * w, 4 * cin))
            w_list.append(jnp.concatenate(taps, axis=0))             # (4*cin, cout)

    a_all = jnp.stack(a_list, axis=0)                                # (4, M, 4*cin) bf16
    w_all = jnp.stack(w_list, axis=0).astype(jnp.bfloat16)           # (4, 4*cin, cout)
    b = bias if bias is not None else jnp.zeros((cout,), jnp.float32)

    y = _matmul_bias_act(a_all, w_all, b, act_out=act_out)           # (4, M, cout) f32
    y = y.reshape(2, 2, n, h, w, cout)                               # [pi, pj, ...]
    y = jnp.transpose(y, (2, 3, 0, 4, 1, 5)).reshape(n, 2 * h, 2 * w, cout)
    return y


# ----------------------------------------------------------------------------
# U-Net block construction (mirrors UnetSkipConnectionBlock / UnetGenerator)
# ----------------------------------------------------------------------------
def _make_block(key, outer_nc, inner_nc, sub=None, outermost=False, innermost=False):
    ks = jax.random.split(key, 8)
    norm = lambda k, shp: 0.02 * jax.random.normal(k, shp, jnp.float32)
    p = {"outermost": outermost, "innermost": innermost, "sub": sub}
    # downconv: Conv2d(outer_nc, inner_nc, 4, 2, 1, bias=False)  (BatchNorm norm_layer)
    p["down_w"] = norm(ks[0], (inner_nc, outer_nc, 4, 4))
    if outermost:
        # upconv: ConvTranspose2d(inner_nc*2, outer_nc, 4, 2, 1)  (bias=True)
        p["up_w"] = norm(ks[1], (inner_nc * 2, outer_nc, 4, 4))
        p["up_b"] = norm(ks[2], (outer_nc,))
    elif innermost:
        p["up_w"] = norm(ks[1], (inner_nc, outer_nc, 4, 4))
        p["up_gamma"] = 1.0 + norm(ks[3], (outer_nc,))
        p["up_beta"] = norm(ks[4], (outer_nc,))
    else:
        p["down_gamma"] = 1.0 + norm(ks[5], (inner_nc,))
        p["down_beta"] = norm(ks[6], (inner_nc,))
        p["up_w"] = norm(ks[1], (inner_nc * 2, outer_nc, 4, 4))
        p["up_gamma"] = 1.0 + norm(ks[3], (outer_nc,))
        p["up_beta"] = norm(ks[4], (outer_nc,))
    return p


def build_unet(key, input_nc, output_nc, num_downs, ngf):
    assert input_nc == output_nc
    keys = jax.random.split(key, num_downs)
    ki = iter(keys)
    blk = _make_block(next(ki), ngf * 8, ngf * 8, innermost=True)
    for _ in range(num_downs - 5):
        blk = _make_block(next(ki), ngf * 8, ngf * 8, sub=blk)
    blk = _make_block(next(ki), ngf * 4, ngf * 8, sub=blk)
    blk = _make_block(next(ki), ngf * 2, ngf * 4, sub=blk)
    blk = _make_block(next(ki), ngf, ngf * 2, sub=blk)
    blk = _make_block(next(ki), output_nc, ngf, sub=blk, outermost=True)
    return blk


def block_forward(p, x):
    """x: NHWC float32."""
    if p["outermost"]:
        h = conv_down(x, p["down_w"], act_in=None)                     # downconv only
        h = block_forward(p["sub"], h)
        return conv_up(h, p["up_w"], p["up_b"], act_in="relu", act_out="tanh")
    elif p["innermost"]:
        h = conv_down(x, p["down_w"], act_in="leaky_relu")             # LeakyReLU->conv
        h = conv_up(h, p["up_w"], None, act_in="relu")                 # ReLU->convT
        h = _batchnorm2d(h, p["up_gamma"], p["up_beta"])
        return jnp.concatenate([x, h], axis=-1)                        # skip-cat (channels)
    else:
        h = conv_down(x, p["down_w"], act_in="leaky_relu")
        h = _batchnorm2d(h, p["down_gamma"], p["down_beta"])
        h = block_forward(p["sub"], h)
        h = conv_up(h, p["up_w"], None, act_in="relu")
        h = _batchnorm2d(h, p["up_gamma"], p["up_beta"])
        return jnp.concatenate([x, h], axis=-1)


def unet_generator_forward(blocks, x_nchw):
    x = jnp.transpose(x_nchw, (0, 2, 3, 1)).astype(jnp.float32)        # NCHW -> NHWC
    y = block_forward(blocks, x)
    return jnp.transpose(y, (0, 3, 1, 2))                              # NHWC -> NCHW


# ----------------------------------------------------------------------------
if __name__ == "__main__":
    key = jax.random.PRNGKey(0)
    k_params, k_x = jax.random.split(key)

    # Small config: num_downs=5 -> spatial must be divisible by 2^5 = 32.
    input_nc = output_nc = 4
    ngf = 8
    num_downs = 5
    N, H, W = 2, 32, 32

    blocks = build_unet(k_params, input_nc, output_nc, num_downs, ngf)
    x = jax.random.normal(k_x, (N, input_nc, H, W), jnp.float32)

    fwd = jax.jit(lambda inp: unet_generator_forward(blocks, inp))
    y = fwd(x)
    jax.block_until_ready(y)

    assert y.shape == (N, output_nc, H, W), y.shape
    assert bool(jnp.all(jnp.isfinite(y)))
    print("KERNEL_OK")
</pallas_src>

<mosaic_0001>
module attributes {stable_mosaic.version = 11 : i64} {
  func.func @_mm_kernel(%arg0: i32, %arg1: i32, %arg2: i32, %arg3: memref<1x512x128xbf16, #tpu.memory_space<vmem>>, %arg4: memref<1x128x128xbf16, #tpu.memory_space<vmem>>, %arg5: memref<1x128xf32, #tpu.memory_space<vmem>>, %arg6: memref<1x512x128xf32, #tpu.memory_space<vmem>>, %arg7: memref<512x128xf32, #tpu.memory_space<vmem>>) attributes {dimension_semantics = [#tpu.dimension_semantics<parallel>, #tpu.dimension_semantics<parallel>, #tpu.dimension_semantics<arbitrary>], iteration_bounds = array<i64: 1, 1, 1>, scalar_prefetch = 0 : i64, scratch_operands = 1 : i64, tpu.core_type = #tpu.core_type<tc>, window_params = [{transform_indices = @transform_0, window_bounds = array<i64: 1, 512, 128>}, {transform_indices = @transform_1, window_bounds = array<i64: 1, 128, 128>}, {pipeline_mode = #tpu.pipeline_mode<synchronous>, transform_indices = @transform_2, window_bounds = array<i64: 1, 128>}, {transform_indices = @transform_3, window_bounds = array<i64: 1, 512, 128>}]} {
    %c0_i32 = arith.constant 0 : i32
    %0 = arith.cmpi eq, %arg2, %c0_i32 : i32
    %1 = arith.extui %0 : i1 to i32
    %c0_i32_0 = arith.constant 0 : i32
    %2 = arith.cmpi ne, %1, %c0_i32_0 : i32
    scf.if %2 {
      %cst_12 = arith.constant 0.000000e+00 : f32
      %14 = vector.broadcast %cst_12 : f32 to vector<512x128xf32>
      %c0_13 = arith.constant 0 : index
      %c0_14 = arith.constant 0 : index
      %15 = vector.load %arg7[%c0_13, %c0_14] : memref<512x128xf32, #tpu.memory_space<vmem>>, vector<512x128xf32>
      tpu.vector_store %arg7[%c0_13, %c0_14], %14 {strides = array<i32>} : memref<512x128xf32, #tpu.memory_space<vmem>>, vector<512x128xf32>,
    } else {
    }
    %c0 = arith.constant 0 : index
    %c0_1 = arith.constant 0 : index
    %3 = vector.load %arg7[%c0, %c0_1] : memref<512x128xf32, #tpu.memory_space<vmem>>, vector<512x128xf32>
    %c0_2 = arith.constant 0 : index
    %c0_3 = arith.constant 0 : index
    %c0_4 = arith.constant 0 : index
    %4 = vector.load %arg3[%c0_2, %c0_3, %c0_4] : memref<1x512x128xbf16, #tpu.memory_space<vmem>>, vector<1x512x128xbf16>
    %5 = vector.shape_cast %4 : vector<1x512x128xbf16> to vector<512x128xbf16>
    %c0_5 = arith.constant 0 : index
    %c0_6 = arith.constant 0 : index
    %c0_7 = arith.constant 0 : index
    %6 = vector.load %arg4[%c0_5, %c0_6, %c0_7] : memref<1x128x128xbf16, #tpu.memory_space<vmem>>, vector<1x128x128xbf16>
    %7 = vector.shape_cast %6 : vector<1x128x128xbf16> to vector<128x128xbf16>
    %cst = arith.constant dense<0.000000e+00> : vector<512x128xf32>
    %8 = tpu.matmul %5, %7, %cst {dimension_numbers = #tpu.dot_dimension_numbers<[1], [0], [0], [1], [0, 0, 1, 1], [], []>} : vector<512x128xbf16>, vector<128x128xbf16>, vector<512x128xf32> -> vector<512x128xf32>
    %9 = arith.addf %3, %8 : vector<512x128xf32>
    %c0_8 = arith.constant 0 : index
    %c0_9 = arith.constant 0 : index
    %10 = vector.load %arg7[%c0_8, %c0_9] : memref<512x128xf32, #tpu.memory_space<vmem>>, vector<512x128xf32>
    tpu.vector_store %arg7[%c0_8, %c0_9], %9 {strides = array<i32>} : memref<512x128xf32, #tpu.memory_space<vmem>>, vector<512x128xf32>,
    %c0_i32_10 = arith.constant 0 : i32
    %11 = arith.cmpi eq, %arg2, %c0_i32_10 : i32
    %12 = arith.extui %11 : i1 to i32
    %c0_i32_11 = arith.constant 0 : i32
    %13 = arith.cmpi ne, %12, %c0_i32_11 : i32
    scf.if %13 {
      %c0_12 = arith.constant 0 : index
      %c0_13 = arith.constant 0 : index
      %14 = vector.load %arg7[%c0_12, %c0_13] : memref<512x128xf32, #tpu.memory_space<vmem>>, vector<512x128xf32>
      %c0_14 = arith.constant 0 : index
      %c0_15 = arith.constant 0 : index
      %15 = vector.load %arg5[%c0_14, %c0_15] : memref<1x128xf32, #tpu.memory_space<vmem>>, vector<1x128xf32>
      %16 = vector.broadcast %15 : vector<1x128xf32> to vector<512x128xf32>
      %17 = arith.addf %14, %16 : vector<512x128xf32>
      %c0_16 = arith.constant 0 : index
      %c0_17 = arith.constant 0 : index
      %c0_18 = arith.constant 0 : index
      %18 = vector.load %arg6[%c0_16, %c0_17, %c0_18] : memref<1x512x128xf32, #tpu.memory_space<vmem>>, vector<1x512x128xf32>
      %19 = vector.shape_cast %18 : vector<1x512x128xf32> to vector<512x128xf32>
      %20 = vector.shape_cast %17 : vector<512x128xf32> to vector<1x512x128xf32>
      tpu.vector_store %arg6[%c0_16, %c0_17, %c0_18], %20 {strides = array<i32>} : memref<1x512x128xf32, #tpu.memory_space<vmem>>, vector<1x512x128xf32>,
    } else {
    }
    return
  }
  func.func @transform_0(%arg0: i32, %arg1: i32, %arg2: i32) -> (i32, i32, i32) {
    %c0_i32 = arith.constant 0 : i32
    return %arg0, %arg1, %arg2 : i32, i32, i32
  }
  func.func @transform_1(%arg0: i32, %arg1: i32, %arg2: i32) -> (i32, i32, i32) {
    %c0_i32 = arith.constant 0 : i32
    %c0_i32_0 = arith.constant 0 : i32
    return %arg0, %arg2, %c0_i32 : i32, i32, i32
  }
  func.func @transform_2(%arg0: i32, %arg1: i32, %arg2: i32) -> (i32, i32) {
    %c0_i32 = arith.constant 0 : i32
    %c0_i32_0 = arith.constant 0 : i32
    %c0_i32_1 = arith.constant 0 : i32
    return %c0_i32, %c0_i32_0 : i32, i32
  }
  func.func @transform_3(%arg0: i32, %arg1: i32, %arg2: i32) -> (i32, i32, i32) {
    %c0_i32 = arith.constant 0 : i32
    %c0_i32_0 = arith.constant 0 : i32
    return %arg0, %arg1, %c0_i32 : i32, i32, i32
  }
}

module attributes {stable_mosaic.version = 11 : i64} {
  func.func @_mm_kernel(%arg0: i32, %arg1: i32, %arg2: i32, %arg3: memref<1x128x128xbf16, #tpu.memory_space<vmem>>, %arg4: memref<1x128x128xbf16, #tpu.memory_space<vmem>>, %arg5: memref<1x128xf32, #tpu.memory_space<vmem>>, %arg6: memref<1x128x128xf32, #tpu.memory_space<vmem>>, %arg7: memref<128x128xf32, #tpu.memory_space<vmem>>) attributes {dimension_semantics = [#tpu.dimension_semantics<parallel>, #tpu.dimension_semantics<parallel>, #tpu.dimension_semantics<arbitrary>], iteration_bounds = array<i64: 1, 1, 1>, scalar_prefetch = 0 : i64, scratch_operands = 1 : i64, tpu.core_type = #tpu.core_type<tc>, window_params = [{transform_indices = @transform_0, window_bounds = array<i64: 1, 128, 128>}, {transform_indices = @transform_1, window_bounds = array<i64: 1, 128, 128>}, {pipeline_mode = #tpu.pipeline_mode<synchronous>, transform_indices = @transform_2, window_bounds = array<i64: 1, 128>}, {transform_indices = @transform_3, window_bounds = array<i64: 1, 128, 128>}]} {
    %c0_i32 = arith.constant 0 : i32
    %0 = arith.cmpi eq, %arg2, %c0_i32 : i32
    %1 = arith.extui %0 : i1 to i32
    %c0_i32_0 = arith.constant 0 : i32
    %2 = arith.cmpi ne, %1, %c0_i32_0 : i32
    scf.if %2 {
      %cst_12 = arith.constant 0.000000e+00 : f32
      %14 = vector.broadcast %cst_12 : f32 to vector<128x128xf32>
      %c0_13 = arith.constant 0 : index
      %c0_14 = arith.constant 0 : index
      %15 = vector.load %arg7[%c0_13, %c0_14] : memref<128x128xf32, #tpu.memory_space<vmem>>, vector<128x128xf32>
      tpu.vector_store %arg7[%c0_13, %c0_14], %14 {strides = array<i32>} : memref<128x128xf32, #tpu.memory_space<vmem>>, vector<128x128xf32>,
    } else {
    }
    %c0 = arith.constant 0 : index
    %c0_1 = arith.constant 0 : index
    %3 = vector.load %arg7[%c0, %c0_1] : memref<128x128xf32, #tpu.memory_space<vmem>>, vector<128x128xf32>
    %c0_2 = arith.constant 0 : index
    %c0_3 = arith.constant 0 : index
    %c0_4 = arith.constant 0 : index
    %4 = vector.load %arg3[%c0_2, %c0_3, %c0_4] : memref<1x128x128xbf16, #tpu.memory_space<vmem>>, vector<1x128x128xbf16>
    %5 = vector.shape_cast %4 : vector<1x128x128xbf16> to vector<128x128xbf16>
    %c0_5 = arith.constant 0 : index
    %c0_6 = arith.constant 0 : index
    %c0_7 = arith.constant 0 : index
    %6 = vector.load %arg4[%c0_5, %c0_6, %c0_7] : memref<1x128x128xbf16, #tpu.memory_space<vmem>>, vector<1x128x128xbf16>
    %7 = vector.shape_cast %6 : vector<1x128x128xbf16> to vector<128x128xbf16>
    %cst = arith.constant dense<0.000000e+00> : vector<128x128xf32>
    %8 = tpu.matmul %5, %7, %cst {dimension_numbers = #tpu.dot_dimension_numbers<[1], [0], [0], [1], [0, 0, 1, 1], [], []>} : vector<128x128xbf16>, vector<128x128xbf16>, vector<128x128xf32> -> vector<128x128xf32>
    %9 = arith.addf %3, %8 : vector<128x128xf32>
    %c0_8 = arith.constant 0 : index
    %c0_9 = arith.constant 0 : index
    %10 = vector.load %arg7[%c0_8, %c0_9] : memref<128x128xf32, #tpu.memory_space<vmem>>, vector<128x128xf32>
    tpu.vector_store %arg7[%c0_8, %c0_9], %9 {strides = array<i32>} : memref<128x128xf32, #tpu.memory_space<vmem>>, vector<128x128xf32>,
    %c0_i32_10 = arith.constant 0 : i32
    %11 = arith.cmpi eq, %arg2, %c0_i32_10 : i32
    %12 = arith.extui %11 : i1 to i32
    %c0_i32_11 = arith.constant 0 : i32
    %13 = arith.cmpi ne, %12, %c0_i32_11 : i32
    scf.if %13 {
      %c0_12 = arith.constant 0 : index
      %c0_13 = arith.constant 0 : index
      %14 = vector.load %arg7[%c0_12, %c0_13] : memref<128x128xf32, #tpu.memory_space<vmem>>, vector<128x128xf32>
      %c0_14 = arith.constant 0 : index
      %c0_15 = arith.constant 0 : index
      %15 = vector.load %arg5[%c0_14, %c0_15] : memref<1x128xf32, #tpu.memory_space<vmem>>, vector<1x128xf32>
      %16 = vector.broadcast %15 : vector<1x128xf32> to vector<128x128xf32>
      %17 = arith.addf %14, %16 : vector<128x128xf32>
      %c0_16 = arith.constant 0 : index
      %c0_17 = arith.constant 0 : index
      %c0_18 = arith.constant 0 : index
      %18 = vector.load %arg6[%c0_16, %c0_17, %c0_18] : memref<1x128x128xf32, #tpu.memory_space<vmem>>, vector<1x128x128xf32>
      %19 = vector.shape_cast %18 : vector<1x128x128xf32> to vector<128x128xf32>
      %20 = vector.shape_cast %17 : vector<128x128xf32> to vector<1x128x128xf32>
      tpu.vector_store %arg6[%c0_16, %c0_17, %c0_18], %20 {strides = array<i32>} : memref<1x128x128xf32, #tpu.memory_space<vmem>>, vector<1x128x128xf32>,
    } else {
    }
    return
  }
  func.func @transform_0(%arg0: i32, %arg1: i32, %arg2: i32) -> (i32, i32, i32) {
    %c0_i32 = arith.constant 0 : i32
    return %arg0, %arg1, %arg2 : i32, i32, i32
  }
  func.func @transform_1(%arg0: i32, %arg1: i32, %arg2: i32) -> (i32, i32, i32) {
    %c0_i32 = arith.constant 0 : i32
    %c0_i32_0 = arith.constant 0 : i32
    return %arg0, %arg2, %c0_i32 : i32, i32, i32
  }
  func.func @transform_2(%arg0: i32, %arg1: i32, %arg2: i32) -> (i32, i32) {
    %c0_i32 = arith.constant 0 : i32
    %c0_i32_0 = arith.constant 0 : i32
    %c0_i32_1 = arith.constant 0 : i32
    return %c0_i32, %c0_i32_0 : i32, i32
  }
  func.func @transform_3(%arg0: i32, %arg1: i32, %arg2: i32) -> (i32, i32, i32) {
    %c0_i32 = arith.constant 0 : i32
    %c0_i32_0 = arith.constant 0 : i32
    return %arg0, %arg1, %c0_i32 : i32, i32, i32
  }
}

module attributes {stable_mosaic.version = 11 : i64} {
  func.func @_bn_stats_kernel(%arg0: i32, %arg1: memref<128x16xf32, #tpu.memory_space<vmem>>, %arg2: memref<2x16xf32, #tpu.memory_space<vmem>>) attributes {dimension_semantics = [#tpu.dimension_semantics<arbitrary>], iteration_bounds = array<i64: 1>, scalar_prefetch = 0 : i64, scratch_operands = 0 : i64, tpu.core_type = #tpu.core_type<tc>, window_params = [{transform_indices = @transform_0, window_bounds = array<i64: 128, 16>}, {pipeline_mode = #tpu.pipeline_mode<synchronous>, transform_indices = @transform_1, window_bounds = array<i64: 2, 16>}]} {
    %c0_i32 = arith.constant 0 : i32
    %0 = arith.cmpi eq, %arg0, %c0_i32 : i32
    %1 = arith.extui %0 : i1 to i32
    %c0_i32_0 = arith.constant 0 : i32
    %2 = arith.cmpi ne, %1, %c0_i32_0 : i32
    scf.if %2 {
      %cst_7 = arith.constant 0.000000e+00 : f32
      %13 = vector.broadcast %cst_7 : f32 to vector<2x16xf32>
      %c0_8 = arith.constant 0 : index
      %c0_9 = arith.constant 0 : index
      %14 = vector.load %arg2[%c0_8, %c0_9] : memref<2x16xf32, #tpu.memory_space<vmem>>, vector<2x16xf32>
      tpu.vector_store %arg2[%c0_8, %c0_9], %13 {strides = array<i32>} : memref<2x16xf32, #tpu.memory_space<vmem>>, vector<2x16xf32>,
    } else {
    }
    %c0 = arith.constant 0 : index
    %c0_1 = arith.constant 0 : index
    %3 = vector.load %arg1[%c0, %c0_1] : memref<128x16xf32, #tpu.memory_space<vmem>>, vector<128x16xf32>
    %cst = arith.constant dense<0.000000e+00> : vector<16xf32>
    %4 = vector.multi_reduction <add>, %3, %cst [0] : vector<128x16xf32> to vector<16xf32>
    %5 = vector.shape_cast %4 : vector<16xf32> to vector<1x16xf32>
    %6 = arith.mulf %3, %3 : vector<128x16xf32>
    %cst_2 = arith.constant dense<0.000000e+00> : vector<16xf32>
    %7 = vector.multi_reduction <add>, %6, %cst_2 [0] : vector<128x16xf32> to vector<16xf32>
    %8 = vector.shape_cast %7 : vector<16xf32> to vector<1x16xf32>
    %9 = tpu.concatenate %5, %8 in 0 : vector<1x16xf32>, vector<1x16xf32> -> vector<2x16xf32>
    %c0_3 = arith.constant 0 : index
    %c0_4 = arith.constant 0 : index
    %10 = vector.load %arg2[%c0_3, %c0_4] : memref<2x16xf32, #tpu.memory_space<vmem>>, vector<2x16xf32>
    %11 = arith.addf %10, %9 : vector<2x16xf32>
    %c0_5 = arith.constant 0 : index
    %c0_6 = arith.constant 0 : index
    %12 = vector.load %arg2[%c0_5, %c0_6] : memref<2x16xf32, #tpu.memory_space<vmem>>, vector<2x16xf32>
    tpu.vector_store %arg2[%c0_5, %c0_6], %11 {strides = array<i32>} : memref<2x16xf32, #tpu.memory_space<vmem>>, vector<2x16xf32>,
    return
  }
  func.func @transform_0(%arg0: i32) -> (i32, i32) {
    %c0_i32 = arith.constant 0 : i32
    %c0_i32_0 = arith.constant 0 : i32
    return %arg0, %c0_i32 : i32, i32
  }
  func.func @transform_1(%arg0: i32) -> (i32, i32) {
    %c0_i32 = arith.constant 0 : i32
    %c0_i32_0 = arith.constant 0 : i32
    %c0_i32_1 = arith.constant 0 : i32
    return %c0_i32, %c0_i32_0 : i32, i32
  }
}

module attributes {stable_mosaic.version = 11 : i64} {
  func.func @_bn_apply_kernel(%arg0: i32, %arg1: memref<128x16xf32, #tpu.memory_space<vmem>>, %arg2: memref<1x16xf32, #tpu.memory_space<vmem>>, %arg3: memref<1x16xf32, #tpu.memory_space<vmem>>, %arg4: memref<128x16xf32, #tpu.memory_space<vmem>>) attributes {dimension_semantics = [#tpu.dimension_semantics<parallel>], iteration_bounds = array<i64: 1>, scalar_prefetch = 0 : i64, scratch_operands = 0 : i64, tpu.core_type = #tpu.core_type<tc>, window_params = [{transform_indices = @transform_0, window_bounds = array<i64: 128, 16>}, {pipeline_mode = #tpu.pipeline_mode<synchronous>, transform_indices = @transform_1, window_bounds = array<i64: 1, 16>}, {pipeline_mode = #tpu.pipeline_mode<synchronous>, transform_indices = @transform_2, window_bounds = array<i64: 1, 16>}, {transform_indices = @transform_3, window_bounds = array<i64: 128, 16>}]} {
    %c0 = arith.constant 0 : index
    %c0_0 = arith.constant 0 : index
    %0 = vector.load %arg1[%c0, %c0_0] : memref<128x16xf32, #tpu.memory_space<vmem>>, vector<128x16xf32>
    %c0_1 = arith.constant 0 : index
    %c0_2 = arith.constant 0 : index
    %1 = vector.load %arg2[%c0_1, %c0_2] : memref<1x16xf32, #tpu.memory_space<vmem>>, vector<1x16xf32>
    %2 = vector.broadcast %1 : vector<1x16xf32> to vector<128x16xf32>
    %3 = arith.mulf %0, %2 : vector<128x16xf32>
    %c0_3 = arith.constant 0 : index
    %c0_4 = arith.constant 0 : index
    %4 = vector.load %arg3[%c0_3, %c0_4] : memref<1x16xf32, #tpu.memory_space<vmem>>, vector<1x16xf32>
    %5 = vector.broadcast %4 : vector<1x16xf32> to vector<128x16xf32>
    %6 = arith.addf %3, %5 : vector<128x16xf32>
    %c0_5 = arith.constant 0 : index
    %c0_6 = arith.constant 0 : index
    %7 = vector.load %arg4[%c0_5, %c0_6] : memref<128x16xf32, #tpu.memory_space<vmem>>, vector<128x16xf32>
    tpu.vector_store %arg4[%c0_5, %c0_6], %6 {strides = array<i32>} : memref<128x16xf32, #tpu.memory_space<vmem>>, vector<128x16xf32>,
    return
  }
  func.func @transform_0(%arg0: i32) -> (i32, i32) {
    %c0_i32 = arith.constant 0 : i32
    %c0_i32_0 = arith.constant 0 : i32
    return %arg0, %c0_i32 : i32, i32
  }
  func.func @transform_1(%arg0: i32) -> (i32, i32) {
    %c0_i32 = arith.constant 0 : i32
    %c0_i32_0 = arith.constant 0 : i32
    %c0_i32_1 = arith.constant 0 : i32
    return %c0_i32, %c0_i32_0 : i32, i32
  }
  func.func @transform_2(%arg0: i32) -> (i32, i32) {
    %c0_i32 = arith.constant 0 : i32
    %c0_i32_0 = arith.constant 0 : i32
    %c0_i32_1 = arith.constant 0 : i32
    return %c0_i32, %c0_i32_0 : i32, i32
  }
  func.func @transform_3(%arg0: i32) -> (i32, i32) {
    %c0_i32 = arith.constant 0 : i32
    %c0_i32_0 = arith.constant 0 : i32
    return %arg0, %c0_i32 : i32, i32
  }
}

module attributes {stable_mosaic.version = 11 : i64} {
  func.func @_mm_kernel(%arg0: i32, %arg1: i32, %arg2: i32, %arg3: memref<1x32x256xbf16, #tpu.memory_space<vmem>>, %arg4: memref<1x256x128xbf16, #tpu.memory_space<vmem>>, %arg5: memref<1x128xf32, #tpu.memory_space<vmem>>, %arg6: memref<1x32x128xf32, #tpu.memory_space<vmem>>, %arg7: memref<32x128xf32, #tpu.memory_space<vmem>>) attributes {dimension_semantics = [#tpu.dimension_semantics<parallel>, #tpu.dimension_semantics<parallel>, #tpu.dimension_semantics<arbitrary>], iteration_bounds = array<i64: 1, 1, 1>, scalar_prefetch = 0 : i64, scratch_operands = 1 : i64, tpu.core_type = #tpu.core_type<tc>, window_params = [{transform_indices = @transform_0, window_bounds = array<i64: 1, 32, 256>}, {transform_indices = @transform_1, window_bounds = array<i64: 1, 256, 128>}, {pipeline_mode = #tpu.pipeline_mode<synchronous>, transform_indices = @transform_2, window_bounds = array<i64: 1, 128>}, {transform_indices = @transform_3, window_bounds = array<i64: 1, 32, 128>}]} {
    %c0_i32 = arith.constant 0 : i32
    %0 = arith.cmpi eq, %arg2, %c0_i32 : i32
    %1 = arith.extui %0 : i1 to i32
    %c0_i32_0 = arith.constant 0 : i32
    %2 = arith.cmpi ne, %1, %c0_i32_0 : i32
    scf.if %2 {
      %cst_12 = arith.constant 0.000000e+00 : f32
      %14 = vector.broadcast %cst_12 : f32 to vector<32x128xf32>
      %c0_13 = arith.constant 0 : index
      %c0_14 = arith.constant 0 : index
      %15 = vector.load %arg7[%c0_13, %c0_14] : memref<32x128xf32, #tpu.memory_space<vmem>>, vector<32x128xf32>
      tpu.vector_store %arg7[%c0_13, %c0_14], %14 {strides = array<i32>} : memref<32x128xf32, #tpu.memory_space<vmem>>, vector<32x128xf32>,
    } else {
    }
    %c0 = arith.constant 0 : index
    %c0_1 = arith.constant 0 : index
    %3 = vector.load %arg7[%c0, %c0_1] : memref<32x128xf32, #tpu.memory_space<vmem>>, vector<32x128xf32>
    %c0_2 = arith.constant 0 : index
    %c0_3 = arith.constant 0 : index
    %c0_4 = arith.constant 0 : index
    %4 = vector.load %arg3[%c0_2, %c0_3, %c0_4] : memref<1x32x256xbf16, #tpu.memory_space<vmem>>, vector<1x32x256xbf16>
    %5 = vector.shape_cast %4 : vector<1x32x256xbf16> to vector<32x256xbf16>
    %c0_5 = arith.constant 0 : index
    %c0_6 = arith.constant 0 : index
    %c0_7 = arith.constant 0 : index
    %6 = vector.load %arg4[%c0_5, %c0_6, %c0_7] : memref<1x256x128xbf16, #tpu.memory_space<vmem>>, vector<1x256x128xbf16>
    %7 = vector.shape_cast %6 : vector<1x256x128xbf16> to vector<256x128xbf16>
    %cst = arith.constant dense<0.000000e+00> : vector<32x128xf32>
    %8 = tpu.matmul %5, %7, %cst {dimension_numbers = #tpu.dot_dimension_numbers<[1], [0], [0], [1], [0, 0, 1, 1], [], []>} : vector<32x256xbf16>, vector<256x128xbf16>, vector<32x128xf32> -> vector<32x128xf32>
    %9 = arith.addf %3, %8 : vector<32x128xf32>
    %c0_8 = arith.constant 0 : index
    %c0_9 = arith.constant 0 : index
    %10 = vector.load %arg7[%c0_8, %c0_9] : memref<32x128xf32, #tpu.memory_space<vmem>>, vector<32x128xf32>
    tpu.vector_store %arg7[%c0_8, %c0_9], %9 {strides = array<i32>} : memref<32x128xf32, #tpu.memory_space<vmem>>, vector<32x128xf32>,
    %c0_i32_10 = arith.constant 0 : i32
    %11 = arith.cmpi eq, %arg2, %c0_i32_10 : i32
    %12 = arith.extui %11 : i1 to i32
    %c0_i32_11 = arith.constant 0 : i32
    %13 = arith.cmpi ne, %12, %c0_i32_11 : i32
    scf.if %13 {
      %c0_12 = arith.constant 0 : index
      %c0_13 = arith.constant 0 : index
      %14 = vector.load %arg7[%c0_12, %c0_13] : memref<32x128xf32, #tpu.memory_space<vmem>>, vector<32x128xf32>
      %c0_14 = arith.constant 0 : index
      %c0_15 = arith.constant 0 : index
      %15 = vector.load %arg5[%c0_14, %c0_15] : memref<1x128xf32, #tpu.memory_space<vmem>>, vector<1x128xf32>
      %16 = vector.broadcast %15 : vector<1x128xf32> to vector<32x128xf32>
      %17 = arith.addf %14, %16 : vector<32x128xf32>
      %c0_16 = arith.constant 0 : index
      %c0_17 = arith.constant 0 : index
      %c0_18 = arith.constant 0 : index
      %18 = vector.load %arg6[%c0_16, %c0_17, %c0_18] : memref<1x32x128xf32, #tpu.memory_space<vmem>>, vector<1x32x128xf32>
      %19 = vector.shape_cast %18 : vector<1x32x128xf32> to vector<32x128xf32>
      %20 = vector.shape_cast %17 : vector<32x128xf32> to vector<1x32x128xf32>
      tpu.vector_store %arg6[%c0_16, %c0_17, %c0_18], %20 {strides = array<i32>} : memref<1x32x128xf32, #tpu.memory_space<vmem>>, vector<1x32x128xf32>,
    } else {
    }
    return
  }
  func.func @transform_0(%arg0: i32, %arg1: i32, %arg2: i32) -> (i32, i32, i32) {
    %c0_i32 = arith.constant 0 : i32
    return %arg0, %arg1, %arg2 : i32, i32, i32
  }
  func.func @transform_1(%arg0: i32, %arg1: i32, %arg2: i32) -> (i32, i32, i32) {
    %c0_i32 = arith.constant 0 : i32
    %c0_i32_0 = arith.constant 0 : i32
    return %arg0, %arg2, %c0_i32 : i32, i32, i32
  }
  func.func @transform_2(%arg0: i32, %arg1: i32, %arg2: i32) -> (i32, i32) {
    %c0_i32 = arith.constant 0 : i32
    %c0_i32_0 = arith.constant 0 : i32
    %c0_i32_1 = arith.constant 0 : i32
    return %c0_i32, %c0_i32_0 : i32, i32
  }
  func.func @transform_3(%arg0: i32, %arg1: i32, %arg2: i32) -> (i32, i32, i32) {
    %c0_i32 = arith.constant 0 : i32
    %c0_i32_0 = arith.constant 0 : i32
    return %arg0, %arg1, %c0_i32 : i32, i32, i32
  }
}

module attributes {stable_mosaic.version = 11 : i64} {
  func.func @_bn_stats_kernel(%arg0: i32, %arg1: memref<32x32xf32, #tpu.memory_space<vmem>>, %arg2: memref<2x32xf32, #tpu.memory_space<vmem>>) attributes {dimension_semantics = [#tpu.dimension_semantics<arbitrary>], iteration_bounds = array<i64: 1>, scalar_prefetch = 0 : i64, scratch_operands = 0 : i64, tpu.core_type = #tpu.core_type<tc>, window_params = [{transform_indices = @transform_0, window_bounds = array<i64: 32, 32>}, {pipeline_mode = #tpu.pipeline_mode<synchronous>, transform_indices = @transform_1, window_bounds = array<i64: 2, 32>}]} {
    %c0_i32 = arith.constant 0 : i32
    %0 = arith.cmpi eq, %arg0, %c0_i32 : i32
    %1 = arith.extui %0 : i1 to i32
    %c0_i32_0 = arith.constant 0 : i32
    %2 = arith.cmpi ne, %1, %c0_i32_0 : i32
    scf.if %2 {
      %cst_7 = arith.constant 0.000000e+00 : f32
      %13 = vector.broadcast %cst_7 : f32 to vector<2x32xf32>
      %c0_8 = arith.constant 0 : index
      %c0_9 = arith.constant 0 : index
      %14 = vector.load %arg2[%c0_8, %c0_9] : memref<2x32xf32, #tpu.memory_space<vmem>>, vector<2x32xf32>
      tpu.vector_store %arg2[%c0_8, %c0_9], %13 {strides = array<i32>} : memref<2x32xf32, #tpu.memory_space<vmem>>, vector<2x32xf32>,
    } else {
    }
    %c0 = arith.constant 0 : index
    %c0_1 = arith.constant 0 : index
    %3 = vector.load %arg1[%c0, %c0_1] : memref<32x32xf32, #tpu.memory_space<vmem>>, vector<32x32xf32>
    %cst = arith.constant dense<0.000000e+00> : vector<32xf32>
    %4 = vector.multi_reduction <add>, %3, %cst [0] : vector<32x32xf32> to vector<32xf32>
    %5 = vector.shape_cast %4 : vector<32xf32> to vector<1x32xf32>
    %6 = arith.mulf %3, %3 : vector<32x32xf32>
    %cst_2 = arith.constant dense<0.000000e+00> : vector<32xf32>
    %7 = vector.multi_reduction <add>, %6, %cst_2 [0] : vector<32x32xf32> to vector<32xf32>
    %8 = vector.shape_cast %7 : vector<32xf32> to vector<1x32xf32>
    %9 = tpu.concatenate %5, %8 in 0 : vector<1x32xf32>, vector<1x32xf32> -> vector<2x32xf32>
    %c0_3 = arith.constant 0 : index
    %c0_4 = arith.constant 0 : index
    %10 = vector.load %arg2[%c0_3, %c0_4] : memref<2x32xf32, #tpu.memory_space<vmem>>, vector<2x32xf32>
    %11 = arith.addf %10, %9 : vector<2x32xf32>
    %c0_5 = arith.constant 0 : index
    %c0_6 = arith.constant 0 : index
    %12 = vector.load %arg2[%c0_5, %c0_6] : memref<2x32xf32, #tpu.memory_space<vmem>>, vector<2x32xf32>
    tpu.vector_store %arg2[%c0_5, %c0_6], %11 {strides = array<i32>} : memref<2x32xf32, #tpu.memory_space<vmem>>, vector<2x32xf32>,
    return
  }
  func.func @transform_0(%arg0: i32) -> (i32, i32) {
    %c0_i32 = arith.constant 0 : i32
    %c0_i32_0 = arith.constant 0 : i32
    return %arg0, %c0_i32 : i32, i32
  }
  func.func @transform_1(%arg0: i32) -> (i32, i32) {
    %c0_i32 = arith.constant 0 : i32
    %c0_i32_0 = arith.constant 0 : i32
    %c0_i32_1 = arith.constant 0 : i32
    return %c0_i32, %c0_i32_0 : i32, i32
  }
}

module attributes {stable_mosaic.version = 11 : i64} {
  func.func @_bn_apply_kernel(%arg0: i32, %arg1: memref<32x32xf32, #tpu.memory_space<vmem>>, %arg2: memref<1x32xf32, #tpu.memory_space<vmem>>, %arg3: memref<1x32xf32, #tpu.memory_space<vmem>>, %arg4: memref<32x32xf32, #tpu.memory_space<vmem>>) attributes {dimension_semantics = [#tpu.dimension_semantics<parallel>], iteration_bounds = array<i64: 1>, scalar_prefetch = 0 : i64, scratch_operands = 0 : i64, tpu.core_type = #tpu.core_type<tc>, window_params = [{transform_indices = @transform_0, window_bounds = array<i64: 32, 32>}, {pipeline_mode = #tpu.pipeline_mode<synchronous>, transform_indices = @transform_1, window_bounds = array<i64: 1, 32>}, {pipeline_mode = #tpu.pipeline_mode<synchronous>, transform_indices = @transform_2, window_bounds = array<i64: 1, 32>}, {transform_indices = @transform_3, window_bounds = array<i64: 32, 32>}]} {
    %c0 = arith.constant 0 : index
    %c0_0 = arith.constant 0 : index
    %0 = vector.load %arg1[%c0, %c0_0] : memref<32x32xf32, #tpu.memory_space<vmem>>, vector<32x32xf32>
    %c0_1 = arith.constant 0 : index
    %c0_2 = arith.constant 0 : index
    %1 = vector.load %arg2[%c0_1, %c0_2] : memref<1x32xf32, #tpu.memory_space<vmem>>, vector<1x32xf32>
    %2 = vector.broadcast %1 : vector<1x32xf32> to vector<32x32xf32>
    %3 = arith.mulf %0, %2 : vector<32x32xf32>
    %c0_3 = arith.constant 0 : index
    %c0_4 = arith.constant 0 : index
    %4 = vector.load %arg3[%c0_3, %c0_4] : memref<1x32xf32, #tpu.memory_space<vmem>>, vector<1x32xf32>
    %5 = vector.broadcast %4 : vector<1x32xf32> to vector<32x32xf32>
    %6 = arith.addf %3, %5 : vector<32x32xf32>
    %c0_5 = arith.constant 0 : index
    %c0_6 = arith.constant 0 : index
    %7 = vector.load %arg4[%c0_5, %c0_6] : memref<32x32xf32, #tpu.memory_space<vmem>>, vector<32x32xf32>
    tpu.vector_store %arg4[%c0_5, %c0_6], %6 {strides = array<i32>} : memref<32x32xf32, #tpu.memory_space<vmem>>, vector<32x32xf32>,
    return
  }
  func.func @transform_0(%arg0: i32) -> (i32, i32) {
    %c0_i32 = arith.constant 0 : i32
    %c0_i32_0 = arith.constant 0 : i32
    return %arg0, %c0_i32 : i32, i32
  }
  func.func @transform_1(%arg0: i32) -> (i32, i32) {
    %c0_i32 = arith.constant 0 : i32
    %c0_i32_0 = arith.constant 0 : i32
    %c0_i32_1 = arith.constant 0 : i32
    return %c0_i32, %c0_i32_0 : i32, i32
  }
  func.func @transform_2(%arg0: i32) -> (i32, i32) {
    %c0_i32 = arith.constant 0 : i32
    %c0_i32_0 = arith.constant 0 : i32
    %c0_i32_1 = arith.constant 0 : i32
    return %c0_i32, %c0_i32_0 : i32, i32
  }
  func.func @transform_3(%arg0: i32) -> (i32, i32) {
    %c0_i32 = arith.constant 0 : i32
    %c0_i32_0 = arith.constant 0 : i32
    return %arg0, %c0_i32 : i32, i32
  }
}

module attributes {stable_mosaic.version = 11 : i64} {
  func.func @_bn_stats_kernel(%arg0: i32, %arg1: memref<8x64xf32, #tpu.memory_space<vmem>>, %arg2: memref<2x64xf32, #tpu.memory_space<vmem>>) attributes {dimension_semantics = [#tpu.dimension_semantics<arbitrary>], iteration_bounds = array<i64: 1>, scalar_prefetch = 0 : i64, scratch_operands = 0 : i64, tpu.core_type = #tpu.core_type<tc>, window_params = [{transform_indices = @transform_0, window_bounds = array<i64: 8, 64>}, {pipeline_mode = #tpu.pipeline_mode<synchronous>, transform_indices = @transform_1, window_bounds = array<i64: 2, 64>}]} {
    %c0_i32 = arith.constant 0 : i32
    %0 = arith.cmpi eq, %arg0, %c0_i32 : i32
    %1 = arith.extui %0 : i1 to i32
    %c0_i32_0 = arith.constant 0 : i32
    %2 = arith.cmpi ne, %1, %c0_i32_0 : i32
    scf.if %2 {
      %cst_7 = arith.constant 0.000000e+00 : f32
      %13 = vector.broadcast %cst_7 : f32 to vector<2x64xf32>
      %c0_8 = arith.constant 0 : index
      %c0_9 = arith.constant 0 : index
      %14 = vector.load %arg2[%c0_8, %c0_9] : memref<2x64xf32, #tpu.memory_space<vmem>>, vector<2x64xf32>
      tpu.vector_store %arg2[%c0_8, %c0_9], %13 {strides = array<i32>} : memref<2x64xf32, #tpu.memory_space<vmem>>, vector<2x64xf32>,
    } else {
    }
    %c0 = arith.constant 0 : index
    %c0_1 = arith.constant 0 : index
    %3 = vector.load %arg1[%c0, %c0_1] : memref<8x64xf32, #tpu.memory_space<vmem>>, vector<8x64xf32>
    %cst = arith.constant dense<0.000000e+00> : vector<64xf32>
    %4 = vector.multi_reduction <add>, %3, %cst [0] : vector<8x64xf32> to vector<64xf32>
    %5 = vector.shape_cast %4 : vector<64xf32> to vector<1x64xf32>
    %6 = arith.mulf %3, %3 : vector<8x64xf32>
    %cst_2 = arith.constant dense<0.000000e+00> : vector<64xf32>
    %7 = vector.multi_reduction <add>, %6, %cst_2 [0] : vector<8x64xf32> to vector<64xf32>
    %8 = vector.shape_cast %7 : vector<64xf32> to vector<1x64xf32>
    %9 = tpu.concatenate %5, %8 in 0 : vector<1x64xf32>, vector<1x64xf32> -> vector<2x64xf32>
    %c0_3 = arith.constant 0 : index
    %c0_4 = arith.constant 0 : index
    %10 = vector.load %arg2[%c0_3, %c0_4] : memref<2x64xf32, #tpu.memory_space<vmem>>, vector<2x64xf32>
    %11 = arith.addf %10, %9 : vector<2x64xf32>
    %c0_5 = arith.constant 0 : index
    %c0_6 = arith.constant 0 : index
    %12 = vector.load %arg2[%c0_5, %c0_6] : memref<2x64xf32, #tpu.memory_space<vmem>>, vector<2x64xf32>
    tpu.vector_store %arg2[%c0_5, %c0_6], %11 {strides = array<i32>} : memref<2x64xf32, #tpu.memory_space<vmem>>, vector<2x64xf32>,
    return
  }
  func.func @transform_0(%arg0: i32) -> (i32, i32) {
    %c0_i32 = arith.constant 0 : i32
    %c0_i32_0 = arith.constant 0 : i32
    return %arg0, %c0_i32 : i32, i32
  }
  func.func @transform_1(%arg0: i32) -> (i32, i32) {
    %c0_i32 = arith.constant 0 : i32
    %c0_i32_0 = arith.constant 0 : i32
    %c0_i32_1 = arith.constant 0 : i32
    return %c0_i32, %c0_i32_0 : i32, i32
  }
}

module attributes {stable_mosaic.version = 11 : i64} {
  func.func @_bn_apply_kernel(%arg0: i32, %arg1: memref<8x64xf32, #tpu.memory_space<vmem>>, %arg2: memref<1x64xf32, #tpu.memory_space<vmem>>, %arg3: memref<1x64xf32, #tpu.memory_space<vmem>>, %arg4: memref<8x64xf32, #tpu.memory_space<vmem>>) attributes {dimension_semantics = [#tpu.dimension_semantics<parallel>], iteration_bounds = array<i64: 1>, scalar_prefetch = 0 : i64, scratch_operands = 0 : i64, tpu.core_type = #tpu.core_type<tc>, window_params = [{transform_indices = @transform_0, window_bounds = array<i64: 8, 64>}, {pipeline_mode = #tpu.pipeline_mode<synchronous>, transform_indices = @transform_1, window_bounds = array<i64: 1, 64>}, {pipeline_mode = #tpu.pipeline_mode<synchronous>, transform_indices = @transform_2, window_bounds = array<i64: 1, 64>}, {transform_indices = @transform_3, window_bounds = array<i64: 8, 64>}]} {
    %c0 = arith.constant 0 : index
    %c0_0 = arith.constant 0 : index
    %0 = vector.load %arg1[%c0, %c0_0] : memref<8x64xf32, #tpu.memory_space<vmem>>, vector<8x64xf32>
    %c0_1 = arith.constant 0 : index
    %c0_2 = arith.constant 0 : index
    %1 = vector.load %arg2[%c0_1, %c0_2] : memref<1x64xf32, #tpu.memory_space<vmem>>, vector<1x64xf32>
    %2 = vector.broadcast %1 : vector<1x64xf32> to vector<8x64xf32>
    %3 = arith.mulf %0, %2 : vector<8x64xf32>
    %c0_3 = arith.constant 0 : index
    %c0_4 = arith.constant 0 : index
    %4 = vector.load %arg3[%c0_3, %c0_4] : memref<1x64xf32, #tpu.memory_space<vmem>>, vector<1x64xf32>
    %5 = vector.broadcast %4 : vector<1x64xf32> to vector<8x64xf32>
    %6 = arith.addf %3, %5 : vector<8x64xf32>
    %c0_5 = arith.constant 0 : index
    %c0_6 = arith.constant 0 : index
    %7 = vector.load %arg4[%c0_5, %c0_6] : memref<8x64xf32, #tpu.memory_space<vmem>>, vector<8x64xf32>
    tpu.vector_store %arg4[%c0_5, %c0_6], %6 {strides = array<i32>} : memref<8x64xf32, #tpu.memory_space<vmem>>, vector<8x64xf32>,
    return
  }
  func.func @transform_0(%arg0: i32) -> (i32, i32) {
    %c0_i32 = arith.constant 0 : i32
    %c0_i32_0 = arith.constant 0 : i32
    return %arg0, %c0_i32 : i32, i32
  }
  func.func @transform_1(%arg0: i32) -> (i32, i32) {
    %c0_i32 = arith.constant 0 : i32
    %c0_i32_0 = arith.constant 0 : i32
    %c0_i32_1 = arith.constant 0 : i32
    return %c0_i32, %c0_i32_0 : i32, i32
  }
  func.func @transform_2(%arg0: i32) -> (i32, i32) {
    %c0_i32 = arith.constant 0 : i32
    %c0_i32_0 = arith.constant 0 : i32
    %c0_i32_1 = arith.constant 0 : i32
    return %c0_i32, %c0_i32_0 : i32, i32
  }
  func.func @transform_3(%arg0: i32) -> (i32, i32) {
    %c0_i32 = arith.constant 0 : i32
    %c0_i32_0 = arith.constant 0 : i32
    return %arg0, %c0_i32 : i32, i32
  }
}

module attributes {stable_mosaic.version = 11 : i64} {
  func.func @_mm_kernel(%arg0: i32, %arg1: i32, %arg2: i32, %arg3: memref<1x16x512xbf16, #tpu.memory_space<vmem>>, %arg4: memref<1x512x128xbf16, #tpu.memory_space<vmem>>, %arg5: memref<1x128xf32, #tpu.memory_space<vmem>>, %arg6: memref<1x16x128xf32, #tpu.memory_space<vmem>>, %arg7: memref<16x128xf32, #tpu.memory_space<vmem>>) attributes {dimension_semantics = [#tpu.dimension_semantics<parallel>, #tpu.dimension_semantics<parallel>, #tpu.dimension_semantics<arbitrary>], iteration_bounds = array<i64: 1, 1, 1>, scalar_prefetch = 0 : i64, scratch_operands = 1 : i64, tpu.core_type = #tpu.core_type<tc>, window_params = [{transform_indices = @transform_0, window_bounds = array<i64: 1, 16, 512>}, {transform_indices = @transform_1, window_bounds = array<i64: 1, 512, 128>}, {pipeline_mode = #tpu.pipeline_mode<synchronous>, transform_indices = @transform_2, window_bounds = array<i64: 1, 128>}, {transform_indices = @transform_3, window_bounds = array<i64: 1, 16, 128>}]} {
    %c0_i32 = arith.constant 0 : i32
    %0 = arith.cmpi eq, %arg2, %c0_i32 : i32
    %1 = arith.extui %0 : i1 to i32
    %c0_i32_0 = arith.constant 0 : i32
    %2 = arith.cmpi ne, %1, %c0_i32_0 : i32
    scf.if %2 {
      %cst_12 = arith.constant 0.000000e+00 : f32
      %14 = vector.broadcast %cst_12 : f32 to vector<16x128xf32>
      %c0_13 = arith.constant 0 : index
      %c0_14 = arith.constant 0 : index
      %15 = vector.load %arg7[%c0_13, %c0_14] : memref<16x128xf32, #tpu.memory_space<vmem>>, vector<16x128xf32>
      tpu.vector_store %arg7[%c0_13, %c0_14], %14 {strides = array<i32>} : memref<16x128xf32, #tpu.memory_space<vmem>>, vector<16x128xf32>,
    } else {
    }
    %c0 = arith.constant 0 : index
    %c0_1 = arith.constant 0 : index
    %3 = vector.load %arg7[%c0, %c0_1] : memref<16x128xf32, #tpu.memory_space<vmem>>, vector<16x128xf32>
    %c0_2 = arith.constant 0 : index
    %c0_3 = arith.constant 0 : index
    %c0_4 = arith.constant 0 : index
    %4 = vector.load %arg3[%c0_2, %c0_3, %c0_4] : memref<1x16x512xbf16, #tpu.memory_space<vmem>>, vector<1x16x512xbf16>
    %5 = vector.shape_cast %4 : vector<1x16x512xbf16> to vector<16x512xbf16>
    %c0_5 = arith.constant 0 : index
    %c0_6 = arith.constant 0 : index
    %c0_7 = arith.constant 0 : index
    %6 = vector.load %arg4[%c0_5, %c0_6, %c0_7] : memref<1x512x128xbf16, #tpu.memory_space<vmem>>, vector<1x512x128xbf16>
    %7 = vector.shape_cast %6 : vector<1x512x128xbf16> to vector<512x128xbf16>
    %cst = arith.constant dense<0.000000e+00> : vector<16x128xf32>
    %8 = tpu.matmul %5, %7, %cst {dimension_numbers = #tpu.dot_dimension_numbers<[1], [0], [0], [1], [0, 0, 1, 1], [], []>} : vector<16x512xbf16>, vector<512x128xbf16>, vector<16x128xf32> -> vector<16x128xf32>
    %9 = arith.addf %3, %8 : vector<16x128xf32>
    %c0_8 = arith.constant 0 : index
    %c0_9 = arith.constant 0 : index
    %10 = vector.load %arg7[%c0_8, %c0_9] : memref<16x128xf32, #tpu.memory_space<vmem>>, vector<16x128xf32>
    tpu.vector_store %arg7[%c0_8, %c0_9], %9 {strides = array<i32>} : memref<16x128xf32, #tpu.memory_space<vmem>>, vector<16x128xf32>,
    %c0_i32_10 = arith.constant 0 : i32
    %11 = arith.cmpi eq, %arg2, %c0_i32_10 : i32
    %12 = arith.extui %11 : i1 to i32
    %c0_i32_11 = arith.constant 0 : i32
    %13 = arith.cmpi ne, %12, %c0_i32_11 : i32
    scf.if %13 {
      %c0_12 = arith.constant 0 : index
      %c0_13 = arith.constant 0 : index
      %14 = vector.load %arg7[%c0_12, %c0_13] : memref<16x128xf32, #tpu.memory_space<vmem>>, vector<16x128xf32>
      %c0_14 = arith.constant 0 : index
      %c0_15 = arith.constant 0 : index
      %15 = vector.load %arg5[%c0_14, %c0_15] : memref<1x128xf32, #tpu.memory_space<vmem>>, vector<1x128xf32>
      %16 = vector.broadcast %15 : vector<1x128xf32> to vector<16x128xf32>
      %17 = arith.addf %14, %16 : vector<16x128xf32>
      %c0_16 = arith.constant 0 : index
      %c0_17 = arith.constant 0 : index
      %c0_18 = arith.constant 0 : index
      %18 = vector.load %arg6[%c0_16, %c0_17, %c0_18] : memref<1x16x128xf32, #tpu.memory_space<vmem>>, vector<1x16x128xf32>
      %19 = vector.shape_cast %18 : vector<1x16x128xf32> to vector<16x128xf32>
      %20 = vector.shape_cast %17 : vector<16x128xf32> to vector<1x16x128xf32>
      tpu.vector_store %arg6[%c0_16, %c0_17, %c0_18], %20 {strides = array<i32>} : memref<1x16x128xf32, #tpu.memory_space<vmem>>, vector<1x16x128xf32>,
    } else {
    }
    return
  }
  func.func @transform_0(%arg0: i32, %arg1: i32, %arg2: i32) -> (i32, i32, i32) {
    %c0_i32 = arith.constant 0 : i32
    return %arg0, %arg1, %arg2 : i32, i32, i32
  }
  func.func @transform_1(%arg0: i32, %arg1: i32, %arg2: i32) -> (i32, i32, i32) {
    %c0_i32 = arith.constant 0 : i32
    %c0_i32_0 = arith.constant 0 : i32
    return %arg0, %arg2, %c0_i32 : i32, i32, i32
  }
  func.func @transform_2(%arg0: i32, %arg1: i32, %arg2: i32) -> (i32, i32) {
    %c0_i32 = arith.constant 0 : i32
    %c0_i32_0 = arith.constant 0 : i32
    %c0_i32_1 = arith.constant 0 : i32
    return %c0_i32, %c0_i32_0 : i32, i32
  }
  func.func @transform_3(%arg0: i32, %arg1: i32, %arg2: i32) -> (i32, i32, i32) {
    %c0_i32 = arith.constant 0 : i32
    %c0_i32_0 = arith.constant 0 : i32
    return %arg0, %arg1, %c0_i32 : i32, i32, i32
  }
}

module attributes {stable_mosaic.version = 11 : i64} {
  func.func @_mm_kernel(%arg0: i32, %arg1: i32, %arg2: i32, %arg3: memref<1x16x512xbf16, #tpu.memory_space<vmem>>, %arg4: memref<1x512x128xbf16, #tpu.memory_space<vmem>>, %arg5: memref<1x128xf32, #tpu.memory_space<vmem>>, %arg6: memref<1x16x128xf32, #tpu.memory_space<vmem>>, %arg7: memref<16x128xf32, #tpu.memory_space<vmem>>) attributes {dimension_semantics = [#tpu.dimension_semantics<parallel>, #tpu.dimension_semantics<parallel>, #tpu.dimension_semantics<arbitrary>], iteration_bounds = array<i64: 1, 1, 2>, scalar_prefetch = 0 : i64, scratch_operands = 1 : i64, tpu.core_type = #tpu.core_type<tc>, window_params = [{transform_indices = @transform_0, window_bounds = array<i64: 1, 16, 512>}, {transform_indices = @transform_1, window_bounds = array<i64: 1, 512, 128>}, {pipeline_mode = #tpu.pipeline_mode<synchronous>, transform_indices = @transform_2, window_bounds = array<i64: 1, 128>}, {transform_indices = @transform_3, window_bounds = array<i64: 1, 16, 128>}]} {
    %c0_i32 = arith.constant 0 : i32
    %0 = arith.cmpi eq, %arg2, %c0_i32 : i32
    %1 = arith.extui %0 : i1 to i32
    %c0_i32_0 = arith.constant 0 : i32
    %2 = arith.cmpi ne, %1, %c0_i32_0 : i32
    scf.if %2 {
      %cst_11 = arith.constant 0.000000e+00 : f32
      %14 = vector.broadcast %cst_11 : f32 to vector<16x128xf32>
      %c0_12 = arith.constant 0 : index
      %c0_13 = arith.constant 0 : index
      %15 = vector.load %arg7[%c0_12, %c0_13] : memref<16x128xf32, #tpu.memory_space<vmem>>, vector<16x128xf32>
      tpu.vector_store %arg7[%c0_12, %c0_13], %14 {strides = array<i32>} : memref<16x128xf32, #tpu.memory_space<vmem>>, vector<16x128xf32>,
    } else {
    }
    %c0 = arith.constant 0 : index
    %c0_1 = arith.constant 0 : index
    %3 = vector.load %arg7[%c0, %c0_1] : memref<16x128xf32, #tpu.memory_space<vmem>>, vector<16x128xf32>
    %c0_2 = arith.constant 0 : index
    %c0_3 = arith.constant 0 : index
    %c0_4 = arith.constant 0 : index
    %4 = vector.load %arg3[%c0_2, %c0_3, %c0_4] : memref<1x16x512xbf16, #tpu.memory_space<vmem>>, vector<1x16x512xbf16>
    %5 = vector.shape_cast %4 : vector<1x16x512xbf16> to vector<16x512xbf16>
    %c0_5 = arith.constant 0 : index
    %c0_6 = arith.constant 0 : index
    %c0_7 = arith.constant 0 : index
    %6 = vector.load %arg4[%c0_5, %c0_6, %c0_7] : memref<1x512x128xbf16, #tpu.memory_space<vmem>>, vector<1x512x128xbf16>
    %7 = vector.shape_cast %6 : vector<1x512x128xbf16> to vector<512x128xbf16>
    %cst = arith.constant dense<0.000000e+00> : vector<16x128xf32>
    %8 = tpu.matmul %5, %7, %cst {dimension_numbers = #tpu.dot_dimension_numbers<[1], [0], [0], [1], [0, 0, 1, 1], [], []>} : vector<16x512xbf16>, vector<512x128xbf16>, vector<16x128xf32> -> vector<16x128xf32>
    %9 = arith.addf %3, %8 : vector<16x128xf32>
    %c0_8 = arith.constant 0 : index
    %c0_9 = arith.constant 0 : index
    %10 = vector.load %arg7[%c0_8, %c0_9] : memref<16x128xf32, #tpu.memory_space<vmem>>, vector<16x128xf32>
    tpu.vector_store %arg7[%c0_8, %c0_9], %9 {strides = array<i32>} : memref<16x128xf32, #tpu.memory_space<vmem>>, vector<16x128xf32>,
    %c1_i32 = arith.constant 1 : i32
    %11 = arith.cmpi eq, %arg2, %c1_i32 : i32
    %12 = arith.extui %11 : i1 to i32
    %c0_i32_10 = arith.constant 0 : i32
    %13 = arith.cmpi ne, %12, %c0_i32_10 : i32
    scf.if %13 {
      %c0_11 = arith.constant 0 : index
      %c0_12 = arith.constant 0 : index
      %14 = vector.load %arg7[%c0_11, %c0_12] : memref<16x128xf32, #tpu.memory_space<vmem>>, vector<16x128xf32>
      %c0_13 = arith.constant 0 : index
      %c0_14 = arith.constant 0 : index
      %15 = vector.load %arg5[%c0_13, %c0_14] : memref<1x128xf32, #tpu.memory_space<vmem>>, vector<1x128xf32>
      %16 = vector.broadcast %15 : vector<1x128xf32> to vector<16x128xf32>
      %17 = arith.addf %14, %16 : vector<16x128xf32>
      %c0_15 = arith.constant 0 : index
      %c0_16 = arith.constant 0 : index
      %c0_17 = arith.constant 0 : index
      %18 = vector.load %arg6[%c0_15, %c0_16, %c0_17] : memref<1x16x128xf32, #tpu.memory_space<vmem>>, vector<1x16x128xf32>
      %19 = vector.shape_cast %18 : vector<1x16x128xf32> to vector<16x128xf32>
      %20 = vector.shape_cast %17 : vector<16x128xf32> to vector<1x16x128xf32>
      tpu.vector_store %arg6[%c0_15, %c0_16, %c0_17], %20 {strides = array<i32>} : memref<1x16x128xf32, #tpu.memory_space<vmem>>, vector<1x16x128xf32>,
    } else {
    }
    return
  }
  func.func @transform_0(%arg0: i32, %arg1: i32, %arg2: i32) -> (i32, i32, i32) {
    %c0_i32 = arith.constant 0 : i32
    return %arg0, %arg1, %arg2 : i32, i32, i32
  }
  func.func @transform_1(%arg0: i32, %arg1: i32, %arg2: i32) -> (i32, i32, i32) {
    %c0_i32 = arith.constant 0 : i32
    %c0_i32_0 = arith.constant 0 : i32
    return %arg0, %arg2, %c0_i32 : i32, i32, i32
  }
  func.func @transform_2(%arg0: i32, %arg1: i32, %arg2: i32) -> (i32, i32) {
    %c0_i32 = arith.constant 0 : i32
    %c0_i32_0 = arith.constant 0 : i32
    %c0_i32_1 = arith.constant 0 : i32
    return %c0_i32, %c0_i32_0 : i32, i32
  }
  func.func @transform_3(%arg0: i32, %arg1: i32, %arg2: i32) -> (i32, i32, i32) {
    %c0_i32 = arith.constant 0 : i32
    %c0_i32_0 = arith.constant 0 : i32
    return %arg0, %arg1, %c0_i32 : i32, i32, i32
  }
}

module attributes {stable_mosaic.version = 11 : i64} {
  func.func @_mm_kernel(%arg0: i32, %arg1: i32, %arg2: i32, %arg3: memref<1x16x256xbf16, #tpu.memory_space<vmem>>, %arg4: memref<1x256x128xbf16, #tpu.memory_space<vmem>>, %arg5: memref<1x128xf32, #tpu.memory_space<vmem>>, %arg6: memref<1x16x128xf32, #tpu.memory_space<vmem>>, %arg7: memref<16x128xf32, #tpu.memory_space<vmem>>) attributes {dimension_semantics = [#tpu.dimension_semantics<parallel>, #tpu.dimension_semantics<parallel>, #tpu.dimension_semantics<arbitrary>], iteration_bounds = array<i64: 4, 1, 1>, scalar_prefetch = 0 : i64, scratch_operands = 1 : i64, tpu.core_type = #tpu.core_type<tc>, window_params = [{transform_indices = @transform_0, window_bounds = array<i64: 1, 16, 256>}, {transform_indices = @transform_1, window_bounds = array<i64: 1, 256, 128>}, {pipeline_mode = #tpu.pipeline_mode<synchronous>, transform_indices = @transform_2, window_bounds = array<i64: 1, 128>}, {transform_indices = @transform_3, window_bounds = array<i64: 1, 16, 128>}]} {
    %c0_i32 = arith.constant 0 : i32
    %0 = arith.cmpi eq, %arg2, %c0_i32 : i32
    %1 = arith.extui %0 : i1 to i32
    %c0_i32_0 = arith.constant 0 : i32
    %2 = arith.cmpi ne, %1, %c0_i32_0 : i32
    scf.if %2 {
      %cst_12 = arith.constant 0.000000e+00 : f32
      %14 = vector.broadcast %cst_12 : f32 to vector<16x128xf32>
      %c0_13 = arith.constant 0 : index
      %c0_14 = arith.constant 0 : index
      %15 = vector.load %arg7[%c0_13, %c0_14] : memref<16x128xf32, #tpu.memory_space<vmem>>, vector<16x128xf32>
      tpu.vector_store %arg7[%c0_13, %c0_14], %14 {strides = array<i32>} : memref<16x128xf32, #tpu.memory_space<vmem>>, vector<16x128xf32>,
    } else {
    }
    %c0 = arith.constant 0 : index
    %c0_1 = arith.constant 0 : index
    %3 = vector.load %arg7[%c0, %c0_1] : memref<16x128xf32, #tpu.memory_space<vmem>>, vector<16x128xf32>
    %c0_2 = arith.constant 0 : index
    %c0_3 = arith.constant 0 : index
    %c0_4 = arith.constant 0 : index
    %4 = vector.load %arg3[%c0_2, %c0_3, %c0_4] : memref<1x16x256xbf16, #tpu.memory_space<vmem>>, vector<1x16x256xbf16>
    %5 = vector.shape_cast %4 : vector<1x16x256xbf16> to vector<16x256xbf16>
    %c0_5 = arith.constant 0 : index
    %c0_6 = arith.constant 0 : index
    %c0_7 = arith.constant 0 : index
    %6 = vector.load %arg4[%c0_5, %c0_6, %c0_7] : memref<1x256x128xbf16, #tpu.memory_space<vmem>>, vector<1x256x128xbf16>
    %7 = vector.shape_cast %6 : vector<1x256x128xbf16> to vector<256x128xbf16>
    %cst = arith.constant dense<0.000000e+00> : vector<16x128xf32>
    %8 = tpu.matmul %5, %7, %cst {dimension_numbers = #tpu.dot_dimension_numbers<[1], [0], [0], [1], [0, 0, 1, 1], [], []>} : vector<16x256xbf16>, vector<256x128xbf16>, vector<16x128xf32> -> vector<16x128xf32>
    %9 = arith.addf %3, %8 : vector<16x128xf32>
    %c0_8 = arith.constant 0 : index
    %c0_9 = arith.constant 0 : index
    %10 = vector.load %arg7[%c0_8, %c0_9] : memref<16x128xf32, #tpu.memory_space<vmem>>, vector<16x128xf32>
    tpu.vector_store %arg7[%c0_8, %c0_9], %9 {strides = array<i32>} : memref<16x128xf32, #tpu.memory_space<vmem>>, vector<16x128xf32>,
    %c0_i32_10 = arith.constant 0 : i32
    %11 = arith.cmpi eq, %arg2, %c0_i32_10 : i32
    %12 = arith.extui %11 : i1 to i32
    %c0_i32_11 = arith.constant 0 : i32
    %13 = arith.cmpi ne, %12, %c0_i32_11 : i32
    scf.if %13 {
      %c0_12 = arith.constant 0 : index
      %c0_13 = arith.constant 0 : index
      %14 = vector.load %arg7[%c0_12, %c0_13] : memref<16x128xf32, #tpu.memory_space<vmem>>, vector<16x128xf32>
      %c0_14 = arith.constant 0 : index
      %c0_15 = arith.constant 0 : index
      %15 = vector.load %arg5[%c0_14, %c0_15] : memref<1x128xf32, #tpu.memory_space<vmem>>, vector<1x128xf32>
      %16 = vector.broadcast %15 : vector<1x128xf32> to vector<16x128xf32>
      %17 = arith.addf %14, %16 : vector<16x128xf32>
      %c0_16 = arith.constant 0 : index
      %c0_17 = arith.constant 0 : index
      %c0_18 = arith.constant 0 : index
      %18 = vector.load %arg6[%c0_16, %c0_17, %c0_18] : memref<1x16x128xf32, #tpu.memory_space<vmem>>, vector<1x16x128xf32>
      %19 = vector.shape_cast %18 : vector<1x16x128xf32> to vector<16x128xf32>
      %20 = vector.shape_cast %17 : vector<16x128xf32> to vector<1x16x128xf32>
      tpu.vector_store %arg6[%c0_16, %c0_17, %c0_18], %20 {strides = array<i32>} : memref<1x16x128xf32, #tpu.memory_space<vmem>>, vector<1x16x128xf32>,
    } else {
    }
    return
  }
  func.func @transform_0(%arg0: i32, %arg1: i32, %arg2: i32) -> (i32, i32, i32) {
    %c0_i32 = arith.constant 0 : i32
    return %arg0, %arg1, %arg2 : i32, i32, i32
  }
  func.func @transform_1(%arg0: i32, %arg1: i32, %arg2: i32) -> (i32, i32, i32) {
    %c0_i32 = arith.constant 0 : i32
    %c0_i32_0 = arith.constant 0 : i32
    return %arg0, %arg2, %c0_i32 : i32, i32, i32
  }
  func.func @transform_2(%arg0: i32, %arg1: i32, %arg2: i32) -> (i32, i32) {
    %c0_i32 = arith.constant 0 : i32
    %c0_i32_0 = arith.constant 0 : i32
    %c0_i32_1 = arith.constant 0 : i32
    return %c0_i32, %c0_i32_0 : i32, i32
  }
  func.func @transform_3(%arg0: i32, %arg1: i32, %arg2: i32) -> (i32, i32, i32) {
    %c0_i32 = arith.constant 0 : i32
    %c0_i32_0 = arith.constant 0 : i32
    return %arg0, %arg1, %c0_i32 : i32, i32, i32
  }
}

module attributes {stable_mosaic.version = 11 : i64} {
  func.func @_mm_kernel(%arg0: i32, %arg1: i32, %arg2: i32, %arg3: memref<1x16x512xbf16, #tpu.memory_space<vmem>>, %arg4: memref<1x512x128xbf16, #tpu.memory_space<vmem>>, %arg5: memref<1x128xf32, #tpu.memory_space<vmem>>, %arg6: memref<1x16x128xf32, #tpu.memory_space<vmem>>, %arg7: memref<16x128xf32, #tpu.memory_space<vmem>>) attributes {dimension_semantics = [#tpu.dimension_semantics<parallel>, #tpu.dimension_semantics<parallel>, #tpu.dimension_semantics<arbitrary>], iteration_bounds = array<i64: 4, 1, 1>, scalar_prefetch = 0 : i64, scratch_operands = 1 : i64, tpu.core_type = #tpu.core_type<tc>, window_params = [{transform_indices = @transform_0, window_bounds = array<i64: 1, 16, 512>}, {transform_indices = @transform_1, window_bounds = array<i64: 1, 512, 128>}, {pipeline_mode = #tpu.pipeline_mode<synchronous>, transform_indices = @transform_2, window_bounds = array<i64: 1, 128>}, {transform_indices = @transform_3, window_bounds = array<i64: 1, 16, 128>}]} {
    %c0_i32 = arith.constant 0 : i32
    %0 = arith.cmpi eq, %arg2, %c0_i32 : i32
    %1 = arith.extui %0 : i1 to i32
    %c0_i32_0 = arith.constant 0 : i32
    %2 = arith.cmpi ne, %1, %c0_i32_0 : i32
    scf.if %2 {
      %cst_12 = arith.constant 0.000000e+00 : f32
      %14 = vector.broadcast %cst_12 : f32 to vector<16x128xf32>
      %c0_13 = arith.constant 0 : index
      %c0_14 = arith.constant 0 : index
      %15 = vector.load %arg7[%c0_13, %c0_14] : memref<16x128xf32, #tpu.memory_space<vmem>>, vector<16x128xf32>
      tpu.vector_store %arg7[%c0_13, %c0_14], %14 {strides = array<i32>} : memref<16x128xf32, #tpu.memory_space<vmem>>, vector<16x128xf32>,
    } else {
    }
    %c0 = arith.constant 0 : index
    %c0_1 = arith.constant 0 : index
    %3 = vector.load %arg7[%c0, %c0_1] : memref<16x128xf32, #tpu.memory_space<vmem>>, vector<16x128xf32>
    %c0_2 = arith.constant 0 : index
    %c0_3 = arith.constant 0 : index
    %c0_4 = arith.constant 0 : index
    %4 = vector.load %arg3[%c0_2, %c0_3, %c0_4] : memref<1x16x512xbf16, #tpu.memory_space<vmem>>, vector<1x16x512xbf16>
    %5 = vector.shape_cast %4 : vector<1x16x512xbf16> to vector<16x512xbf16>
    %c0_5 = arith.constant 0 : index
    %c0_6 = arith.constant 0 : index
    %c0_7 = arith.constant 0 : index
    %6 = vector.load %arg4[%c0_5, %c0_6, %c0_7] : memref<1x512x128xbf16, #tpu.memory_space<vmem>>, vector<1x512x128xbf16>
    %7 = vector.shape_cast %6 : vector<1x512x128xbf16> to vector<512x128xbf16>
    %cst = arith.constant dense<0.000000e+00> : vector<16x128xf32>
    %8 = tpu.matmul %5, %7, %cst {dimension_numbers = #tpu.dot_dimension_numbers<[1], [0], [0], [1], [0, 0, 1, 1], [], []>} : vector<16x512xbf16>, vector<512x128xbf16>, vector<16x128xf32> -> vector<16x128xf32>
    %9 = arith.addf %3, %8 : vector<16x128xf32>
    %c0_8 = arith.constant 0 : index
    %c0_9 = arith.constant 0 : index
    %10 = vector.load %arg7[%c0_8, %c0_9] : memref<16x128xf32, #tpu.memory_space<vmem>>, vector<16x128xf32>
    tpu.vector_store %arg7[%c0_8, %c0_9], %9 {strides = array<i32>} : memref<16x128xf32, #tpu.memory_space<vmem>>, vector<16x128xf32>,
    %c0_i32_10 = arith.constant 0 : i32
    %11 = arith.cmpi eq, %arg2, %c0_i32_10 : i32
    %12 = arith.extui %11 : i1 to i32
    %c0_i32_11 = arith.constant 0 : i32
    %13 = arith.cmpi ne, %12, %c0_i32_11 : i32
    scf.if %13 {
      %c0_12 = arith.constant 0 : index
      %c0_13 = arith.constant 0 : index
      %14 = vector.load %arg7[%c0_12, %c0_13] : memref<16x128xf32, #tpu.memory_space<vmem>>, vector<16x128xf32>
      %c0_14 = arith.constant 0 : index
      %c0_15 = arith.constant 0 : index
      %15 = vector.load %arg5[%c0_14, %c0_15] : memref<1x128xf32, #tpu.memory_space<vmem>>, vector<1x128xf32>
      %16 = vector.broadcast %15 : vector<1x128xf32> to vector<16x128xf32>
      %17 = arith.addf %14, %16 : vector<16x128xf32>
      %c0_16 = arith.constant 0 : index
      %c0_17 = arith.constant 0 : index
      %c0_18 = arith.constant 0 : index
      %18 = vector.load %arg6[%c0_16, %c0_17, %c0_18] : memref<1x16x128xf32, #tpu.memory_space<vmem>>, vector<1x16x128xf32>
      %19 = vector.shape_cast %18 : vector<1x16x128xf32> to vector<16x128xf32>
      %20 = vector.shape_cast %17 : vector<16x128xf32> to vector<1x16x128xf32>
      tpu.vector_store %arg6[%c0_16, %c0_17, %c0_18], %20 {strides = array<i32>} : memref<1x16x128xf32, #tpu.memory_space<vmem>>, vector<1x16x128xf32>,
    } else {
    }
    return
  }
  func.func @transform_0(%arg0: i32, %arg1: i32, %arg2: i32) -> (i32, i32, i32) {
    %c0_i32 = arith.constant 0 : i32
    return %arg0, %arg1, %arg2 : i32, i32, i32
  }
  func.func @transform_1(%arg0: i32, %arg1: i32, %arg2: i32) -> (i32, i32, i32) {
    %c0_i32 = arith.constant 0 : i32
    %c0_i32_0 = arith.constant 0 : i32
    return %arg0, %arg2, %c0_i32 : i32, i32, i32
  }
  func.func @transform_2(%arg0: i32, %arg1: i32, %arg2: i32) -> (i32, i32) {
    %c0_i32 = arith.constant 0 : i32
    %c0_i32_0 = arith.constant 0 : i32
    %c0_i32_1 = arith.constant 0 : i32
    return %c0_i32, %c0_i32_0 : i32, i32
  }
  func.func @transform_3(%arg0: i32, %arg1: i32, %arg2: i32) -> (i32, i32, i32) {
    %c0_i32 = arith.constant 0 : i32
    %c0_i32_0 = arith.constant 0 : i32
    return %arg0, %arg1, %c0_i32 : i32, i32, i32
  }
}

module attributes {stable_mosaic.version = 11 : i64} {
  func.func @_mm_kernel(%arg0: i32, %arg1: i32, %arg2: i32, %arg3: memref<1x32x256xbf16, #tpu.memory_space<vmem>>, %arg4: memref<1x256x128xbf16, #tpu.memory_space<vmem>>, %arg5: memref<1x128xf32, #tpu.memory_space<vmem>>, %arg6: memref<1x32x128xf32, #tpu.memory_space<vmem>>, %arg7: memref<32x128xf32, #tpu.memory_space<vmem>>) attributes {dimension_semantics = [#tpu.dimension_semantics<parallel>, #tpu.dimension_semantics<parallel>, #tpu.dimension_semantics<arbitrary>], iteration_bounds = array<i64: 4, 1, 1>, scalar_prefetch = 0 : i64, scratch_operands = 1 : i64, tpu.core_type = #tpu.core_type<tc>, window_params = [{transform_indices = @transform_0, window_bounds = array<i64: 1, 32, 256>}, {transform_indices = @transform_1, window_bounds = array<i64: 1, 256, 128>}, {pipeline_mode = #tpu.pipeline_mode<synchronous>, transform_indices = @transform_2, window_bounds = array<i64: 1, 128>}, {transform_indices = @transform_3, window_bounds = array<i64: 1, 32, 128>}]} {
    %c0_i32 = arith.constant 0 : i32
    %0 = arith.cmpi eq, %arg2, %c0_i32 : i32
    %1 = arith.extui %0 : i1 to i32
    %c0_i32_0 = arith.constant 0 : i32
    %2 = arith.cmpi ne, %1, %c0_i32_0 : i32
    scf.if %2 {
      %cst_12 = arith.constant 0.000000e+00 : f32
      %14 = vector.broadcast %cst_12 : f32 to vector<32x128xf32>
      %c0_13 = arith.constant 0 : index
      %c0_14 = arith.constant 0 : index
      %15 = vector.load %arg7[%c0_13, %c0_14] : memref<32x128xf32, #tpu.memory_space<vmem>>, vector<32x128xf32>
      tpu.vector_store %arg7[%c0_13, %c0_14], %14 {strides = array<i32>} : memref<32x128xf32, #tpu.memory_space<vmem>>, vector<32x128xf32>,
    } else {
    }
    %c0 = arith.constant 0 : index
    %c0_1 = arith.constant 0 : index
    %3 = vector.load %arg7[%c0, %c0_1] : memref<32x128xf32, #tpu.memory_space<vmem>>, vector<32x128xf32>
    %c0_2 = arith.constant 0 : index
    %c0_3 = arith.constant 0 : index
    %c0_4 = arith.constant 0 : index
    %4 = vector.load %arg3[%c0_2, %c0_3, %c0_4] : memref<1x32x256xbf16, #tpu.memory_space<vmem>>, vector<1x32x256xbf16>
    %5 = vector.shape_cast %4 : vector<1x32x256xbf16> to vector<32x256xbf16>
    %c0_5 = arith.constant 0 : index
    %c0_6 = arith.constant 0 : index
    %c0_7 = arith.constant 0 : index
    %6 = vector.load %arg4[%c0_5, %c0_6, %c0_7] : memref<1x256x128xbf16, #tpu.memory_space<vmem>>, vector<1x256x128xbf16>
    %7 = vector.shape_cast %6 : vector<1x256x128xbf16> to vector<256x128xbf16>
    %cst = arith.constant dense<0.000000e+00> : vector<32x128xf32>
    %8 = tpu.matmul %5, %7, %cst {dimension_numbers = #tpu.dot_dimension_numbers<[1], [0], [0], [1], [0, 0, 1, 1], [], []>} : vector<32x256xbf16>, vector<256x128xbf16>, vector<32x128xf32> -> vector<32x128xf32>
    %9 = arith.addf %3, %8 : vector<32x128xf32>
    %c0_8 = arith.constant 0 : index
    %c0_9 = arith.constant 0 : index
    %10 = vector.load %arg7[%c0_8, %c0_9] : memref<32x128xf32, #tpu.memory_space<vmem>>, vector<32x128xf32>
    tpu.vector_store %arg7[%c0_8, %c0_9], %9 {strides = array<i32>} : memref<32x128xf32, #tpu.memory_space<vmem>>, vector<32x128xf32>,
    %c0_i32_10 = arith.constant 0 : i32
    %11 = arith.cmpi eq, %arg2, %c0_i32_10 : i32
    %12 = arith.extui %11 : i1 to i32
    %c0_i32_11 = arith.constant 0 : i32
    %13 = arith.cmpi ne, %12, %c0_i32_11 : i32
    scf.if %13 {
      %c0_12 = arith.constant 0 : index
      %c0_13 = arith.constant 0 : index
      %14 = vector.load %arg7[%c0_12, %c0_13] : memref<32x128xf32, #tpu.memory_space<vmem>>, vector<32x128xf32>
      %c0_14 = arith.constant 0 : index
      %c0_15 = arith.constant 0 : index
      %15 = vector.load %arg5[%c0_14, %c0_15] : memref<1x128xf32, #tpu.memory_space<vmem>>, vector<1x128xf32>
      %16 = vector.broadcast %15 : vector<1x128xf32> to vector<32x128xf32>
      %17 = arith.addf %14, %16 : vector<32x128xf32>
      %c0_16 = arith.constant 0 : index
      %c0_17 = arith.constant 0 : index
      %c0_18 = arith.constant 0 : index
      %18 = vector.load %arg6[%c0_16, %c0_17, %c0_18] : memref<1x32x128xf32, #tpu.memory_space<vmem>>, vector<1x32x128xf32>
      %19 = vector.shape_cast %18 : vector<1x32x128xf32> to vector<32x128xf32>
      %20 = vector.shape_cast %17 : vector<32x128xf32> to vector<1x32x128xf32>
      tpu.vector_store %arg6[%c0_16, %c0_17, %c0_18], %20 {strides = array<i32>} : memref<1x32x128xf32, #tpu.memory_space<vmem>>, vector<1x32x128xf32>,
    } else {
    }
    return
  }
  func.func @transform_0(%arg0: i32, %arg1: i32, %arg2: i32) -> (i32, i32, i32) {
    %c0_i32 = arith.constant 0 : i32
    return %arg0, %arg1, %arg2 : i32, i32, i32
  }
  func.func @transform_1(%arg0: i32, %arg1: i32, %arg2: i32) -> (i32, i32, i32) {
    %c0_i32 = arith.constant 0 : i32
    %c0_i32_0 = arith.constant 0 : i32
    return %arg0, %arg2, %c0_i32 : i32, i32, i32
  }
  func.func @transform_2(%arg0: i32, %arg1: i32, %arg2: i32) -> (i32, i32) {
    %c0_i32 = arith.constant 0 : i32
    %c0_i32_0 = arith.constant 0 : i32
    %c0_i32_1 = arith.constant 0 : i32
    return %c0_i32, %c0_i32_0 : i32, i32
  }
  func.func @transform_3(%arg0: i32, %arg1: i32, %arg2: i32) -> (i32, i32, i32) {
    %c0_i32 = arith.constant 0 : i32
    %c0_i32_0 = arith.constant 0 : i32
    return %arg0, %arg1, %c0_i32 : i32, i32, i32
  }
}

module attributes {stable_mosaic.version = 11 : i64} {
  func.func @_mm_kernel(%arg0: i32, %arg1: i32, %arg2: i32, %arg3: memref<1x128x128xbf16, #tpu.memory_space<vmem>>, %arg4: memref<1x128x128xbf16, #tpu.memory_space<vmem>>, %arg5: memref<1x128xf32, #tpu.memory_space<vmem>>, %arg6: memref<1x128x128xf32, #tpu.memory_space<vmem>>, %arg7: memref<128x128xf32, #tpu.memory_space<vmem>>) attributes {dimension_semantics = [#tpu.dimension_semantics<parallel>, #tpu.dimension_semantics<parallel>, #tpu.dimension_semantics<arbitrary>], iteration_bounds = array<i64: 4, 1, 1>, scalar_prefetch = 0 : i64, scratch_operands = 1 : i64, tpu.core_type = #tpu.core_type<tc>, window_params = [{transform_indices = @transform_0, window_bounds = array<i64: 1, 128, 128>}, {transform_indices = @transform_1, window_bounds = array<i64: 1, 128, 128>}, {pipeline_mode = #tpu.pipeline_mode<synchronous>, transform_indices = @transform_2, window_bounds = array<i64: 1, 128>}, {transform_indices = @transform_3, window_bounds = array<i64: 1, 128, 128>}]} {
    %c0_i32 = arith.constant 0 : i32
    %0 = arith.cmpi eq, %arg2, %c0_i32 : i32
    %1 = arith.extui %0 : i1 to i32
    %c0_i32_0 = arith.constant 0 : i32
    %2 = arith.cmpi ne, %1, %c0_i32_0 : i32
    scf.if %2 {
      %cst_12 = arith.constant 0.000000e+00 : f32
      %14 = vector.broadcast %cst_12 : f32 to vector<128x128xf32>
      %c0_13 = arith.constant 0 : index
      %c0_14 = arith.constant 0 : index
      %15 = vector.load %arg7[%c0_13, %c0_14] : memref<128x128xf32, #tpu.memory_space<vmem>>, vector<128x128xf32>
      tpu.vector_store %arg7[%c0_13, %c0_14], %14 {strides = array<i32>} : memref<128x128xf32, #tpu.memory_space<vmem>>, vector<128x128xf32>,
    } else {
    }
    %c0 = arith.constant 0 : index
    %c0_1 = arith.constant 0 : index
    %3 = vector.load %arg7[%c0, %c0_1] : memref<128x128xf32, #tpu.memory_space<vmem>>, vector<128x128xf32>
    %c0_2 = arith.constant 0 : index
    %c0_3 = arith.constant 0 : index
    %c0_4 = arith.constant 0 : index
    %4 = vector.load %arg3[%c0_2, %c0_3, %c0_4] : memref<1x128x128xbf16, #tpu.memory_space<vmem>>, vector<1x128x128xbf16>
    %5 = vector.shape_cast %4 : vector<1x128x128xbf16> to vector<128x128xbf16>
    %c0_5 = arith.constant 0 : index
    %c0_6 = arith.constant 0 : index
    %c0_7 = arith.constant 0 : index
    %6 = vector.load %arg4[%c0_5, %c0_6, %c0_7] : memref<1x128x128xbf16, #tpu.memory_space<vmem>>, vector<1x128x128xbf16>
    %7 = vector.shape_cast %6 : vector<1x128x128xbf16> to vector<128x128xbf16>
    %cst = arith.constant dense<0.000000e+00> : vector<128x128xf32>
    %8 = tpu.matmul %5, %7, %cst {dimension_numbers = #tpu.dot_dimension_numbers<[1], [0], [0], [1], [0, 0, 1, 1], [], []>} : vector<128x128xbf16>, vector<128x128xbf16>, vector<128x128xf32> -> vector<128x128xf32>
    %9 = arith.addf %3, %8 : vector<128x128xf32>
    %c0_8 = arith.constant 0 : index
    %c0_9 = arith.constant 0 : index
    %10 = vector.load %arg7[%c0_8, %c0_9] : memref<128x128xf32, #tpu.memory_space<vmem>>, vector<128x128xf32>
    tpu.vector_store %arg7[%c0_8, %c0_9], %9 {strides = array<i32>} : memref<128x128xf32, #tpu.memory_space<vmem>>, vector<128x128xf32>,
    %c0_i32_10 = arith.constant 0 : i32
    %11 = arith.cmpi eq, %arg2, %c0_i32_10 : i32
    %12 = arith.extui %11 : i1 to i32
    %c0_i32_11 = arith.constant 0 : i32
    %13 = arith.cmpi ne, %12, %c0_i32_11 : i32
    scf.if %13 {
      %c0_12 = arith.constant 0 : index
      %c0_13 = arith.constant 0 : index
      %14 = vector.load %arg7[%c0_12, %c0_13] : memref<128x128xf32, #tpu.memory_space<vmem>>, vector<128x128xf32>
      %c0_14 = arith.constant 0 : index
      %c0_15 = arith.constant 0 : index
      %15 = vector.load %arg5[%c0_14, %c0_15] : memref<1x128xf32, #tpu.memory_space<vmem>>, vector<1x128xf32>
      %16 = vector.broadcast %15 : vector<1x128xf32> to vector<128x128xf32>
      %17 = arith.addf %14, %16 : vector<128x128xf32>
      %c0_16 = arith.constant 0 : index
      %c0_17 = arith.constant 0 : index
      %c0_18 = arith.constant 0 : index
      %18 = vector.load %arg6[%c0_16, %c0_17, %c0_18] : memref<1x128x128xf32, #tpu.memory_space<vmem>>, vector<1x128x128xf32>
      %19 = vector.shape_cast %18 : vector<1x128x128xf32> to vector<128x128xf32>
      %20 = vector.shape_cast %17 : vector<128x128xf32> to vector<1x128x128xf32>
      tpu.vector_store %arg6[%c0_16, %c0_17, %c0_18], %20 {strides = array<i32>} : memref<1x128x128xf32, #tpu.memory_space<vmem>>, vector<1x128x128xf32>,
    } else {
    }
    return
  }
  func.func @transform_0(%arg0: i32, %arg1: i32, %arg2: i32) -> (i32, i32, i32) {
    %c0_i32 = arith.constant 0 : i32
    return %arg0, %arg1, %arg2 : i32, i32, i32
  }
  func.func @transform_1(%arg0: i32, %arg1: i32, %arg2: i32) -> (i32, i32, i32) {
    %c0_i32 = arith.constant 0 : i32
    %c0_i32_0 = arith.constant 0 : i32
    return %arg0, %arg2, %c0_i32 : i32, i32, i32
  }
  func.func @transform_2(%arg0: i32, %arg1: i32, %arg2: i32) -> (i32, i32) {
    %c0_i32 = arith.constant 0 : i32
    %c0_i32_0 = arith.constant 0 : i32
    %c0_i32_1 = arith.constant 0 : i32
    return %c0_i32, %c0_i32_0 : i32, i32
  }
  func.func @transform_3(%arg0: i32, %arg1: i32, %arg2: i32) -> (i32, i32, i32) {
    %c0_i32 = arith.constant 0 : i32
    %c0_i32_0 = arith.constant 0 : i32
    return %arg0, %arg1, %c0_i32 : i32, i32, i32
  }
}

module attributes {stable_mosaic.version = 11 : i64} {
  func.func @_bn_stats_kernel(%arg0: i32, %arg1: memref<512x8xf32, #tpu.memory_space<vmem>>, %arg2: memref<2x8xf32, #tpu.memory_space<vmem>>) attributes {dimension_semantics = [#tpu.dimension_semantics<arbitrary>], iteration_bounds = array<i64: 1>, scalar_prefetch = 0 : i64, scratch_operands = 0 : i64, tpu.core_type = #tpu.core_type<tc>, window_params = [{transform_indices = @transform_0, window_bounds = array<i64: 512, 8>}, {pipeline_mode = #tpu.pipeline_mode<synchronous>, transform_indices = @transform_1, window_bounds = array<i64: 2, 8>}]} {
    %c0_i32 = arith.constant 0 : i32
    %0 = arith.cmpi eq, %arg0, %c0_i32 : i32
    %1 = arith.extui %0 : i1 to i32
    %c0_i32_0 = arith.constant 0 : i32
    %2 = arith.cmpi ne, %1, %c0_i32_0 : i32
    scf.if %2 {
      %cst_7 = arith.constant 0.000000e+00 : f32
      %13 = vector.broadcast %cst_7 : f32 to vector<2x8xf32>
      %c0_8 = arith.constant 0 : index
      %c0_9 = arith.constant 0 : index
      %14 = vector.load %arg2[%c0_8, %c0_9] : memref<2x8xf32, #tpu.memory_space<vmem>>, vector<2x8xf32>
      tpu.vector_store %arg2[%c0_8, %c0_9], %13 {strides = array<i32>} : memref<2x8xf32, #tpu.memory_space<vmem>>, vector<2x8xf32>,
    } else {
    }
    %c0 = arith.constant 0 : index
    %c0_1 = arith.constant 0 : index
    %3 = vector.load %arg1[%c0, %c0_1] : memref<512x8xf32, #tpu.memory_space<vmem>>, vector<512x8xf32>
    %cst = arith.constant dense<0.000000e+00> : vector<8xf32>
    %4 = vector.multi_reduction <add>, %3, %cst [0] : vector<512x8xf32> to vector<8xf32>
    %5 = vector.shape_cast %4 : vector<8xf32> to vector<1x8xf32>
    %6 = arith.mulf %3, %3 : vector<512x8xf32>
    %cst_2 = arith.constant dense<0.000000e+00> : vector<8xf32>
    %7 = vector.multi_reduction <add>, %6, %cst_2 [0] : vector<512x8xf32> to vector<8xf32>
    %8 = vector.shape_cast %7 : vector<8xf32> to vector<1x8xf32>
    %9 = tpu.concatenate %5, %8 in 0 : vector<1x8xf32>, vector<1x8xf32> -> vector<2x8xf32>
    %c0_3 = arith.constant 0 : index
    %c0_4 = arith.constant 0 : index
    %10 = vector.load %arg2[%c0_3, %c0_4] : memref<2x8xf32, #tpu.memory_space<vmem>>, vector<2x8xf32>
    %11 = arith.addf %10, %9 : vector<2x8xf32>
    %c0_5 = arith.constant 0 : index
    %c0_6 = arith.constant 0 : index
    %12 = vector.load %arg2[%c0_5, %c0_6] : memref<2x8xf32, #tpu.memory_space<vmem>>, vector<2x8xf32>
    tpu.vector_store %arg2[%c0_5, %c0_6], %11 {strides = array<i32>} : memref<2x8xf32, #tpu.memory_space<vmem>>, vector<2x8xf32>,
    return
  }
  func.func @transform_0(%arg0: i32) -> (i32, i32) {
    %c0_i32 = arith.constant 0 : i32
    %c0_i32_0 = arith.constant 0 : i32
    return %arg0, %c0_i32 : i32, i32
  }
  func.func @transform_1(%arg0: i32) -> (i32, i32) {
    %c0_i32 = arith.constant 0 : i32
    %c0_i32_0 = arith.constant 0 : i32
    %c0_i32_1 = arith.constant 0 : i32
    return %c0_i32, %c0_i32_0 : i32, i32
  }
}

module attributes {stable_mosaic.version = 11 : i64} {
  func.func @_bn_apply_kernel(%arg0: i32, %arg1: memref<512x8xf32, #tpu.memory_space<vmem>>, %arg2: memref<1x8xf32, #tpu.memory_space<vmem>>, %arg3: memref<1x8xf32, #tpu.memory_space<vmem>>, %arg4: memref<512x8xf32, #tpu.memory_space<vmem>>) attributes {dimension_semantics = [#tpu.dimension_semantics<parallel>], iteration_bounds = array<i64: 1>, scalar_prefetch = 0 : i64, scratch_operands = 0 : i64, tpu.core_type = #tpu.core_type<tc>, window_params = [{transform_indices = @transform_0, window_bounds = array<i64: 512, 8>}, {pipeline_mode = #tpu.pipeline_mode<synchronous>, transform_indices = @transform_1, window_bounds = array<i64: 1, 8>}, {pipeline_mode = #tpu.pipeline_mode<synchronous>, transform_indices = @transform_2, window_bounds = array<i64: 1, 8>}, {transform_indices = @transform_3, window_bounds = array<i64: 512, 8>}]} {
    %c0 = arith.constant 0 : index
    %c0_0 = arith.constant 0 : index
    %0 = vector.load %arg1[%c0, %c0_0] : memref<512x8xf32, #tpu.memory_space<vmem>>, vector<512x8xf32>
    %c0_1 = arith.constant 0 : index
    %c0_2 = arith.constant 0 : index
    %1 = vector.load %arg2[%c0_1, %c0_2] : memref<1x8xf32, #tpu.memory_space<vmem>>, vector<1x8xf32>
    %2 = vector.broadcast %1 : vector<1x8xf32> to vector<512x8xf32>
    %3 = arith.mulf %0, %2 : vector<512x8xf32>
    %c0_3 = arith.constant 0 : index
    %c0_4 = arith.constant 0 : index
    %4 = vector.load %arg3[%c0_3, %c0_4] : memref<1x8xf32, #tpu.memory_space<vmem>>, vector<1x8xf32>
    %5 = vector.broadcast %4 : vector<1x8xf32> to vector<512x8xf32>
    %6 = arith.addf %3, %5 : vector<512x8xf32>
    %c0_5 = arith.constant 0 : index
    %c0_6 = arith.constant 0 : index
    %7 = vector.load %arg4[%c0_5, %c0_6] : memref<512x8xf32, #tpu.memory_space<vmem>>, vector<512x8xf32>
    tpu.vector_store %arg4[%c0_5, %c0_6], %6 {strides = array<i32>} : memref<512x8xf32, #tpu.memory_space<vmem>>, vector<512x8xf32>,
    return
  }
  func.func @transform_0(%arg0: i32) -> (i32, i32) {
    %c0_i32 = arith.constant 0 : i32
    %c0_i32_0 = arith.constant 0 : i32
    return %arg0, %c0_i32 : i32, i32
  }
  func.func @transform_1(%arg0: i32) -> (i32, i32) {
    %c0_i32 = arith.constant 0 : i32
    %c0_i32_0 = arith.constant 0 : i32
    %c0_i32_1 = arith.constant 0 : i32
    return %c0_i32, %c0_i32_0 : i32, i32
  }
  func.func @transform_2(%arg0: i32) -> (i32, i32) {
    %c0_i32 = arith.constant 0 : i32
    %c0_i32_0 = arith.constant 0 : i32
    %c0_i32_1 = arith.constant 0 : i32
    return %c0_i32, %c0_i32_0 : i32, i32
  }
  func.func @transform_3(%arg0: i32) -> (i32, i32) {
    %c0_i32 = arith.constant 0 : i32
    %c0_i32_0 = arith.constant 0 : i32
    return %arg0, %c0_i32 : i32, i32
  }
}

module attributes {stable_mosaic.version = 11 : i64} {
  func.func @_mm_kernel(%arg0: i32, %arg1: i32, %arg2: i32, %arg3: memref<1x512x128xbf16, #tpu.memory_space<vmem>>, %arg4: memref<1x128x128xbf16, #tpu.memory_space<vmem>>, %arg5: memref<1x128xf32, #tpu.memory_space<vmem>>, %arg6: memref<1x512x128xf32, #tpu.memory_space<vmem>>, %arg7: memref<512x128xf32, #tpu.memory_space<vmem>>) attributes {dimension_semantics = [#tpu.dimension_semantics<parallel>, #tpu.dimension_semantics<parallel>, #tpu.dimension_semantics<arbitrary>], iteration_bounds = array<i64: 4, 1, 1>, scalar_prefetch = 0 : i64, scratch_operands = 1 : i64, tpu.core_type = #tpu.core_type<tc>, window_params = [{transform_indices = @transform_0, window_bounds = array<i64: 1, 512, 128>}, {transform_indices = @transform_1, window_bounds = array<i64: 1, 128, 128>}, {pipeline_mode = #tpu.pipeline_mode<synchronous>, transform_indices = @transform_2, window_bounds = array<i64: 1, 128>}, {transform_indices = @transform_3, window_bounds = array<i64: 1, 512, 128>}]} {
    %c0_i32 = arith.constant 0 : i32
    %0 = arith.cmpi eq, %arg2, %c0_i32 : i32
    %1 = arith.extui %0 : i1 to i32
    %c0_i32_0 = arith.constant 0 : i32
    %2 = arith.cmpi ne, %1, %c0_i32_0 : i32
    scf.if %2 {
      %cst_12 = arith.constant 0.000000e+00 : f32
      %14 = vector.broadcast %cst_12 : f32 to vector<512x128xf32>
      %c0_13 = arith.constant 0 : index
      %c0_14 = arith.constant 0 : index
      %15 = vector.load %arg7[%c0_13, %c0_14] : memref<512x128xf32, #tpu.memory_space<vmem>>, vector<512x128xf32>
      tpu.vector_store %arg7[%c0_13, %c0_14], %14 {strides = array<i32>} : memref<512x128xf32, #tpu.memory_space<vmem>>, vector<512x128xf32>,
    } else {
    }
    %c0 = arith.constant 0 : index
    %c0_1 = arith.constant 0 : index
    %3 = vector.load %arg7[%c0, %c0_1] : memref<512x128xf32, #tpu.memory_space<vmem>>, vector<512x128xf32>
    %c0_2 = arith.constant 0 : index
    %c0_3 = arith.constant 0 : index
    %c0_4 = arith.constant 0 : index
    %4 = vector.load %arg3[%c0_2, %c0_3, %c0_4] : memref<1x512x128xbf16, #tpu.memory_space<vmem>>, vector<1x512x128xbf16>
    %5 = vector.shape_cast %4 : vector<1x512x128xbf16> to vector<512x128xbf16>
    %c0_5 = arith.constant 0 : index
    %c0_6 = arith.constant 0 : index
    %c0_7 = arith.constant 0 : index
    %6 = vector.load %arg4[%c0_5, %c0_6, %c0_7] : memref<1x128x128xbf16, #tpu.memory_space<vmem>>, vector<1x128x128xbf16>
    %7 = vector.shape_cast %6 : vector<1x128x128xbf16> to vector<128x128xbf16>
    %cst = arith.constant dense<0.000000e+00> : vector<512x128xf32>
    %8 = tpu.matmul %5, %7, %cst {dimension_numbers = #tpu.dot_dimension_numbers<[1], [0], [0], [1], [0, 0, 1, 1], [], []>} : vector<512x128xbf16>, vector<128x128xbf16>, vector<512x128xf32> -> vector<512x128xf32>
    %9 = arith.addf %3, %8 : vector<512x128xf32>
    %c0_8 = arith.constant 0 : index
    %c0_9 = arith.constant 0 : index
    %10 = vector.load %arg7[%c0_8, %c0_9] : memref<512x128xf32, #tpu.memory_space<vmem>>, vector<512x128xf32>
    tpu.vector_store %arg7[%c0_8, %c0_9], %9 {strides = array<i32>} : memref<512x128xf32, #tpu.memory_space<vmem>>, vector<512x128xf32>,
    %c0_i32_10 = arith.constant 0 : i32
    %11 = arith.cmpi eq, %arg2, %c0_i32_10 : i32
    %12 = arith.extui %11 : i1 to i32
    %c0_i32_11 = arith.constant 0 : i32
    %13 = arith.cmpi ne, %12, %c0_i32_11 : i32
    scf.if %13 {
      %c0_12 = arith.constant 0 : index
      %c0_13 = arith.constant 0 : index
      %14 = vector.load %arg7[%c0_12, %c0_13] : memref<512x128xf32, #tpu.memory_space<vmem>>, vector<512x128xf32>
      %c0_14 = arith.constant 0 : index
      %c0_15 = arith.constant 0 : index
      %15 = vector.load %arg5[%c0_14, %c0_15] : memref<1x128xf32, #tpu.memory_space<vmem>>, vector<1x128xf32>
      %16 = vector.broadcast %15 : vector<1x128xf32> to vector<512x128xf32>
      %17 = arith.addf %14, %16 : vector<512x128xf32>
      %18 = math.tanh %17 : vector<512x128xf32>
      %c0_16 = arith.constant 0 : index
      %c0_17 = arith.constant 0 : index
      %c0_18 = arith.constant 0 : index
      %19 = vector.load %arg6[%c0_16, %c0_17, %c0_18] : memref<1x512x128xf32, #tpu.memory_space<vmem>>, vector<1x512x128xf32>
      %20 = vector.shape_cast %19 : vector<1x512x128xf32> to vector<512x128xf32>
      %21 = vector.shape_cast %18 : vector<512x128xf32> to vector<1x512x128xf32>
      tpu.vector_store %arg6[%c0_16, %c0_17, %c0_18], %21 {strides = array<i32>} : memref<1x512x128xf32, #tpu.memory_space<vmem>>, vector<1x512x128xf32>,
    } else {
    }
    return
  }
  func.func @transform_0(%arg0: i32, %arg1: i32, %arg2: i32) -> (i32, i32, i32) {
    %c0_i32 = arith.constant 0 : i32
    return %arg0, %arg1, %arg2 : i32, i32, i32
  }
  func.func @transform_1(%arg0: i32, %arg1: i32, %arg2: i32) -> (i32, i32, i32) {
    %c0_i32 = arith.constant 0 : i32
    %c0_i32_0 = arith.constant 0 : i32
    return %arg0, %arg2, %c0_i32 : i32, i32, i32
  }
  func.func @transform_2(%arg0: i32, %arg1: i32, %arg2: i32) -> (i32, i32) {
    %c0_i32 = arith.constant 0 : i32
    %c0_i32_0 = arith.constant 0 : i32
    %c0_i32_1 = arith.constant 0 : i32
    return %c0_i32, %c0_i32_0 : i32, i32
  }
  func.func @transform_3(%arg0: i32, %arg1: i32, %arg2: i32) -> (i32, i32, i32) {
    %c0_i32 = arith.constant 0 : i32
    %c0_i32_0 = arith.constant 0 : i32
    return %arg0, %arg1, %c0_i32 : i32, i32, i32
  }
}

</mosaic_0001>

<bundles_post_ra>
// kernel: _lambda_.24
= control target key start
LH: loop header
LB: loop body
LE: loop exit
PB: predicated region body
PF: predicated region fallthrough
CT: control target
= control target key end

     0   :  { %s1708_s1 = inlined_call_operand.vmem [shape: bf16[1,128,128], index: 1, kind: input, shape index: {}]   ;;  %s1709_s0 = inlined_call_operand.vmem [shape: bf16[1,512,128], index: 0, kind: input, shape index: {}]   ;;  %s1710_s2 = inlined_call_operand.vmem [shape: f32[1,128], index: 2, kind: input, shape index: {}]   ;;  %s1711_s3 = inlined_call_operand.vmem [shape: f32[1,512,128], index: 3, kind: output, shape index: {}]  }
   0x1   :  { %v1267_v0 = vld [vmem:[%s1708_s1] sm:$0xff]   ;;  %v1268_v1 = vld [vmem:[%s1708_s1 + $0x8] sm:$0xff]   ;;  %v1269_v2 = vld [vmem:[%s1708_s1 + $0x10] sm:$0xff]  }
   0x2   :  { %1171 = vmatprep.subr.bf16.mxu0 %v1267_v0  ;;  %1251 = vmatprep.subr.bf16.mxu1 %v1267_v0  ;;  %v1270_v3 = vld [vmem:[%s1708_s1 + $0x18] sm:$0xff]   ;;  %v1275_v4 = vld [vmem:[%s1709_s0] sm:$0xff]   ;;  %v1272_v7 = vld [vmem:[%s1708_s1 + $0x28] sm:$0xff]  }
   0x3   :  { %1172 = vmatpush3.bf16.msra.mxu0 %v1267_v0  ;;  %1259 = vmatpush3.bf16.msra.mxu1 %v1267_v0  ;;  %v1276_v5 = vld [vmem:[%s1709_s0 + $0x80] sm:$0xff]   ;;  %v1273_v8 = vld [vmem:[%s1708_s1 + $0x30] sm:$0xff]   ;;  %v1274_v9 = vld [vmem:[%s1708_s1 + $0x38] sm:$0xff]  }
   0x4   :  { %1173 = vmatprep.subr.bf16.mxu0 %v1268_v1  ;;  %1252 = vmatprep.subr.bf16.mxu1 %v1268_v1  ;;  %v1271_v6 = vld [vmem:[%s1708_s1 + $0x20] sm:$0xff]   ;;  %v1277_v10 = vld [vmem:[%s1709_s0 + $0x8] sm:$0xff]   ;;  %v1279_v12 = vld [vmem:[%s1709_s0 + $0x10] sm:$0xff]  }
   0x5   :  { %1187 = vmatprep.mubr.bf16.mxu0 %v1275_v4  ;;  %1219 = vmatprep.mubr.bf16.mxu1 %v1276_v5  ;;  %v1278_v11 = vld [vmem:[%s1709_s0 + $0x88] sm:$0xff]   ;;  %v1280_v13 = vld [vmem:[%s1709_s0 + $0x90] sm:$0xff]   ;;  %v1281_v14 = vld [vmem:[%s1709_s0 + $0x18] sm:$0xff]  }
   0x6   :  { %v1282_v15 = vld [vmem:[%s1709_s0 + $0x98] sm:$0xff]   ;;  %v1283_v16 = vld [vmem:[%s1709_s0 + $0x20] sm:$0xff]   ;;  %v1285_v18 = vld [vmem:[%s1709_s0 + $0x28] sm:$0xff]  }
   0x7   :  { %1174 = vmatpush3.bf16.msra.mxu0 %v1268_v1  ;;  %1260 = vmatpush3.bf16.msra.mxu1 %v1268_v1  ;;  %v1284_v17 = vld [vmem:[%s1709_s0 + $0xa0] sm:$0xff]   ;;  %v1286_v19 = vld [vmem:[%s1709_s0 + $0xa8] sm:$0xff]   ;;  %v1287_v20 = vld [vmem:[%s1709_s0 + $0x30] sm:$0xff]  }
   0x8   :  { %1175 = vmatprep.subr.bf16.mxu0 %v1269_v2  ;;  %1253 = vmatprep.subr.bf16.mxu1 %v1269_v2  ;;  %v1288_v21 = vld [vmem:[%s1709_s0 + $0xb0] sm:$0xff]   ;;  %v1289_v22 = vld [vmem:[%s1709_s0 + $0x38] sm:$0xff]   ;;  %v1291_v24 = vld [vmem:[%s1709_s0 + $0x40] sm:$0xff]  }
   0x9   :  { %v1290_v23 = vld [vmem:[%s1709_s0 + $0xb8] sm:$0xff]   ;;  %v1292_v25 = vld [vmem:[%s1709_s0 + $0xc0] sm:$0xff]   ;;  %v1293_v26 = vld [vmem:[%s1709_s0 + $0x48] sm:$0xff]  }
   0xa   :  { %v1294_v27 = vld [vmem:[%s1709_s0 + $0xc8] sm:$0xff]   ;;  %v1295_v28 = vld [vmem:[%s1709_s0 + $0x50] sm:$0xff]   ;;  %v1297_v30 = vld [vmem:[%s1709_s0 + $0x58] sm:$0xff]  }
   0xb   :  { %1176 = vmatpush3.bf16.msra.mxu0 %v1269_v2  ;;  %1261 = vmatpush3.bf16.msra.mxu1 %v1269_v2  ;;  %v1296_v29 = vld [vmem:[%s1709_s0 + $0xd0] sm:$0xff]   ;;  %v1298_v31 = vld [vmem:[%s1709_s0 + $0xd8] sm:$0xff]   ;;  %v1299_v32 = vld [vmem:[%s1709_s0 + $0x60] sm:$0xff]  }
   0xc   :  { %1177 = vmatprep.subr.bf16.mxu0 %v1270_v3  ;;  %1254 = vmatprep.subr.bf16.mxu1 %v1270_v3  ;;  %v1300_v33 = vld [vmem:[%s1709_s0 + $0xe0] sm:$0xff]   ;;  %v1301_v34 = vld [vmem:[%s1709_s0 + $0x68] sm:$0xff]   ;;  %v1303_v36 = vld [vmem:[%s1709_s0 + $0x70] sm:$0xff]  }
   0xd   :  { %v1302_v35 = vld [vmem:[%s1709_s0 + $0xe8] sm:$0xff]   ;;  %v1304_v37 = vld [vmem:[%s1709_s0 + $0xf0] sm:$0xff]   ;;  %v1305_v38 = vld [vmem:[%s1709_s0 + $0x78] sm:$0xff]  }
   0xe   :  { %v1306_v39 = vld [vmem:[%s1709_s0 + $0xf8] sm:$0xff]   ;;  %v1450_v40 = vld [vmem:[%s1710_s2] ss:$0 sm:$0xff] }
   0xf   :  { %1178 = vmatpush3.bf16.msra.mxu0 %v1270_v3  ;;  %1262 = vmatpush3.bf16.msra.mxu1 %v1270_v3 }
  0x10   :  { %1179 = vmatprep.subr.bf16.mxu0 %v1271_v6  ;;  %1255 = vmatprep.subr.bf16.mxu1 %v1271_v6 }
  0x13   :  { %1180 = vmatpush3.bf16.msra.mxu0 %v1271_v6  ;;  %1263 = vmatpush3.bf16.msra.mxu1 %v1271_v6 }
  0x14   :  { %1181 = vmatprep.subr.bf16.mxu0 %v1272_v7  ;;  %1256 = vmatprep.subr.bf16.mxu1 %v1272_v7 }
  0x17   :  { %1182 = vmatpush3.bf16.msra.mxu0 %v1272_v7  ;;  %1264 = vmatpush3.bf16.msra.mxu1 %v1272_v7 }
  0x18   :  { %1183 = vmatprep.subr.bf16.mxu0 %v1273_v8  ;;  %1257 = vmatprep.subr.bf16.mxu1 %v1273_v8 }
  0x1b   :  { %1184 = vmatpush3.bf16.msra.mxu0 %v1273_v8  ;;  %1265 = vmatpush3.bf16.msra.mxu1 %v1273_v8 }
  0x1c   :  { %1185 = vmatprep.subr.bf16.mxu0 %v1274_v9  ;;  %1258 = vmatprep.subr.bf16.mxu1 %v1274_v9 }
  0x1f   :  { %1186 = vmatpush3.bf16.msra.mxu0 %v1274_v9  ;;  %1266 = vmatpush3.bf16.msra.mxu1 %v1274_v9 }
  0x22   :  { %1188 = vmatmul.mubr.bf16.vlgmr.msra.gmra.mrb[0].mxu0 %v1277_v10  ;;  %1220 = vmatmul.mubr.bf16.vlgmr.msra.gmra.mrb[0].mxu1 %v1278_v11 }
  0x23   :  { %1191 = vmatprep.mubr.bf16.mxu0 %v1279_v12  ;;  %1223 = vmatprep.mubr.bf16.mxu1 %v1280_v13 }
  0x2a   :  { %1192 = vmatmul.mubr.bf16.gmra.mrb[4].mxu0 %v1281_v14  ;;  %1224 = vmatmul.mubr.bf16.gmra.mrb[4].mxu1 %v1282_v15 }
  0x2b   :  { %1195 = vmatprep.mubr.bf16.mxu0 %v1283_v16  ;;  %1227 = vmatprep.mubr.bf16.mxu1 %v1284_v17 }
  0x32   :  { %1196 = vmatmul.mubr.bf16.gmra.mrb[8].mxu0 %v1285_v18  ;;  %1228 = vmatmul.mubr.bf16.gmra.mrb[8].mxu1 %v1286_v19 }
  0x33   :  { %1199 = vmatprep.mubr.bf16.mxu0 %v1287_v20  ;;  %1231 = vmatprep.mubr.bf16.mxu1 %v1288_v21 }
  0x3a   :  { %1200 = vmatmul.mubr.bf16.gmra.mrb[12].mxu0 %v1289_v22  ;;  %1232 = vmatmul.mubr.bf16.gmra.mrb[12].mxu1 %v1290_v23 }
  0x3b   :  { %1203 = vmatprep.mubr.bf16.mxu0 %v1291_v24  ;;  %1235 = vmatprep.mubr.bf16.mxu1 %v1292_v25 }
  0x42   :  { %1204 = vmatmul.mubr.bf16.gmra.mrb[16].mxu0 %v1293_v26  ;;  %1236 = vmatmul.mubr.bf16.gmra.mrb[16].mxu1 %v1294_v27 }
  0x43   :  { %1207 = vmatprep.mubr.bf16.mxu0 %v1295_v28  ;;  %1239 = vmatprep.mubr.bf16.mxu1 %v1296_v29 }
  0x4a   :  { %1208 = vmatmul.mubr.bf16.gmra.mrb[20].mxu0 %v1297_v30  ;;  %1240 = vmatmul.mubr.bf16.gmra.mrb[20].mxu1 %v1298_v31 }
  0x4b   :  { %1211 = vmatprep.mubr.bf16.mxu0 %v1299_v32  ;;  %1243 = vmatprep.mubr.bf16.mxu1 %v1300_v33 }
  0x52   :  { %1212 = vmatmul.mubr.bf16.gmra.mrb[24].mxu0 %v1301_v34  ;;  %1244 = vmatmul.mubr.bf16.gmra.mrb[24].mxu1 %v1302_v35 }
  0x53   :  { %1215 = vmatprep.mubr.bf16.mxu0 %v1303_v36  ;;  %1247 = vmatprep.mubr.bf16.mxu1 %v1304_v37 }
  0x5a   :  { %1216 = vmatmul.mubr.bf16.gmra.mrb[28].mxu0 %v1305_v38  ;;  %1248 = vmatmul.mubr.bf16.gmra.mrb[28].mxu1 %v1306_v39 }
  0xf5   :  { %v1189_v41 = vpop.f32.mrb[0].mxu0  ;;  %v1221_v42 = vpop.f32.mrb[0].mxu1 }
  0xf6   :  { %v960_v43 = vadd.f32 %v1189_v41, %v1450_v40  ;;  %v992_v44 = vadd.f32 %v1221_v42, %v1450_v40  ;;  %v501_v45 = vpop.f32.mrb[1].mxu0  ;;  %v629_v46 = vpop.f32.mrb[1].mxu1 }
  0xf7   :  { %v958_v47 = vadd.f32 %v1450_v40, %v501_v45  ;;  %v990_v48 = vadd.f32 %v1450_v40, %v629_v46  ;;  %v1190_v49 = vpop.f32.mrb[2].mxu0  ;;  %v1222_v50 = vpop.f32.mrb[2].mxu1 }
  0xf8   :  { %1024 = vst [vmem:[%s1711_s3 + $0x10] sm:$0xff] %v960_v43  ;;  %1056 = vst [vmem:[%s1711_s3 + $0x110] sm:$0xff] %v992_v44  ;;  %v961_v51 = vadd.f32 %v1190_v49, %v1450_v40  ;;  %v993_v52 = vadd.f32 %v1222_v50, %v1450_v40  ;;  %v504_v53 = vpop.f32.mrb[3].mxu0  ;;  %v632_v54 = vpop.f32.mrb[3].mxu1 }
  0xf9   :  { %1022 = vst [vmem:[%s1711_s3] sm:$0xff] %v958_v47  ;;  %1054 = vst [vmem:[%s1711_s3 + $0x100] sm:$0xff] %v990_v48  ;;  %v959_v55 = vadd.f32 %v1450_v40, %v504_v53  ;;  %v991_v56 = vadd.f32 %v1450_v40, %v632_v54 }
  0xfa   :  { %1025 = vst [vmem:[%s1711_s3 + $0x18] sm:$0xff] %v961_v51  ;;  %1057 = vst [vmem:[%s1711_s3 + $0x118] sm:$0xff] %v993_v52 }
  0xfb   :  { %1023 = vst [vmem:[%s1711_s3 + $0x8] sm:$0xff] %v959_v55  ;;  %1055 = vst [vmem:[%s1711_s3 + $0x108] sm:$0xff] %v991_v56 }
  0xfd   :  { %v1193_v57 = vpop.f32.mrb[4].mxu0  ;;  %v1225_v58 = vpop.f32.mrb[4].mxu1 }
  0xfe   :  { %v964_v59 = vadd.f32 %v1193_v57, %v1450_v40  ;;  %v996_v60 = vadd.f32 %v1225_v58, %v1450_v40  ;;  %v517_v61 = vpop.f32.mrb[5].mxu0  ;;  %v645_v62 = vpop.f32.mrb[5].mxu1 }
  0xff   :  { %v962_v63 = vadd.f32 %v1450_v40, %v517_v61  ;;  %v994_v0 = vadd.f32 %v1450_v40, %v645_v62  ;;  %v1194_v1 = vpop.f32.mrb[6].mxu0  ;;  %v1226_v2 = vpop.f32.mrb[6].mxu1 }
 0x100   :  { %1028 = vst [vmem:[%s1711_s3 + $0x30] sm:$0xff] %v964_v59  ;;  %1060 = vst [vmem:[%s1711_s3 + $0x130] sm:$0xff] %v996_v60  ;;  %v965_v3 = vadd.f32 %v1194_v1, %v1450_v40  ;;  %v997_v4 = vadd.f32 %v1226_v2, %v1450_v40  ;;  %v520_v5 = vpop.f32.mrb[7].mxu0  ;;  %v648_v6 = vpop.f32.mrb[7].mxu1 }
 0x101   :  { %1026 = vst [vmem:[%s1711_s3 + $0x20] sm:$0xff] %v962_v63  ;;  %1058 = vst [vmem:[%s1711_s3 + $0x120] sm:$0xff] %v994_v0  ;;  %v963_v7 = vadd.f32 %v1450_v40, %v520_v5  ;;  %v995_v8 = vadd.f32 %v1450_v40, %v648_v6 }
 0x102   :  { %1029 = vst [vmem:[%s1711_s3 + $0x38] sm:$0xff] %v965_v3  ;;  %1061 = vst [vmem:[%s1711_s3 + $0x138] sm:$0xff] %v997_v4 }
 0x103   :  { %1027 = vst [vmem:[%s1711_s3 + $0x28] sm:$0xff] %v963_v7  ;;  %1059 = vst [vmem:[%s1711_s3 + $0x128] sm:$0xff] %v995_v8 }
 0x105   :  { %v1197_v9 = vpop.f32.mrb[8].mxu0  ;;  %v1229_v10 = vpop.f32.mrb[8].mxu1 }
 0x106   :  { %v968_v11 = vadd.f32 %v1197_v9, %v1450_v40  ;;  %v1000_v12 = vadd.f32 %v1229_v10, %v1450_v40  ;;  %v533_v13 = vpop.f32.mrb[9].mxu0  ;;  %v661_v14 = vpop.f32.mrb[9].mxu1 }
 0x107   :  { %v966_v15 = vadd.f32 %v1450_v40, %v533_v13  ;;  %v998_v16 = vadd.f32 %v1450_v40, %v661_v14  ;;  %v1198_v17 = vpop.f32.mrb[10].mxu0  ;;  %v1230_v18 = vpop.f32.mrb[10].mxu1 }
 0x108   :  { %1032 = vst [vmem:[%s1711_s3 + $0x50] sm:$0xff] %v968_v11  ;;  %1064 = vst [vmem:[%s1711_s3 + $0x150] sm:$0xff] %v1000_v12  ;;  %v969_v19 = vadd.f32 %v1198_v17, %v1450_v40  ;;  %v1001_v20 = vadd.f32 %v1230_v18, %v1450_v40  ;;  %v536_v21 = vpop.f32.mrb[11].mxu0  ;;  %v664_v22 = vpop.f32.mrb[11].mxu1 }
 0x109   :  { %1030 = vst [vmem:[%s1711_s3 + $0x40] sm:$0xff] %v966_v15  ;;  %1062 = vst [vmem:[%s1711_s3 + $0x140] sm:$0xff] %v998_v16  ;;  %v967_v23 = vadd.f32 %v1450_v40, %v536_v21  ;;  %v999_v24 = vadd.f32 %v1450_v40, %v664_v22 }
 0x10a   :  { %1033 = vst [vmem:[%s1711_s3 + $0x58] sm:$0xff] %v969_v19  ;;  %1065 = vst [vmem:[%s1711_s3 + $0x158] sm:$0xff] %v1001_v20 }
 0x10b   :  { %1031 = vst [vmem:[%s1711_s3 + $0x48] sm:$0xff] %v967_v23  ;;  %1063 = vst [vmem:[%s1711_s3 + $0x148] sm:$0xff] %v999_v24 }
 0x10d   :  { %v1201_v25 = vpop.f32.mrb[12].mxu0  ;;  %v1233_v26 = vpop.f32.mrb[12].mxu1 }
 0x10e   :  { %v972_v27 = vadd.f32 %v1201_v25, %v1450_v40  ;;  %v1004_v28 = vadd.f32 %v1233_v26, %v1450_v40  ;;  %v549_v29 = vpop.f32.mrb[13].mxu0  ;;  %v677_v30 = vpop.f32.mrb[13].mxu1 }
 0x10f   :  { %v970_v31 = vadd.f32 %v1450_v40, %v549_v29  ;;  %v1002_v32 = vadd.f32 %v1450_v40, %v677_v30  ;;  %v1202_v33 = vpop.f32.mrb[14].mxu0  ;;  %v1234_v34 = vpop.f32.mrb[14].mxu1 }
 0x110   :  { %1036 = vst [vmem:[%s1711_s3 + $0x70] sm:$0xff] %v972_v27  ;;  %1068 = vst [vmem:[%s1711_s3 + $0x170] sm:$0xff] %v1004_v28  ;;  %v973_v35 = vadd.f32 %v1202_v33, %v1450_v40  ;;  %v1005_v36 = vadd.f32 %v1234_v34, %v1450_v40  ;;  %v552_v37 = vpop.f32.mrb[15].mxu0  ;;  %v680_v38 = vpop.f32.mrb[15].mxu1 }
 0x111   :  { %1034 = vst [vmem:[%s1711_s3 + $0x60] sm:$0xff] %v970_v31  ;;  %1066 = vst [vmem:[%s1711_s3 + $0x160] sm:$0xff] %v1002_v32  ;;  %v971_v39 = vadd.f32 %v1450_v40, %v552_v37  ;;  %v1003_v41 = vadd.f32 %v1450_v40, %v680_v38 }
 0x112   :  { %1037 = vst [vmem:[%s1711_s3 + $0x78] sm:$0xff] %v973_v35  ;;  %1069 = vst [vmem:[%s1711_s3 + $0x178] sm:$0xff] %v1005_v36 }
 0x113   :  { %1035 = vst [vmem:[%s1711_s3 + $0x68] sm:$0xff] %v971_v39  ;;  %1067 = vst [vmem:[%s1711_s3 + $0x168] sm:$0xff] %v1003_v41 }
 0x115   :  { %v1205_v42 = vpop.f32.mrb[16].mxu0  ;;  %v1237_v43 = vpop.f32.mrb[16].mxu1 }
 0x116   :  { %v976_v44 = vadd.f32 %v1205_v42, %v1450_v40  ;;  %v1008_v45 = vadd.f32 %v1237_v43, %v1450_v40  ;;  %v565_v46 = vpop.f32.mrb[17].mxu0  ;;  %v693_v47 = vpop.f32.mrb[17].mxu1 }
 0x117   :  { %v974_v48 = vadd.f32 %v1450_v40, %v565_v46  ;;  %v1006_v49 = vadd.f32 %v1450_v40, %v693_v47  ;;  %v1206_v50 = vpop.f32.mrb[18].mxu0  ;;  %v1238_v51 = vpop.f32.mrb[18].mxu1 }
 0x118   :  { %1040 = vst [vmem:[%s1711_s3 + $0x90] sm:$0xff] %v976_v44  ;;  %1072 = vst [vmem:[%s1711_s3 + $0x190] sm:$0xff] %v1008_v45  ;;  %v977_v52 = vadd.f32 %v1206_v50, %v1450_v40  ;;  %v1009_v53 = vadd.f32 %v1238_v51, %v1450_v40  ;;  %v568_v54 = vpop.f32.mrb[19].mxu0  ;;  %v696_v55 = vpop.f32.mrb[19].mxu1 }
 0x119   :  { %1038 = vst [vmem:[%s1711_s3 + $0x80] sm:$0xff] %v974_v48  ;;  %1070 = vst [vmem:[%s1711_s3 + $0x180] sm:$0xff] %v1006_v49  ;;  %v975_v56 = vadd.f32 %v1450_v40, %v568_v54  ;;  %v1007_v57 = vadd.f32 %v1450_v40, %v696_v55 }
 0x11a   :  { %1041 = vst [vmem:[%s1711_s3 + $0x98] sm:$0xff] %v977_v52  ;;  %1073 = vst [vmem:[%s1711_s3 + $0x198] sm:$0xff] %v1009_v53 }
 0x11b   :  { %1039 = vst [vmem:[%s1711_s3 + $0x88] sm:$0xff] %v975_v56  ;;  %1071 = vst [vmem:[%s1711_s3 + $0x188] sm:$0xff] %v1007_v57 }
 0x11d   :  { %v1209_v58 = vpop.f32.mrb[20].mxu0  ;;  %v1241_v59 = vpop.f32.mrb[20].mxu1 }
 0x11e   :  { %v980_v60 = vadd.f32 %v1209_v58, %v1450_v40  ;;  %v1012_v61 = vadd.f32 %v1241_v59, %v1450_v40  ;;  %v581_v62 = vpop.f32.mrb[21].mxu0  ;;  %v709_v63 = vpop.f32.mrb[21].mxu1 }
 0x11f   :  { %v978_v0 = vadd.f32 %v1450_v40, %v581_v62  ;;  %v1010_v1 = vadd.f32 %v1450_v40, %v709_v63  ;;  %v1210_v2 = vpop.f32.mrb[22].mxu0  ;;  %v1242_v3 = vpop.f32.mrb[22].mxu1 }
 0x120   :  { %1044 = vst [vmem:[%s1711_s3 + $0xb0] sm:$0xff] %v980_v60  ;;  %1076 = vst [vmem:[%s1711_s3 + $0x1b0] sm:$0xff] %v1012_v61  ;;  %v981_v4 = vadd.f32 %v1210_v2, %v1450_v40  ;;  %v1013_v5 = vadd.f32 %v1242_v3, %v1450_v40  ;;  %v584_v6 = vpop.f32.mrb[23].mxu0  ;;  %v712_v7 = vpop.f32.mrb[23].mxu1 }
 0x121   :  { %1042 = vst [vmem:[%s1711_s3 + $0xa0] sm:$0xff] %v978_v0  ;;  %1074 = vst [vmem:[%s1711_s3 + $0x1a0] sm:$0xff] %v1010_v1  ;;  %v979_v8 = vadd.f32 %v1450_v40, %v584_v6  ;;  %v1011_v9 = vadd.f32 %v1450_v40, %v712_v7 }
 0x122   :  { %1045 = vst [vmem:[%s1711_s3 + $0xb8] sm:$0xff] %v981_v4  ;;  %1077 = vst [vmem:[%s1711_s3 + $0x1b8] sm:$0xff] %v1013_v5 }
 0x123   :  { %1043 = vst [vmem:[%s1711_s3 + $0xa8] sm:$0xff] %v979_v8  ;;  %1075 = vst [vmem:[%s1711_s3 + $0x1a8] sm:$0xff] %v1011_v9 }
 0x125   :  { %v1213_v10 = vpop.f32.mrb[24].mxu0  ;;  %v1245_v11 = vpop.f32.mrb[24].mxu1 }
 0x126   :  { %v984_v12 = vadd.f32 %v1213_v10, %v1450_v40  ;;  %v1016_v13 = vadd.f32 %v1245_v11, %v1450_v40  ;;  %v597_v14 = vpop.f32.mrb[25].mxu0  ;;  %v725_v15 = vpop.f32.mrb[25].mxu1 }
 0x127   :  { %v982_v16 = vadd.f32 %v1450_v40, %v597_v14  ;;  %v1014_v17 = vadd.f32 %v1450_v40, %v725_v15  ;;  %v1214_v18 = vpop.f32.mrb[26].mxu0  ;;  %v1246_v19 = vpop.f32.mrb[26].mxu1 }
 0x128   :  { %1048 = vst [vmem:[%s1711_s3 + $0xd0] sm:$0xff] %v984_v12  ;;  %1080 = vst [vmem:[%s1711_s3 + $0x1d0] sm:$0xff] %v1016_v13  ;;  %v985_v20 = vadd.f32 %v1214_v18, %v1450_v40  ;;  %v1017_v21 = vadd.f32 %v1246_v19, %v1450_v40  ;;  %v600_v22 = vpop.f32.mrb[27].mxu0  ;;  %v728_v23 = vpop.f32.mrb[27].mxu1 }
 0x129   :  { %1046 = vst [vmem:[%s1711_s3 + $0xc0] sm:$0xff] %v982_v16  ;;  %1078 = vst [vmem:[%s1711_s3 + $0x1c0] sm:$0xff] %v1014_v17  ;;  %v983_v24 = vadd.f32 %v1450_v40, %v600_v22  ;;  %v1015_v25 = vadd.f32 %v1450_v40, %v728_v23 }
 0x12a   :  { %1049 = vst [vmem:[%s1711_s3 + $0xd8] sm:$0xff] %v985_v20  ;;  %1081 = vst [vmem:[%s1711_s3 + $0x1d8] sm:$0xff] %v1017_v21 }
 0x12b   :  { %1047 = vst [vmem:[%s1711_s3 + $0xc8] sm:$0xff] %v983_v24  ;;  %1079 = vst [vmem:[%s1711_s3 + $0x1c8] sm:$0xff] %v1015_v25 }
 0x12d   :  { %v1217_v26 = vpop.f32.mrb[28].mxu0  ;;  %v1249_v27 = vpop.f32.mrb[28].mxu1 }
 0x12e   :  { %v988_v28 = vadd.f32 %v1217_v26, %v1450_v40  ;;  %v1020_v29 = vadd.f32 %v1249_v27, %v1450_v40  ;;  %v613_v30 = vpop.f32.mrb[29].mxu0  ;;  %v741_v31 = vpop.f32.mrb[29].mxu1 }
 0x12f   :  { %v986_v32 = vadd.f32 %v1450_v40, %v613_v30  ;;  %v1018_v33 = vadd.f32 %v1450_v40, %v741_v31  ;;  %v1218_v34 = vpop.f32.mrb[30].mxu0  ;;  %v1250_v35 = vpop.f32.mrb[30].mxu1 }
 0x130   :  { %1052 = vst [vmem:[%s1711_s3 + $0xf0] sm:$0xff] %v988_v28  ;;  %1084 = vst [vmem:[%s1711_s3 + $0x1f0] sm:$0xff] %v1020_v29  ;;  %v989_v36 = vadd.f32 %v1218_v34, %v1450_v40  ;;  %v1021_v37 = vadd.f32 %v1250_v35, %v1450_v40  ;;  %v616_v38 = vpop.f32.mrb[31].mxu0  ;;  %v744_v39 = vpop.f32.mrb[31].mxu1 }
 0x131   :  { %1050 = vst [vmem:[%s1711_s3 + $0xe0] sm:$0xff] %v986_v32  ;;  %1082 = vst [vmem:[%s1711_s3 + $0x1e0] sm:$0xff] %v1018_v33  ;;  %v987_v41 = vadd.f32 %v1450_v40, %v616_v38  ;;  %v1019_v42 = vadd.f32 %v1450_v40, %v744_v39 }
 0x132   :  { %1053 = vst [vmem:[%s1711_s3 + $0xf8] sm:$0xff] %v989_v36  ;;  %1085 = vst [vmem:[%s1711_s3 + $0x1f8] sm:$0xff] %v1021_v37 }
 0x133   :  { %1051 = vst [vmem:[%s1711_s3 + $0xe8] sm:$0xff] %v987_v41  ;;  %1083 = vst [vmem:[%s1711_s3 + $0x1e8] sm:$0xff] %v1019_v42 }

// kernel: _lambda_.25
= control target key start
LH: loop header
LB: loop body
LE: loop exit
PB: predicated region body
PF: predicated region fallthrough
CT: control target
= control target key end

     0   :  { %s586_s1 = inlined_call_operand.vmem [shape: bf16[1,128,128], index: 1, kind: input, shape index: {}]   ;;  %s587_s0 = inlined_call_operand.vmem [shape: bf16[1,128,128], index: 0, kind: input, shape index: {}]   ;;  %s588_s2 = inlined_call_operand.vmem [shape: f32[1,128], index: 2, kind: input, shape index: {}]   ;;  %s589_s3 = inlined_call_operand.vmem [shape: f32[1,128,128], index: 3, kind: output, shape index: {}]  }
   0x1   :  { %v451_v0 = vld [vmem:[%s586_s1] sm:$0xff]   ;;  %v452_v1 = vld [vmem:[%s586_s1 + $0x8] sm:$0xff]   ;;  %v453_v2 = vld [vmem:[%s586_s1 + $0x10] sm:$0xff]  }
   0x2   :  { %403 = vmatprep.subr.bf16.mxu0 %v451_v0  ;;  %435 = vmatprep.subr.bf16.mxu1 %v451_v0  ;;  %v454_v3 = vld [vmem:[%s586_s1 + $0x18] sm:$0xff]   ;;  %v459_v4 = vld [vmem:[%s587_s0] sm:$0xff]   ;;  %v456_v7 = vld [vmem:[%s586_s1 + $0x28] sm:$0xff]  }
   0x3   :  { %404 = vmatpush3.bf16.msra.mxu0 %v451_v0  ;;  %443 = vmatpush3.bf16.msra.mxu1 %v451_v0  ;;  %v460_v5 = vld [vmem:[%s587_s0 + $0x20] sm:$0xff]   ;;  %v457_v8 = vld [vmem:[%s586_s1 + $0x30] sm:$0xff]   ;;  %v458_v9 = vld [vmem:[%s586_s1 + $0x38] sm:$0xff]  }
   0x4   :  { %405 = vmatprep.subr.bf16.mxu0 %v452_v1  ;;  %436 = vmatprep.subr.bf16.mxu1 %v452_v1  ;;  %v455_v6 = vld [vmem:[%s586_s1 + $0x20] sm:$0xff]   ;;  %v461_v10 = vld [vmem:[%s587_s0 + $0x8] sm:$0xff]   ;;  %v463_v12 = vld [vmem:[%s587_s0 + $0x10] sm:$0xff]  }
   0x5   :  { %419 = vmatprep.mubr.bf16.mxu0 %v459_v4  ;;  %427 = vmatprep.mubr.bf16.mxu1 %v460_v5  ;;  %v462_v11 = vld [vmem:[%s587_s0 + $0x28] sm:$0xff]   ;;  %v464_v13 = vld [vmem:[%s587_s0 + $0x30] sm:$0xff]   ;;  %v465_v14 = vld [vmem:[%s587_s0 + $0x18] sm:$0xff]  }
   0x6   :  { %v466_v15 = vld [vmem:[%s587_s0 + $0x38] sm:$0xff]   ;;  %v386_v16 = vld [vmem:[%s588_s2] ss:$0 sm:$0xff] }
   0x7   :  { %406 = vmatpush3.bf16.msra.mxu0 %v452_v1  ;;  %444 = vmatpush3.bf16.msra.mxu1 %v452_v1 }
   0x8   :  { %407 = vmatprep.subr.bf16.mxu0 %v453_v2  ;;  %437 = vmatprep.subr.bf16.mxu1 %v453_v2 }
   0xb   :  { %408 = vmatpush3.bf16.msra.mxu0 %v453_v2  ;;  %445 = vmatpush3.bf16.msra.mxu1 %v453_v2 }
   0xc   :  { %409 = vmatprep.subr.bf16.mxu0 %v454_v3  ;;  %438 = vmatprep.subr.bf16.mxu1 %v454_v3 }
   0xf   :  { %410 = vmatpush3.bf16.msra.mxu0 %v454_v3  ;;  %446 = vmatpush3.bf16.msra.mxu1 %v454_v3 }
  0x10   :  { %411 = vmatprep.subr.bf16.mxu0 %v455_v6  ;;  %439 = vmatprep.subr.bf16.mxu1 %v455_v6 }
  0x13   :  { %412 = vmatpush3.bf16.msra.mxu0 %v455_v6  ;;  %447 = vmatpush3.bf16.msra.mxu1 %v455_v6 }
  0x14   :  { %413 = vmatprep.subr.bf16.mxu0 %v456_v7  ;;  %440 = vmatprep.subr.bf16.mxu1 %v456_v7 }
  0x17   :  { %414 = vmatpush3.bf16.msra.mxu0 %v456_v7  ;;  %448 = vmatpush3.bf16.msra.mxu1 %v456_v7 }
  0x18   :  { %415 = vmatprep.subr.bf16.mxu0 %v457_v8  ;;  %441 = vmatprep.subr.bf16.mxu1 %v457_v8 }
  0x1b   :  { %416 = vmatpush3.bf16.msra.mxu0 %v457_v8  ;;  %449 = vmatpush3.bf16.msra.mxu1 %v457_v8 }
  0x1c   :  { %417 = vmatprep.subr.bf16.mxu0 %v458_v9  ;;  %442 = vmatprep.subr.bf16.mxu1 %v458_v9 }
  0x1f   :  { %418 = vmatpush3.bf16.msra.mxu0 %v458_v9  ;;  %450 = vmatpush3.bf16.msra.mxu1 %v458_v9 }
  0x22   :  { %420 = vmatmul.mubr.bf16.vlgmr.msra.gmra.mrb[0].mxu0 %v461_v10  ;;  %428 = vmatmul.mubr.bf16.vlgmr.msra.gmra.mrb[0].mxu1 %v462_v11 }
  0x23   :  { %423 = vmatprep.mubr.bf16.mxu0 %v463_v12  ;;  %431 = vmatprep.mubr.bf16.mxu1 %v464_v13 }
  0x2a   :  { %424 = vmatmul.mubr.bf16.gmra.mrb[4].mxu0 %v465_v14  ;;  %432 = vmatmul.mubr.bf16.gmra.mrb[4].mxu1 %v466_v15 }
  0xf5   :  { %v421_v17 = vpop.f32.mrb[0].mxu0  ;;  %v429_v18 = vpop.f32.mrb[0].mxu1 }
  0xf6   :  { %v336_v19 = vadd.f32 %v421_v17, %v386_v16  ;;  %v344_v20 = vadd.f32 %v429_v18, %v386_v16  ;;  %v213_v21 = vpop.f32.mrb[1].mxu0  ;;  %v245_v22 = vpop.f32.mrb[1].mxu1 }
  0xf7   :  { %v334_v23 = vadd.f32 %v386_v16, %v213_v21  ;;  %v342_v24 = vadd.f32 %v386_v16, %v245_v22  ;;  %v422_v25 = vpop.f32.mrb[2].mxu0  ;;  %v430_v26 = vpop.f32.mrb[2].mxu1 }
  0xf8   :  { %352 = vst [vmem:[%s589_s3 + $0x10] sm:$0xff] %v336_v19  ;;  %360 = vst [vmem:[%s589_s3 + $0x50] sm:$0xff] %v344_v20  ;;  %v337_v27 = vadd.f32 %v422_v25, %v386_v16  ;;  %v345_v28 = vadd.f32 %v430_v26, %v386_v16  ;;  %v216_v29 = vpop.f32.mrb[3].mxu0  ;;  %v248_v30 = vpop.f32.mrb[3].mxu1 }
  0xf9   :  { %350 = vst [vmem:[%s589_s3] sm:$0xff] %v334_v23  ;;  %358 = vst [vmem:[%s589_s3 + $0x40] sm:$0xff] %v342_v24  ;;  %v335_v31 = vadd.f32 %v386_v16, %v216_v29  ;;  %v343_v32 = vadd.f32 %v386_v16, %v248_v30 }
  0xfa   :  { %353 = vst [vmem:[%s589_s3 + $0x18] sm:$0xff] %v337_v27  ;;  %361 = vst [vmem:[%s589_s3 + $0x58] sm:$0xff] %v345_v28 }
  0xfb   :  { %351 = vst [vmem:[%s589_s3 + $0x8] sm:$0xff] %v335_v31  ;;  %359 = vst [vmem:[%s589_s3 + $0x48] sm:$0xff] %v343_v32 }
  0xfd   :  { %v425_v33 = vpop.f32.mrb[4].mxu0  ;;  %v433_v34 = vpop.f32.mrb[4].mxu1 }
  0xfe   :  { %v340_v35 = vadd.f32 %v425_v33, %v386_v16  ;;  %v348_v36 = vadd.f32 %v433_v34, %v386_v16  ;;  %v229_v37 = vpop.f32.mrb[5].mxu0  ;;  %v261_v38 = vpop.f32.mrb[5].mxu1 }
  0xff   :  { %v338_v39 = vadd.f32 %v386_v16, %v229_v37  ;;  %v346_v40 = vadd.f32 %v386_v16, %v261_v38  ;;  %v426_v41 = vpop.f32.mrb[6].mxu0  ;;  %v434_v42 = vpop.f32.mrb[6].mxu1 }
 0x100   :  { %356 = vst [vmem:[%s589_s3 + $0x30] sm:$0xff] %v340_v35  ;;  %364 = vst [vmem:[%s589_s3 + $0x70] sm:$0xff] %v348_v36  ;;  %v341_v43 = vadd.f32 %v426_v41, %v386_v16  ;;  %v349_v44 = vadd.f32 %v434_v42, %v386_v16  ;;  %v232_v45 = vpop.f32.mrb[7].mxu0  ;;  %v264_v46 = vpop.f32.mrb[7].mxu1 }
 0x101   :  { %354 = vst [vmem:[%s589_s3 + $0x20] sm:$0xff] %v338_v39  ;;  %362 = vst [vmem:[%s589_s3 + $0x60] sm:$0xff] %v346_v40  ;;  %v339_v47 = vadd.f32 %v386_v16, %v232_v45  ;;  %v347_v48 = vadd.f32 %v386_v16, %v264_v46 }
 0x102   :  { %357 = vst [vmem:[%s589_s3 + $0x38] sm:$0xff] %v341_v43  ;;  %365 = vst [vmem:[%s589_s3 + $0x78] sm:$0xff] %v349_v44 }
 0x103   :  { %355 = vst [vmem:[%s589_s3 + $0x28] sm:$0xff] %v339_v47  ;;  %363 = vst [vmem:[%s589_s3 + $0x68] sm:$0xff] %v347_v48 }

// kernel: _lambda_.26
= control target key start
LH: loop header
LB: loop body
LE: loop exit
PB: predicated region body
PF: predicated region fallthrough
CT: control target
= control target key end

     0   :  { %vm12_vm0 = vcmask 123904   ;;  %vm30_vm1 = vcmask 130048   ;;  %v132_v0 = vmov 0.0   ;;  %vm121_vm2 = vcmask 1040384   ;;  %s234_s0 = inlined_call_operand.vmem [shape: f32[128,16], index: 0, kind: input, shape index: {}]   ;;  %s235_s1 = inlined_call_operand.vmem [shape: f32[2,16], index: 1, kind: output, shape index: {}]  }
   0x1   :  { %13 = vst.msk [vmem:[%s235_s1] sm:$0x3] %vm12_vm0, %v132_v0  ;;  %v14_v1 = vld [vmem:[%s234_s0] sm:$0xff]  ;;  %v15_v2 = vld [vmem:[%s234_s0 + $0x8] sm:$0xff]  ;;  %v16_v3 = vld [vmem:[%s234_s0 + $0x10] sm:$0xff] }
   0x2   :  { %v31_v4 = vsel %vm30_vm1, %v14_v1, 0.0  ;;  %v32_v5 = vsel %vm30_vm1, %v15_v2, 0.0  ;;  %v34_v6 = vsel %vm30_vm1, %v16_v3, 0.0  ;;  %v17_v7 = vld [vmem:[%s234_s0 + $0x18] sm:$0xff]  ;;  %v18_v10 = vld [vmem:[%s234_s0 + $0x20] sm:$0xff]  ;;  %v19_v13 = vld [vmem:[%s234_s0 + $0x28] sm:$0xff]  ;;  %v68_v15 = vmul.f32 %v14_v1, %v14_v1 }
   0x3   :  { %v33_v8 = vadd.f32 %v32_v5, %v31_v4  ;;  %v36_v9 = vsel %vm30_vm1, %v17_v7, 0.0  ;;  %v38_v12 = vsel %vm30_vm1, %v18_v10, 0.0  ;;  %v69_v16 = vmul.f32 %v15_v2, %v15_v2  ;;  %v20_v19 = vld [vmem:[%s234_s0 + $0x30] sm:$0xff]  ;;  %v21_v24 = vld [vmem:[%s234_s0 + $0x38] sm:$0xff]  ;;  %v22_v31 = vld [vmem:[%s234_s0 + $0x40] sm:$0xff] }
   0x4   :  { %v70_v17 = vmul.f32 %v16_v3, %v16_v3  ;;  %v40_v18 = vsel %vm30_vm1, %v19_v13, 0.0  ;;  %v71_v21 = vmul.f32 %v17_v7, %v17_v7  ;;  %v42_v22 = vsel %vm30_vm1, %v20_v19, 0.0  ;;  %v23_v37 = vld [vmem:[%s234_s0 + $0x48] sm:$0xff]  ;;  %v24_v43 = vld [vmem:[%s234_s0 + $0x50] sm:$0xff]  ;;  %v25_v49 = vld [vmem:[%s234_s0 + $0x58] sm:$0xff] }
   0x5   :  { %v35_v11 = vadd.f32 %v34_v6, %v33_v8  ;;  %v72_v23 = vmul.f32 %v18_v10, %v18_v10  ;;  %v84_v26 = vsel %vm30_vm1, %v68_v15, 0.0  ;;  %v85_v27 = vsel %vm30_vm1, %v69_v16, 0.0  ;;  %v26_v55 = vld [vmem:[%s234_s0 + $0x60] sm:$0xff]  ;;  %v27_v61 = vld [vmem:[%s234_s0 + $0x68] sm:$0xff]  ;;  %v28_v3 = vld [vmem:[%s234_s0 + $0x70] sm:$0xff] }
   0x6   :  { %v87_v28 = vsel %vm30_vm1, %v70_v17, 0.0  ;;  %v44_v29 = vsel %vm30_vm1, %v21_v24, 0.0  ;;  %v86_v30 = vadd.f32 %v85_v27, %v84_v26  ;;  %v73_v33 = vmul.f32 %v19_v13, %v19_v13 }
   0x7   :  { %v37_v14 = vadd.f32 %v36_v9, %v35_v11  ;;  %v89_v34 = vsel %vm30_vm1, %v71_v21, 0.0  ;;  %v46_v35 = vsel %vm30_vm1, %v22_v31, 0.0  ;;  %v74_v39 = vmul.f32 %v20_v19, %v20_v19  ;;  %v29_v9 = vld [vmem:[%s234_s0 + $0x78] sm:$0xff] }
   0x8   :  { %v88_v36 = vadd.f32 %v87_v28, %v86_v30  ;;  %v91_v40 = vsel %vm30_vm1, %v72_v23, 0.0  ;;  %v48_v41 = vsel %vm30_vm1, %v23_v37, 0.0  ;;  %v75_v45 = vmul.f32 %v21_v24, %v21_v24 }
   0x9   :  { %v39_v20 = vadd.f32 %v38_v12, %v37_v14  ;;  %v93_v46 = vsel %vm30_vm1, %v73_v33, 0.0  ;;  %v50_v47 = vsel %vm30_vm1, %v24_v43, 0.0  ;;  %v76_v51 = vmul.f32 %v22_v31, %v22_v31 }
   0xa   :  { %v90_v42 = vadd.f32 %v89_v34, %v88_v36  ;;  %v95_v52 = vsel %vm30_vm1, %v74_v39, 0.0  ;;  %v52_v53 = vsel %vm30_vm1, %v25_v49, 0.0  ;;  %v77_v57 = vmul.f32 %v23_v37, %v23_v37 }
   0xb   :  { %v41_v25 = vadd.f32 %v40_v18, %v39_v20  ;;  %v97_v58 = vsel %vm30_vm1, %v75_v45, 0.0  ;;  %v54_v59 = vsel %vm30_vm1, %v26_v55, 0.0  ;;  %v78_v63 = vmul.f32 %v24_v43, %v24_v43  ;;  %v123_v43 = vld [vmem:[%s235_s1] sm:$0x3] }
   0xc   :  { %v92_v48 = vadd.f32 %v91_v40, %v90_v42  ;;  %v99_v0 = vsel %vm30_vm1, %v76_v51, 0.0  ;;  %v56_v1 = vsel %vm30_vm1, %v27_v61, 0.0  ;;  %v79_v5 = vmul.f32 %v25_v49, %v25_v49 }
   0xd   :  { %v43_v32 = vadd.f32 %v42_v22, %v41_v25  ;;  %v101_v6 = vsel %vm30_vm1, %v77_v57, 0.0  ;;  %v58_v7 = vsel %vm30_vm1, %v28_v3, 0.0  ;;  %v80_v11 = vmul.f32 %v26_v55, %v26_v55 }
   0xe   :  { %v94_v54 = vadd.f32 %v93_v46, %v92_v48  ;;  %v103_v12 = vsel %vm30_vm1, %v78_v63, 0.0  ;;  %v60_v13 = vsel %vm30_vm1, %v29_v9, 0.0  ;;  %v81_v16 = vmul.f32 %v27_v61, %v27_v61 }
   0xf   :  { %v45_v38 = vadd.f32 %v44_v29, %v43_v32  ;;  %v105_v17 = vsel %vm30_vm1, %v79_v5, 0.0  ;;  %v82_v20 = vmul.f32 %v28_v3, %v28_v3  ;;  %v107_v21 = vsel %vm30_vm1, %v80_v11, 0.0 }
  0x10   :  { %v96_v60 = vadd.f32 %v95_v52, %v94_v54  ;;  %v83_v24 = vmul.f32 %v29_v9, %v29_v9  ;;  %v109_v25 = vsel %vm30_vm1, %v81_v16, 0.0 }
  0x11   :  { %v47_v44 = vadd.f32 %v46_v35, %v45_v38  ;;  %v111_v28 = vsel %vm30_vm1, %v82_v20, 0.0 }
  0x12   :  { %v98_v2 = vadd.f32 %v97_v58, %v96_v60  ;;  %v113_v30 = vsel %vm30_vm1, %v83_v24, 0.0 }
  0x13   :  { %v49_v50 = vadd.f32 %v48_v41, %v47_v44 }
  0x14   :  { %v100_v8 = vadd.f32 %v99_v0, %v98_v2 }
  0x15   :  { %v51_v56 = vadd.f32 %v50_v47, %v49_v50 }
  0x16   :  { %v102_v14 = vadd.f32 %v101_v6, %v100_v8 }
  0x17   :  { %v53_v62 = vadd.f32 %v52_v53, %v51_v56 }
  0x18   :  { %v104_v18 = vadd.f32 %v103_v12, %v102_v14 }
  0x19   :  { %v55_v4 = vadd.f32 %v54_v59, %v53_v62 }
  0x1a   :  { %v106_v22 = vadd.f32 %v105_v17, %v104_v18 }
  0x1b   :  { %v57_v10 = vadd.f32 %v56_v1, %v55_v4 }
  0x1c   :  { %v108_v26 = vadd.f32 %v107_v21, %v106_v22 }
  0x1d   :  { %v59_v15 = vadd.f32 %v58_v7, %v57_v10 }
  0x1e   :  { %v110_v29 = vadd.f32 %v109_v25, %v108_v26 }
  0x1f   :  { %v61_v19 = vadd.f32 %v60_v13, %v59_v15 }
  0x20   :  { %v112_v32 = vadd.f32 %v111_v28, %v110_v29 }
  0x21   :  { %v62_v23 = vrot.slane %v61_v19, 4 }
  0x22   :  { %v114_v33 = vadd.f32 %v113_v30, %v112_v32 }
  0x23   :  { %v63_v27 = vadd.f32 %v62_v23, %v61_v19 }
  0x24   :  { %v115_v35 = vrot.slane %v114_v33, 4 }
  0x25   :  { %v64_v31 = vrot.slane %v63_v27, 2 }
  0x26   :  { %v116_v36 = vadd.f32 %v115_v35, %v114_v33 }
  0x27   :  { %v65_v34 = vadd.f32 %v64_v31, %v63_v27 }
  0x28   :  { %v117_v38 = vrot.slane %v116_v36, 2 }
  0x29   :  { %v66_v37 = vrot.slane %v65_v34, 1 }
  0x2a   :  { %v118_v39 = vadd.f32 %v117_v38, %v116_v36 }
  0x2b   :  { %v67_v40 = vadd.f32 %v66_v37, %v65_v34 }
  0x2c   :  { %v119_v41 = vrot.slane %v118_v39, 1 }
  0x2e   :  { %v120_v42 = vadd.f32 %v119_v41, %v118_v39 }
  0x30   :  { %v122_v44 = vsel %vm121_vm2, %v67_v40, %v120_v42 }
  0x31   :  { %v124_v45 = vadd.f32 %v123_v43, %v122_v44 }
  0x33   :  { %126 = vst.msk [vmem:[%s235_s1] sm:$0x3] %vm12_vm0, %v124_v45 }

// kernel: _lambda_.27
= control target key start
LH: loop header
LB: loop body
LE: loop exit
PB: predicated region body
PF: predicated region fallthrough
CT: control target
= control target key end

     0   :  { %vm76_vm0 = vcmask 130048   ;;  %s237_s0 = inlined_call_operand.vmem [shape: f32[128,16], index: 0, kind: input, shape index: {}]   ;;  %s238_s1 = inlined_call_operand.vmem [shape: f32[1,16], index: 1, kind: input, shape index: {}]   ;;  %s239_s2 = inlined_call_operand.vmem [shape: f32[1,16], index: 2, kind: input, shape index: {}]   ;;  %s240_s3 = inlined_call_operand.vmem [shape: f32[128,16], index: 3, kind: output, shape index: {}]  }
   0x1   :  { %v14_v0 = vld [vmem:[%s237_s0] sm:$0xff]  ;;  %v15_v4 = vld [vmem:[%s237_s0 + $0x8] sm:$0xff]  ;;  %v16_v5 = vld [vmem:[%s237_s0 + $0x10] sm:$0xff] }
   0x2   :  { %v97_v1 = vld [vmem:[%s238_s1] ss:$0 sm:$0xff]  ;;  %v17_v6 = vld [vmem:[%s237_s0 + $0x18] sm:$0xff]  ;;  %v19_v11 = vld [vmem:[%s237_s0 + $0x28] sm:$0xff] }
   0x3   :  { %v98_v2 = vld [vmem:[%s239_s2] ss:$0 sm:$0xff]  ;;  %v37_v3 = vmul.f32 %v97_v1, %v14_v0  ;;  %v38_v7 = vmul.f32 %v97_v1, %v15_v4  ;;  %v39_v8 = vmul.f32 %v97_v1, %v16_v5  ;;  %v40_v9 = vmul.f32 %v97_v1, %v17_v6  ;;  %v20_v12 = vld [vmem:[%s237_s0 + $0x30] sm:$0xff]  ;;  %v21_v17 = vld [vmem:[%s237_s0 + $0x38] sm:$0xff] }
   0x4   :  { %v18_v10 = vld [vmem:[%s237_s0 + $0x20] sm:$0xff]  ;;  %v42_v15 = vmul.f32 %v97_v1, %v19_v11  ;;  %v43_v16 = vmul.f32 %v97_v1, %v20_v12  ;;  %v23_v19 = vld [vmem:[%s237_s0 + $0x48] sm:$0xff]  ;;  %v44_v23 = vmul.f32 %v97_v1, %v21_v17  ;;  %v24_v24 = vld [vmem:[%s237_s0 + $0x50] sm:$0xff] }
   0x5   :  { %v60_v13 = vadd.f32 %v98_v2, %v37_v3  ;;  %v41_v14 = vmul.f32 %v97_v1, %v18_v10  ;;  %v22_v18 = vld [vmem:[%s237_s0 + $0x40] sm:$0xff]  ;;  %v61_v20 = vadd.f32 %v98_v2, %v38_v7  ;;  %v62_v21 = vadd.f32 %v98_v2, %v39_v8  ;;  %v25_v25 = vld [vmem:[%s237_s0 + $0x58] sm:$0xff]  ;;  %v27_v31 = vld [vmem:[%s237_s0 + $0x68] sm:$0xff] }
   0x6   :  { %v63_v22 = vadd.f32 %v98_v2, %v40_v9  ;;  %v26_v26 = vld [vmem:[%s237_s0 + $0x60] sm:$0xff]  ;;  %v65_v28 = vadd.f32 %v98_v2, %v42_v15  ;;  %v66_v29 = vadd.f32 %v98_v2, %v43_v16  ;;  %v45_v30 = vmul.f32 %v97_v1, %v22_v18  ;;  %v28_v32 = vld [vmem:[%s237_s0 + $0x70] sm:$0xff]  ;;  %v29_v33 = vld [vmem:[%s237_s0 + $0x78] sm:$0xff] }
   0x7   :  { %77 = vst.msk [vmem:[%s240_s3] sm:$0xff] %vm76_vm0, %v60_v13  ;;  %v64_v27 = vadd.f32 %v98_v2, %v41_v14  ;;  %78 = vst.msk [vmem:[%s240_s3 + $0x8] sm:$0xff] %vm76_vm0, %v61_v20  ;;  %v67_v34 = vadd.f32 %v98_v2, %v44_v23  ;;  %v46_v35 = vmul.f32 %v97_v1, %v23_v19 }
   0x8   :  { %79 = vst.msk [vmem:[%s240_s3 + $0x10] sm:$0xff] %vm76_vm0, %v62_v21  ;;  %80 = vst.msk [vmem:[%s240_s3 + $0x18] sm:$0xff] %vm76_vm0, %v63_v22  ;;  %v47_v36 = vmul.f32 %v97_v1, %v24_v24  ;;  %v48_v37 = vmul.f32 %v97_v1, %v25_v25  ;;  %v68_v38 = vadd.f32 %v98_v2, %v45_v30 }
   0x9   :  { %81 = vst.msk [vmem:[%s240_s3 + $0x20] sm:$0xff] %vm76_vm0, %v64_v27  ;;  %82 = vst.msk [vmem:[%s240_s3 + $0x28] sm:$0xff] %vm76_vm0, %v65_v28  ;;  %v49_v39 = vmul.f32 %v97_v1, %v26_v26  ;;  %v50_v40 = vmul.f32 %v97_v1, %v27_v31  ;;  %v51_v41 = vmul.f32 %v97_v1, %v28_v32 }
   0xa   :  { %83 = vst.msk [vmem:[%s240_s3 + $0x30] sm:$0xff] %vm76_vm0, %v66_v29  ;;  %84 = vst.msk [vmem:[%s240_s3 + $0x38] sm:$0xff] %vm76_vm0, %v67_v34  ;;  %v69_v42 = vadd.f32 %v98_v2, %v46_v35  ;;  %v70_v43 = vadd.f32 %v98_v2, %v47_v36  ;;  %v71_v44 = vadd.f32 %v98_v2, %v48_v37 }
   0xb   :  { %v52_v45 = vmul.f32 %v97_v1, %v29_v33  ;;  %85 = vst.msk [vmem:[%s240_s3 + $0x40] sm:$0xff] %vm76_vm0, %v68_v38  ;;  %v72_v46 = vadd.f32 %v98_v2, %v49_v39  ;;  %v73_v47 = vadd.f32 %v98_v2, %v50_v40  ;;  %v74_v48 = vadd.f32 %v98_v2, %v51_v41 }
   0xc   :  { %86 = vst.msk [vmem:[%s240_s3 + $0x48] sm:$0xff] %vm76_vm0, %v69_v42  ;;  %87 = vst.msk [vmem:[%s240_s3 + $0x50] sm:$0xff] %vm76_vm0, %v70_v43 }
   0xd   :  { %88 = vst.msk [vmem:[%s240_s3 + $0x58] sm:$0xff] %vm76_vm0, %v71_v44  ;;  %v75_v49 = vadd.f32 %v98_v2, %v52_v45  ;;  %89 = vst.msk [vmem:[%s240_s3 + $0x60] sm:$0xff] %vm76_vm0, %v72_v46 }
   0xe   :  { %90 = vst.msk [vmem:[%s240_s3 + $0x68] sm:$0xff] %vm76_vm0, %v73_v47  ;;  %91 = vst.msk [vmem:[%s240_s3 + $0x70] sm:$0xff] %vm76_vm0, %v74_v48 }
   0xf   :  { %92 = vst.msk [vmem:[%s240_s3 + $0x78] sm:$0xff] %vm76_vm0, %v75_v49 }

// kernel: _lambda_.28
= control target key start
LH: loop header
LB: loop body
LE: loop exit
PB: predicated region body
PF: predicated region fallthrough
CT: control target
= control target key end

     0   :  { %s444_s1 = inlined_call_operand.vmem [shape: bf16[1,256,128], index: 1, kind: input, shape index: {}]   ;;  %s445_s0 = inlined_call_operand.vmem [shape: bf16[1,32,256], index: 0, kind: input, shape index: {}]   ;;  %s446_s2 = inlined_call_operand.vmem [shape: f32[1,128], index: 2, kind: input, shape index: {}]   ;;  %s447_s3 = inlined_call_operand.vmem [shape: f32[1,32,128], index: 3, kind: output, shape index: {}]  }
   0x1   :  { %v327_v0 = vld [vmem:[%s444_s1 + $0x40] sm:$0xff]   ;;  %v329_v2 = vld [vmem:[%s444_s1 + $0x48] sm:$0xff]   ;;  %v331_v4 = vld [vmem:[%s444_s1 + $0x50] sm:$0xff]  }
   0x2   :  { %v328_v1 = vld [vmem:[%s444_s1] sm:$0xff]   ;;  %283 = vmatprep.subr.bf16.mxu0 %v327_v0  ;;  %311 = vmatprep.subr.bf16.mxu1 %v327_v0  ;;  %v330_v3 = vld [vmem:[%s444_s1 + $0x8] sm:$0xff]   ;;  %v332_v5 = vld [vmem:[%s444_s1 + $0x10] sm:$0xff]  }
   0x3   :  { %284 = vmatpush3.bf16.msra.mxu0 %v328_v1  ;;  %319 = vmatpush3.bf16.msra.mxu1 %v328_v1  ;;  %v333_v6 = vld [vmem:[%s444_s1 + $0x58] sm:$0xff]   ;;  %v335_v8 = vld [vmem:[%s444_s1 + $0x60] sm:$0xff]   ;;  %v337_v10 = vld [vmem:[%s444_s1 + $0x68] sm:$0xff]  }
   0x4   :  { %285 = vmatprep.subr.bf16.mxu0 %v329_v2  ;;  %312 = vmatprep.subr.bf16.mxu1 %v329_v2  ;;  %v334_v7 = vld [vmem:[%s444_s1 + $0x18] sm:$0xff]   ;;  %v336_v9 = vld [vmem:[%s444_s1 + $0x20] sm:$0xff]   ;;  %v338_v13 = vld [vmem:[%s444_s1 + $0x28] sm:$0xff]  }
   0x5   :  { %v345_v11 = vld [vmem:[%s445_s0 + $0x4] ss:$8 sps:$4 sm:$0xff]   ;;  %v348_v12 = vld [vmem:[%s445_s0 + $0x14] ss:$8 sps:$4 sm:$0xff]   ;;  %v343_v18 = vld [vmem:[%s445_s0] ss:$8 sps:$4 sm:$0xff]  }
   0x6   :  { %v339_v14 = vld [vmem:[%s444_s1 + $0x70] sm:$0xff]   ;;  %211 = vmatprep.mubr.bf16.mxu0 %v345_v11  ;;  %219 = vmatprep.mubr.bf16.mxu1 %v348_v12  ;;  %v341_v16 = vld [vmem:[%s444_s1 + $0x78] sm:$0xff]   ;;  %v282_v23 = vld [vmem:[%s446_s2] ss:$0 sm:$0xff] }
   0x7   :  { %286 = vmatpush3.bf16.msra.mxu0 %v330_v3  ;;  %320 = vmatpush3.bf16.msra.mxu1 %v330_v3  ;;  %v340_v15 = vld [vmem:[%s444_s1 + $0x30] sm:$0xff]   ;;  %v342_v17 = vld [vmem:[%s444_s1 + $0x38] sm:$0xff]  }
   0x8   :  { %287 = vmatprep.subr.bf16.mxu0 %v331_v4  ;;  %313 = vmatprep.subr.bf16.mxu1 %v331_v4  ;;  %v346_v19 = vld [vmem:[%s445_s0 + $0x10] ss:$8 sps:$4 sm:$0xff]  }
   0xb   :  { %288 = vmatpush3.bf16.msra.mxu0 %v332_v5  ;;  %321 = vmatpush3.bf16.msra.mxu1 %v332_v5 }
   0xc   :  { %289 = vmatprep.subr.bf16.mxu0 %v333_v6  ;;  %314 = vmatprep.subr.bf16.mxu1 %v333_v6 }
   0xf   :  { %290 = vmatpush3.bf16.msra.mxu0 %v334_v7  ;;  %322 = vmatpush3.bf16.msra.mxu1 %v334_v7 }
  0x10   :  { %291 = vmatprep.subr.bf16.mxu0 %v335_v8  ;;  %315 = vmatprep.subr.bf16.mxu1 %v335_v8 }
  0x13   :  { %292 = vmatpush3.bf16.msra.mxu0 %v336_v9  ;;  %323 = vmatpush3.bf16.msra.mxu1 %v336_v9 }
  0x14   :  { %293 = vmatprep.subr.bf16.mxu0 %v337_v10  ;;  %316 = vmatprep.subr.bf16.mxu1 %v337_v10 }
  0x17   :  { %294 = vmatpush3.bf16.msra.mxu0 %v338_v13  ;;  %324 = vmatpush3.bf16.msra.mxu1 %v338_v13 }
  0x18   :  { %295 = vmatprep.subr.bf16.mxu0 %v339_v14  ;;  %317 = vmatprep.subr.bf16.mxu1 %v339_v14 }
  0x1b   :  { %296 = vmatpush3.bf16.msra.mxu0 %v340_v15  ;;  %325 = vmatpush3.bf16.msra.mxu1 %v340_v15 }
  0x1c   :  { %297 = vmatprep.subr.bf16.mxu0 %v341_v16  ;;  %318 = vmatprep.subr.bf16.mxu1 %v341_v16 }
  0x1f   :  { %298 = vmatpush3.bf16.msra.mxu0 %v342_v17  ;;  %326 = vmatpush3.bf16.msra.mxu1 %v342_v17 }
  0x22   :  { %212 = vmatmul.mubr.bf16.vlgmr.msra.gmra.mrb[0].mxu0 %v343_v18  ;;  %220 = vmatmul.mubr.bf16.vlgmr.msra.gmra.mrb[0].mxu1 %v346_v19 }
  0xf5   :  { %v299_v20 = vpop.f32.mrb[0].mxu0  ;;  %v305_v21 = vpop.f32.mrb[0].mxu1 }
  0xf6   :  { %v300_v22 = vpop.f32.mrb[1].mxu0  ;;  %v306_v24 = vpop.f32.mrb[1].mxu1 }
  0xf7   :  { %v301_v25 = vadd.f32 %v300_v22, %v299_v20  ;;  %v307_v26 = vadd.f32 %v306_v24, %v305_v21  ;;  %v302_v27 = vpop.f32.mrb[2].mxu0  ;;  %v308_v28 = vpop.f32.mrb[2].mxu1 }
  0xf8   :  { %v303_v29 = vpop.f32.mrb[3].mxu0  ;;  %v309_v30 = vpop.f32.mrb[3].mxu1 }
  0xf9   :  { %v250_v31 = vadd.f32 %v301_v25, %v282_v23  ;;  %v252_v32 = vadd.f32 %v307_v26, %v282_v23  ;;  %v304_v33 = vadd.f32 %v303_v29, %v302_v27  ;;  %v310_v34 = vadd.f32 %v309_v30, %v308_v28 }
  0xfb   :  { %254 = vst [vmem:[%s447_s3] sm:$0xff] %v250_v31  ;;  %256 = vst [vmem:[%s447_s3 + $0x10] sm:$0xff] %v252_v32  ;;  %v251_v35 = vadd.f32 %v304_v33, %v282_v23  ;;  %v253_v36 = vadd.f32 %v310_v34, %v282_v23 }
  0xfd   :  { %255 = vst [vmem:[%s447_s3 + $0x8] sm:$0xff] %v251_v35  ;;  %257 = vst [vmem:[%s447_s3 + $0x18] sm:$0xff] %v253_v36 }

// kernel: _lambda_.29
= control target key start
LH: loop header
LB: loop body
LE: loop exit
PB: predicated region body
PF: predicated region fallthrough
CT: control target
= control target key end

     0   :  { %vm12_vm0 = vcmask 254976   ;;  %vm18_vm1 = vcmask 261120   ;;  %v60_v0 = vmov 0.0   ;;  %vm49_vm2 = vcmask 1040384   ;;  %s102_s0 = inlined_call_operand.vmem [shape: f32[32,32], index: 0, kind: input, shape index: {}]   ;;  %s103_s1 = inlined_call_operand.vmem [shape: f32[2,32], index: 1, kind: output, shape index: {}]  }
   0x1   :  { %13 = vst.msk [vmem:[%s103_s1] sm:$0x3] %vm12_vm0, %v60_v0  ;;  %v14_v1 = vld [vmem:[%s102_s0] sm:$0xff]  ;;  %v15_v2 = vld [vmem:[%s102_s0 + $0x8] sm:$0xff]  ;;  %v16_v3 = vld [vmem:[%s102_s0 + $0x10] sm:$0xff] }
   0x2   :  { %v17_v4 = vld [vmem:[%s102_s0 + $0x18] sm:$0xff]  ;;  %v19_v5 = vsel %vm18_vm1, %v14_v1, 0.0  ;;  %v20_v6 = vsel %vm18_vm1, %v15_v2, 0.0  ;;  %v22_v7 = vsel %vm18_vm1, %v16_v3, 0.0  ;;  %v32_v8 = vmul.f32 %v14_v1, %v14_v1 }
   0x3   :  { %v21_v9 = vadd.f32 %v20_v6, %v19_v5  ;;  %v33_v10 = vmul.f32 %v15_v2, %v15_v2  ;;  %v34_v11 = vmul.f32 %v16_v3, %v16_v3  ;;  %v24_v12 = vsel %vm18_vm1, %v17_v4, 0.0 }
   0x4   :  { %v35_v13 = vmul.f32 %v17_v4, %v17_v4  ;;  %v36_v14 = vsel %vm18_vm1, %v32_v8, 0.0 }
   0x5   :  { %v23_v15 = vadd.f32 %v22_v7, %v21_v9  ;;  %v37_v16 = vsel %vm18_vm1, %v33_v10, 0.0  ;;  %v39_v17 = vsel %vm18_vm1, %v34_v11, 0.0 }
   0x6   :  { %v38_v18 = vadd.f32 %v37_v16, %v36_v14  ;;  %v41_v20 = vsel %vm18_vm1, %v35_v13, 0.0 }
   0x7   :  { %v25_v19 = vadd.f32 %v24_v12, %v23_v15 }
   0x8   :  { %v40_v21 = vadd.f32 %v39_v17, %v38_v18  ;;  %v51_v35 = vld [vmem:[%s103_s1] sm:$0x3] }
   0x9   :  { %v26_v22 = vrot.slane %v25_v19, 4 }
   0xa   :  { %v42_v23 = vadd.f32 %v41_v20, %v40_v21 }
   0xb   :  { %v27_v24 = vadd.f32 %v26_v22, %v25_v19 }
   0xc   :  { %v43_v25 = vrot.slane %v42_v23, 4 }
   0xd   :  { %v28_v26 = vrot.slane %v27_v24, 2 }
   0xe   :  { %v44_v27 = vadd.f32 %v43_v25, %v42_v23 }
   0xf   :  { %v29_v28 = vadd.f32 %v28_v26, %v27_v24 }
  0x10   :  { %v45_v29 = vrot.slane %v44_v27, 2 }
  0x11   :  { %v30_v30 = vrot.slane %v29_v28, 1 }
  0x12   :  { %v46_v31 = vadd.f32 %v45_v29, %v44_v27 }
  0x13   :  { %v31_v32 = vadd.f32 %v30_v30, %v29_v28 }
  0x14   :  { %v47_v33 = vrot.slane %v46_v31, 1 }
  0x16   :  { %v48_v34 = vadd.f32 %v47_v33, %v46_v31 }
  0x18   :  { %v50_v36 = vsel %vm49_vm2, %v31_v32, %v48_v34 }
  0x19   :  { %v52_v37 = vadd.f32 %v51_v35, %v50_v36 }
  0x1b   :  { %54 = vst.msk [vmem:[%s103_s1] sm:$0x3] %vm12_vm0, %v52_v37 }

// kernel: _lambda_.30
= control target key start
LH: loop header
LB: loop body
LE: loop exit
PB: predicated region body
PF: predicated region fallthrough
CT: control target
= control target key end

     0   :  { %vm40_vm0 = vcmask 261120   ;;  %s101_s0 = inlined_call_operand.vmem [shape: f32[32,32], index: 0, kind: input, shape index: {}]   ;;  %s102_s1 = inlined_call_operand.vmem [shape: f32[1,32], index: 1, kind: input, shape index: {}]   ;;  %s103_s2 = inlined_call_operand.vmem [shape: f32[1,32], index: 2, kind: input, shape index: {}]   ;;  %s104_s3 = inlined_call_operand.vmem [shape: f32[32,32], index: 3, kind: output, shape index: {}]  }
   0x1   :  { %v14_v0 = vld [vmem:[%s101_s0] sm:$0xff]  ;;  %v15_v4 = vld [vmem:[%s101_s0 + $0x8] sm:$0xff]  ;;  %v16_v5 = vld [vmem:[%s101_s0 + $0x10] sm:$0xff] }
   0x2   :  { %v49_v1 = vld [vmem:[%s102_s1] ss:$0 sm:$0xff]  ;;  %v17_v6 = vld [vmem:[%s101_s0 + $0x18] sm:$0xff] }
   0x3   :  { %v50_v2 = vld [vmem:[%s103_s2] ss:$0 sm:$0xff]  ;;  %v25_v3 = vmul.f32 %v49_v1, %v14_v0  ;;  %v26_v7 = vmul.f32 %v49_v1, %v15_v4  ;;  %v27_v8 = vmul.f32 %v49_v1, %v16_v5  ;;  %v28_v9 = vmul.f32 %v49_v1, %v17_v6 }
   0x5   :  { %v36_v10 = vadd.f32 %v50_v2, %v25_v3  ;;  %v37_v11 = vadd.f32 %v50_v2, %v26_v7  ;;  %v38_v12 = vadd.f32 %v50_v2, %v27_v8  ;;  %v39_v13 = vadd.f32 %v50_v2, %v28_v9 }
   0x7   :  { %41 = vst.msk [vmem:[%s104_s3] sm:$0xff] %vm40_vm0, %v36_v10  ;;  %42 = vst.msk [vmem:[%s104_s3 + $0x8] sm:$0xff] %vm40_vm0, %v37_v11 }
   0x8   :  { %43 = vst.msk [vmem:[%s104_s3 + $0x10] sm:$0xff] %vm40_vm0, %v38_v12  ;;  %44 = vst.msk [vmem:[%s104_s3 + $0x18] sm:$0xff] %vm40_vm0, %v39_v13 }

// kernel: _lambda_.32
= control target key start
LH: loop header
LB: loop body
LE: loop exit
PB: predicated region body
PF: predicated region fallthrough
CT: control target
= control target key end

     0   :  { %vm12_vm0 = vcmask 517120   ;;  %vm15_vm1 = vcmask 523264   ;;  %v42_v0 = vmov 0.0   ;;  %vm31_vm2 = vcmask 1040384   ;;  %s67_s0 = inlined_call_operand.vmem [shape: f32[8,64], index: 0, kind: input, shape index: {}]   ;;  %s68_s1 = inlined_call_operand.vmem [shape: f32[2,64], index: 1, kind: output, shape index: {}]  }
   0x1   :  { %13 = vst.msk [vmem:[%s68_s1] sm:$0x3] %vm12_vm0, %v42_v0  ;;  %v14_v1 = vld [vmem:[%s67_s0] sm:$0xff] }
   0x2   :  { %v16_v2 = vsel %vm15_vm1, %v14_v1, 0.0  ;;  %v23_v3 = vmul.f32 %v14_v1, %v14_v1 }
   0x3   :  { %v17_v4 = vrot.slane %v16_v2, 4 }
   0x4   :  { %v24_v5 = vsel %vm15_vm1, %v23_v3, 0.0 }
   0x5   :  { %v18_v6 = vadd.f32 %v17_v4, %v16_v2  ;;  %v25_v7 = vrot.slane %v24_v5, 4 }
   0x7   :  { %v19_v8 = vrot.slane %v18_v6, 2  ;;  %v26_v9 = vadd.f32 %v25_v7, %v24_v5 }
   0x8   :  { %v33_v17 = vld [vmem:[%s68_s1] sm:$0x3] }
   0x9   :  { %v20_v10 = vadd.f32 %v19_v8, %v18_v6  ;;  %v27_v11 = vrot.slane %v26_v9, 2 }
   0xb   :  { %v21_v12 = vrot.slane %v20_v10, 1  ;;  %v28_v13 = vadd.f32 %v27_v11, %v26_v9 }
   0xd   :  { %v22_v14 = vadd.f32 %v21_v12, %v20_v10  ;;  %v29_v15 = vrot.slane %v28_v13, 1 }
   0xf   :  { %v30_v16 = vadd.f32 %v29_v15, %v28_v13 }
  0x11   :  { %v32_v18 = vsel %vm31_vm2, %v22_v14, %v30_v16 }
  0x12   :  { %v34_v19 = vadd.f32 %v33_v17, %v32_v18 }
  0x14   :  { %36 = vst.msk [vmem:[%s68_s1] sm:$0x3] %vm12_vm0, %v34_v19 }

// kernel: _lambda_.33
= control target key start
LH: loop header
LB: loop body
LE: loop exit
PB: predicated region body
PF: predicated region fallthrough
CT: control target
= control target key end

     0   :  { %vm31_vm0 = vcmask 523264   ;;  %s71_s0 = inlined_call_operand.vmem [shape: f32[8,64], index: 0, kind: input, shape index: {}]   ;;  %s72_s1 = inlined_call_operand.vmem [shape: f32[1,64], index: 1, kind: input, shape index: {}]   ;;  %s73_s2 = inlined_call_operand.vmem [shape: f32[1,64], index: 2, kind: input, shape index: {}]   ;;  %s74_s3 = inlined_call_operand.vmem [shape: f32[8,64], index: 3, kind: output, shape index: {}]  }
   0x1   :  { %v14_v0 = vld [vmem:[%s71_s0] sm:$0xff] }
   0x2   :  { %v37_v1 = vld [vmem:[%s72_s1] ss:$0 sm:$0xff] }
   0x3   :  { %v38_v2 = vld [vmem:[%s73_s2] ss:$0 sm:$0xff]  ;;  %v22_v3 = vmul.f32 %v37_v1, %v14_v0 }
   0x5   :  { %v30_v4 = vadd.f32 %v38_v2, %v22_v3 }
   0x7   :  { %32 = vst.msk [vmem:[%s74_s3] sm:$0xff] %vm31_vm0, %v30_v4 }

// kernel: _lambda_.31
= control target key start
LH: loop header
LB: loop body
LE: loop exit
PB: predicated region body
PF: predicated region fallthrough
CT: control target
= control target key end

     0   :  { %s665_s1 = inlined_call_operand.vmem [shape: bf16[1,512,128], index: 1, kind: input, shape index: {}]   ;;  %s666_s0 = inlined_call_operand.vmem [shape: bf16[1,16,512], index: 0, kind: input, shape index: {}]   ;;  %s667_s2 = inlined_call_operand.vmem [shape: f32[1,128], index: 2, kind: input, shape index: {}]   ;;  %s668_s3 = inlined_call_operand.vmem [shape: f32[1,16,128], index: 3, kind: output, shape index: {}]  }
   0x1   :  { %v490_v0 = vld [vmem:[%s665_s1 + $0x40] sm:$0xff]   ;;  %v494_v4 = vld [vmem:[%s665_s1 + $0x48] sm:$0xff]   ;;  %v498_v8 = vld [vmem:[%s665_s1 + $0x50] sm:$0xff]  }
   0x2   :  { %v491_v1 = vld [vmem:[%s665_s1 + $0xc0] sm:$0xff]   ;;  %446 = vmatprep.subr.bf16.mxu0 %v490_v0  ;;  %v495_v5 = vld [vmem:[%s665_s1 + $0xc8] sm:$0xff]   ;;  %v499_v9 = vld [vmem:[%s665_s1 + $0xd0] sm:$0xff]  }
   0x3   :  { %v492_v2 = vld [vmem:[%s665_s1] sm:$0xff]   ;;  %468 = vmatprep.subr.bf16.mxu1 %v491_v1  ;;  %v496_v6 = vld [vmem:[%s665_s1 + $0x8] sm:$0xff]   ;;  %v500_v10 = vld [vmem:[%s665_s1 + $0x10] sm:$0xff]  }
   0x4   :  { %v493_v3 = vld [vmem:[%s665_s1 + $0x80] sm:$0xff]   ;;  %447 = vmatpush3.bf16.msra.mxu0 %v492_v2  ;;  %v497_v7 = vld [vmem:[%s665_s1 + $0x88] sm:$0xff]   ;;  %v501_v11 = vld [vmem:[%s665_s1 + $0x90] sm:$0xff]  }
   0x5   :  { %469 = vmatpush3.bf16.msra.mxu1 %v493_v3  ;;  %448 = vmatprep.subr.bf16.mxu0 %v494_v4  ;;  %v502_v12 = vld [vmem:[%s665_s1 + $0x58] sm:$0xff]   ;;  %v506_v16 = vld [vmem:[%s665_s1 + $0x60] sm:$0xff]   ;;  %v510_v20 = vld [vmem:[%s665_s1 + $0x68] sm:$0xff]  }
   0x6   :  { %470 = vmatprep.subr.bf16.mxu1 %v495_v5  ;;  %v503_v13 = vld [vmem:[%s665_s1 + $0xd8] sm:$0xff]   ;;  %v507_v17 = vld [vmem:[%s665_s1 + $0xe0] sm:$0xff]   ;;  %v511_v21 = vld [vmem:[%s665_s1 + $0xe8] sm:$0xff]  }
   0x7   :  { %v504_v14 = vld [vmem:[%s665_s1 + $0x18] sm:$0xff]   ;;  %v508_v18 = vld [vmem:[%s665_s1 + $0x20] sm:$0xff]   ;;  %v512_v22 = vld [vmem:[%s665_s1 + $0x28] sm:$0xff]  }
   0x8   :  { %449 = vmatpush3.bf16.msra.mxu0 %v496_v6  ;;  %v505_v15 = vld [vmem:[%s665_s1 + $0x98] sm:$0xff]   ;;  %v509_v19 = vld [vmem:[%s665_s1 + $0xa0] sm:$0xff]   ;;  %v513_v23 = vld [vmem:[%s665_s1 + $0xa8] sm:$0xff]  }
   0x9   :  { %471 = vmatpush3.bf16.msra.mxu1 %v497_v7  ;;  %450 = vmatprep.subr.bf16.mxu0 %v498_v8  ;;  %v514_v24 = vld [vmem:[%s665_s1 + $0x70] sm:$0xff]   ;;  %v518_v28 = vld [vmem:[%s665_s1 + $0x78] sm:$0xff]   ;;  %v445_v45 = vld [vmem:[%s667_s2] ss:$0 sm:$0xff] }
   0xa   :  { %472 = vmatprep.subr.bf16.mxu1 %v499_v9  ;;  %v515_v25 = vld [vmem:[%s665_s1 + $0xf0] sm:$0xff]   ;;  %v519_v29 = vld [vmem:[%s665_s1 + $0xf8] sm:$0xff]  }
   0xb   :  { %v516_v26 = vld [vmem:[%s665_s1 + $0x30] sm:$0xff]   ;;  %v520_v30 = vld [vmem:[%s665_s1 + $0x38] sm:$0xff]  }
   0xc   :  { %451 = vmatpush3.bf16.msra.mxu0 %v500_v10  ;;  %v517_v27 = vld [vmem:[%s665_s1 + $0xb0] sm:$0xff]   ;;  %v521_v31 = vld [vmem:[%s665_s1 + $0xb8] sm:$0xff]  }
   0xd   :  { %473 = vmatpush3.bf16.msra.mxu1 %v501_v11  ;;  %452 = vmatprep.subr.bf16.mxu0 %v502_v12  ;;  %v522_v32 = vld [vmem:[%s666_s0] ss:$16 sps:$4 sm:$0xff]   ;;  %v524_v33 = vld [vmem:[%s666_s0 + $0x4] ss:$16 sps:$4 sm:$0xff]   ;;  %v525_v34 = vld [vmem:[%s666_s0 + $0x8] ss:$16 sps:$4 sm:$0xff]  }
   0xe   :  { %474 = vmatprep.subr.bf16.mxu1 %v503_v13  ;;  %v527_v35 = vld [vmem:[%s666_s0 + $0xc] ss:$16 sps:$4 sm:$0xff]   ;;  %335 = vmatprep.mubr.bf16.mxu0 %v524_v33 }
   0xf   :  { %376 = vmatprep.mubr.bf16.mxu1 %v527_v35 }
  0x10   :  { %453 = vmatpush3.bf16.msra.mxu0 %v504_v14 }
  0x11   :  { %475 = vmatpush3.bf16.msra.mxu1 %v505_v15  ;;  %454 = vmatprep.subr.bf16.mxu0 %v506_v16 }
  0x12   :  { %476 = vmatprep.subr.bf16.mxu1 %v507_v17 }
  0x14   :  { %455 = vmatpush3.bf16.msra.mxu0 %v508_v18 }
  0x15   :  { %477 = vmatpush3.bf16.msra.mxu1 %v509_v19  ;;  %456 = vmatprep.subr.bf16.mxu0 %v510_v20 }
  0x16   :  { %478 = vmatprep.subr.bf16.mxu1 %v511_v21 }
  0x18   :  { %457 = vmatpush3.bf16.msra.mxu0 %v512_v22 }
  0x19   :  { %479 = vmatpush3.bf16.msra.mxu1 %v513_v23  ;;  %458 = vmatprep.subr.bf16.mxu0 %v514_v24 }
  0x1a   :  { %480 = vmatprep.subr.bf16.mxu1 %v515_v25 }
  0x1c   :  { %459 = vmatpush3.bf16.msra.mxu0 %v516_v26 }
  0x1d   :  { %481 = vmatpush3.bf16.msra.mxu1 %v517_v27  ;;  %460 = vmatprep.subr.bf16.mxu0 %v518_v28 }
  0x1e   :  { %482 = vmatprep.subr.bf16.mxu1 %v519_v29 }
  0x20   :  { %461 = vmatpush3.bf16.msra.mxu0 %v520_v30 }
  0x21   :  { %483 = vmatpush3.bf16.msra.mxu1 %v521_v31 }
  0x23   :  { %336 = vmatmul.mubr.bf16.vlgmr.msra.gmra.mrb[0].mxu0 %v522_v32 }
  0x24   :  { %377 = vmatmul.mubr.bf16.vlgmr.msra.gmra.mrb[0].mxu1 %v525_v34 }
  0xf6   :  { %v462_v36 = vpop.f32.mrb[0].mxu0 }
  0xf7   :  { %v484_v37 = vpop.f32.mrb[0].mxu1  ;;  %v463_v38 = vpop.f32.mrb[1].mxu0 }
  0xf8   :  { %v464_v39 = vadd.f32 %v463_v38, %v462_v36  ;;  %v485_v40 = vpop.f32.mrb[1].mxu1  ;;  %v465_v41 = vpop.f32.mrb[2].mxu0 }
  0xf9   :  { %v486_v42 = vadd.f32 %v485_v40, %v484_v37  ;;  %v487_v43 = vpop.f32.mrb[2].mxu1  ;;  %v466_v44 = vpop.f32.mrb[3].mxu0 }
  0xfa   :  { %v467_v46 = vadd.f32 %v466_v44, %v465_v41  ;;  %v488_v47 = vpop.f32.mrb[3].mxu1 }
  0xfb   :  { %v379_v48 = vadd.f32 %v486_v42, %v464_v39  ;;  %v489_v49 = vadd.f32 %v488_v47, %v487_v43 }
  0xfd   :  { %v401_v50 = vadd.f32 %v445_v45, %v379_v48  ;;  %v382_v51 = vadd.f32 %v489_v49, %v467_v46 }
  0xff   :  { %403 = vst [vmem:[%s668_s3] sm:$0xff] %v401_v50  ;;  %v402_v52 = vadd.f32 %v445_v45, %v382_v51 }
 0x101   :  { %404 = vst [vmem:[%s668_s3 + $0x8] sm:$0xff] %v402_v52 }

// kernel: _lambda_.35
= control target key start
LH: loop header
LB: loop body
LE: loop exit
PB: predicated region body
PF: predicated region fallthrough
CT: control target
= control target key end

     0   :  { %s740_s12 = smov 0   ;;  %s742_s13 = smov 0   ;;  %s805_s0 = inlined_call_operand.vmem [shape: bf16[4,16,256], index: 0, kind: input, shape index: {}]   ;;  %s806_s1 = inlined_call_operand.vmem [shape: bf16[4,256,128], index: 1, kind: input, shape index: {}]   ;;  %s807_s2 = inlined_call_operand.vmem [shape: f32[1,128], index: 2, kind: input, shape index: {}]   ;;  %s808_s3 = inlined_call_operand.vmem [shape: f32[4,16,128], index: 3, kind: output, shape index: {}]  }
   0x1   :  { %s744_s14 = smov 0  }
   0x2 LB: > { %s32_s15 = sadd.s32 1, %s714_s13  ;;  %p600_p0 = scmp.ge.s32.totalorder %s718_s14, 1  ;;  %s718_s14 = sphi %s744_s14, %s13_s14   ;;  %s714_s13 = sphi %s742_s13, %s810_s13   ;;  %s710_s12 = sphi %s740_s12, %s809_s12  }
   0x3   : > { %p34_p1 = scmp.ge.s32.totalorder %s32_s15, 4  ;;  %p190_p2 = scmp.lt.s32.totalorder %s718_s14, 5 }
   0x5   : > { %s812_s15 = smov (%p34_p1, %s32_s15), 0  ;;  %p191_p3 = pnand %p600_p0, %p190_p2 }
   0x6   : > { %p238_p4 = scmp.lt.s32.totalorder (!%p191_p3), %s710_s12, 3  ;;  %v625_v20 = vld [vmem:[%s807_s2] ss:$0 sm:$0xff] (!%p191_p3) }
   0x7   : > { %194 = sbr.rel (%p191_p3) target bundleno = 270 (0x10e), region = 32 }
   0xe   : > { %s814_s12 = smov (!%p238_p4, %s710_s12), 3 }
   0xf   : > { %s629_s16 = sshll.u32 %s814_s12, 7  ;;  %s628_s20 = sshll.u32 %s814_s12, 4 }
  0x10   : > { %s764_s19 = scalar_lea.vmem %s806_s1, %s629_s16  ;;  %s249_s23 = scalar_lea.vmem %s805_s0, %s628_s20 }
  0x11   : > { %v677_v0 = vld [vmem:[%s764_s19 + $0x40] sm:$0xff]   ;;  %v679_v2 = vld [vmem:[%s764_s19 + $0x48] sm:$0xff]   ;;  %v681_v4 = vld [vmem:[%s764_s19 + $0x50] sm:$0xff]   ;;  %s270_s28 = scalar_lea.vmem %s808_s3, %s628_s20 }
  0x12   : > { %v678_v1 = vld [vmem:[%s764_s19] sm:$0xff]   ;;  %631 = vmatprep.subr.bf16.mxu0 %v677_v0  ;;  %v680_v3 = vld [vmem:[%s764_s19 + $0x8] sm:$0xff]   ;;  %v682_v5 = vld [vmem:[%s764_s19 + $0x10] sm:$0xff]  }
  0x13   : > { %632 = vmatpush3.bf16.msra.mxu0 %v678_v1  ;;  %v683_v6 = vld [vmem:[%s764_s19 + $0x58] sm:$0xff]   ;;  %v685_v8 = vld [vmem:[%s764_s19 + $0x60] sm:$0xff]   ;;  %v687_v10 = vld [vmem:[%s764_s19 + $0x68] sm:$0xff]  }
  0x14   : > { %633 = vmatprep.subr.bf16.mxu0 %v679_v2  ;;  %v684_v7 = vld [vmem:[%s764_s19 + $0x18] sm:$0xff]   ;;  %v686_v9 = vld [vmem:[%s764_s19 + $0x20] sm:$0xff]   ;;  %v688_v12 = vld [vmem:[%s764_s19 + $0x28] sm:$0xff]  }
  0x15   : > { %v695_v11 = vld [vmem:[%s249_s23 + $0x4] ss:$8 sps:$4 sm:$0xff]   ;;  %v689_v13 = vld [vmem:[%s764_s19 + $0x70] sm:$0xff]   ;;  %v691_v15 = vld [vmem:[%s764_s19 + $0x78] sm:$0xff]  }
  0x16   : > { %453 = vmatprep.mubr.bf16.mxu0 %v695_v11  ;;  %v690_v14 = vld [vmem:[%s764_s19 + $0x30] sm:$0xff]   ;;  %v692_v16 = vld [vmem:[%s764_s19 + $0x38] sm:$0xff]   ;;  %v693_v17 = vld [vmem:[%s249_s23] ss:$8 sps:$4 sm:$0xff]  }
  0x17   : > { %634 = vmatpush3.bf16.msra.mxu0 %v680_v3 }
  0x18   : > { %635 = vmatprep.subr.bf16.mxu0 %v681_v4 }
  0x1b   : > { %636 = vmatpush3.bf16.msra.mxu0 %v682_v5 }
  0x1c   : > { %637 = vmatprep.subr.bf16.mxu0 %v683_v6 }
  0x1f   : > { %638 = vmatpush3.bf16.msra.mxu0 %v684_v7 }
  0x20   : > { %639 = vmatprep.subr.bf16.mxu0 %v685_v8 }
  0x23   : > { %640 = vmatpush3.bf16.msra.mxu0 %v686_v9 }
  0x24   : > { %641 = vmatprep.subr.bf16.mxu0 %v687_v10 }
  0x27   : > { %642 = vmatpush3.bf16.msra.mxu0 %v688_v12 }
  0x28   : > { %643 = vmatprep.subr.bf16.mxu0 %v689_v13 }
  0x2b   : > { %644 = vmatpush3.bf16.msra.mxu0 %v690_v14 }
  0x2c   : > { %645 = vmatprep.subr.bf16.mxu0 %v691_v15 }
  0x2f   : > { %646 = vmatpush3.bf16.msra.mxu0 %v692_v16 }
  0x32   : > { %454 = vmatmul.mubr.bf16.vlgmr.msra.gmra.mrb[0].mxu0 %v693_v17 }
 0x105   : > { %v647_v18 = vpop.f32.mrb[0].mxu0 }
 0x106   : > { %v648_v19 = vpop.f32.mrb[1].mxu0 }
 0x107   : > { %v649_v21 = vadd.f32 %v648_v19, %v647_v18  ;;  %v650_v22 = vpop.f32.mrb[2].mxu0 }
 0x108   : > { %v651_v23 = vpop.f32.mrb[3].mxu0 }
 0x109   : > { %v478_v24 = vadd.f32 %v649_v21, %v625_v20  ;;  %v652_v25 = vadd.f32 %v651_v23, %v650_v22 }
 0x10b   : > { %480 = vst [vmem:[%s270_s28] sm:$0xff] %v478_v24  ;;  %v479_v26 = vadd.f32 %v652_v25, %v625_v20 }
 0x10d   : > { %481 = vst [vmem:[%s270_s28 + $0x8] sm:$0xff] %v479_v26 }
 0x10e PF: > { %s13_s14 = sadd.s32 1, %s718_s14   ;;  %s809_s12 = smov %s714_s13 }
 0x10f   : > { %p10_p5 = scmp.ge.s32.totalorder %s13_s14, 6   ;;  %s810_s13 = smov %s812_s15 }
 0x111   :  { %12 = sbr.rel (!%p10_p5) target bundleno = 2 (0x2), region = 73 }

// kernel: _lambda_.34
= control target key start
LH: loop header
LB: loop body
LE: loop exit
PB: predicated region body
PF: predicated region fallthrough
CT: control target
= control target key end

     0   :  { %s1014_s12 = smov 0   ;;  %s1016_s13 = smov 0   ;;  %s1130_s0 = inlined_call_operand.vmem [shape: bf16[1,16,1024], index: 0, kind: input, shape index: {}]   ;;  %s1131_s1 = inlined_call_operand.vmem [shape: bf16[1,1024,128], index: 1, kind: input, shape index: {}]   ;;  %s1132_s2 = inlined_call_operand.vmem [shape: f32[1,128], index: 2, kind: input, shape index: {}]   ;;  %s1133_s3 = inlined_call_operand.vmem [shape: f32[1,16,128], index: 3, kind: output, shape index: {}]  }
   0x1   :  { %s1018_s14 = smov 0   ;;  %s1020_s15 = smov 0  }
   0x2   :  { %s1022_s16 = smov 0  }
   0x3 LB: > { %s25_s17 = sadd.s32 1, %s987_s15  ;;  %p50_p1 = scmp.ne.s32.totalorder %s979_s13, %s975_s12  ;;  %s991_s16 = sphi %s1022_s16, %s13_s16   ;;  %s987_s15 = sphi %s1020_s15, %s1137_s15   ;;  %s983_s14 = sphi %s1018_s14, %s1136_s14   ;;  %s979_s13 = sphi %s1016_s13, %s1135_s13   ;;  %s975_s12 = sphi %s1014_s12, %s1134_s12  }
   0x4   : > { %p26_p0 = scmp.ge.s32.totalorder %s25_s17, 2  ;;  %p51_p2 = scmp.eq.s32.totalorder %s991_s16, 0 }
   0x5   : > { %s43_s19 = sadd.s32 1, %s979_s13  ;;  %p778_p5 = scmp.ge.s32.totalorder %s991_s16, 2 }
   0x6   : > { %s1139_s17 = smov (%p26_p0, %s25_s17), 0  ;;  %p52_p3 = por %p51_p2, %p50_p1 }
   0x7   : > { %s39_s18 = ssub.s32 %s987_s15, %s1139_s17  ;;  %156 = sbr.rel (%p778_p5) target bundleno = 21 (0x15), region = 20 }
   0x8   : > { %p41_p4 = scmp.eq.s32.totalorder %s39_s18, 0 }
   0xa   : > { %s1049_s20 = scalar_select %p41_p4, %s979_s13, %s43_s19  }
   0xe   : > { %159 = sbr.rel (!%p52_p3) target bundleno = 21 (0x15), region = 24  ;;  %s161_s21 = sand.u32 (%p52_p3), 1, %s979_s13  }
   0xf   : > { %s829_s22 = sshll.u32 (%p52_p3), %s987_s15, 4  ;;  %s779_s23 = sshll.u32 (%p52_p3), %s161_s21, 5 }
  0x10   : > { %s171_s26 = scalar_lea.vmem (%p52_p3), %s1130_s0, %s829_s22  ;;  %s163_s27 = scalar_lea.vmem (%p52_p3), [#allocation3], %s779_s23 }
  0x11   : > { %v184_v0 = vld [vmem:[%s171_s26] sm:$0xff] (%p52_p3)  ;;  %v186_v1 = vld [vmem:[%s171_s26 + $0x8] sm:$0xff] (%p52_p3) }
  0x12   : > { %v188_v2 = vld [vmem:[%s171_s26 + $0x20] sm:$0xff] (%p52_p3)  ;;  %185 = vst [vmem:[%s163_s27] sm:$0xff] (%p52_p3), %v184_v0  ;;  %187 = vst [vmem:[%s163_s27 + $0x8] sm:$0xff] (%p52_p3), %v186_v1  ;;  %v190_v3 = vld [vmem:[%s171_s26 + $0x28] sm:$0xff] (%p52_p3) }
  0x13   : > { %189 = vst [vmem:[%s163_s27 + $0x10] sm:$0xff] (%p52_p3), %v188_v2  ;;  %191 = vst [vmem:[%s163_s27 + $0x18] sm:$0xff] (%p52_p3), %v190_v3 }
  0x15 PF: > { %p782_p6 = scmp.ge.s32.totalorder %s991_s16, 1  ;;  %p209_p7 = scmp.lt.s32.totalorder %s991_s16, 3 }
  0x17   : > { %p210_p8 = pnand %p782_p6, %p209_p7 }
  0x18   : > { %s216_s28 = sand.u32 (!%p210_p8), 1, %s975_s12   ;;  %s784_s29 = sshll.u32 (!%p210_p8), %s983_s14, 6 }
  0x19   : > { %213 = sbr.rel (%p210_p8) target bundleno = 306 (0x132), region = 51  ;;  %s783_s30 = sshll.u32 (!%p210_p8), %s216_s28, 5 }
  0x1a   : > { %p257_p9 = scmp.lt.s32.totalorder (!%p210_p8), %s784_s29, 127  ;;  %s1066_s8 = scalar_lea.vmem (!%p210_p8), [#allocation3], %s783_s30 }
  0x1b   : > { %p786_p10 = scmp.ne.s32.totalorder (!%p210_p8), %s983_s14, 0 }
  0x20   : > { %s1141_s29 = smov (!%p257_p9, %s784_s29), 127  ;;  %278 = sbr.rel (%p786_p10) target bundleno = 39 (0x27), region = 59 }
  0x21   : > { %s785_s4 = sshll.u32 %s1141_s29, 2  ;;  %v993_v4 = vmov (!%p786_p10), 0.0  }
  0x22   : > { %s1064_s7 = scalar_lea.vmem %s1131_s1, %s785_s4  ;;  %279 = vst [vmem:[#allocation2] sm:$0xff] (!%p786_p10), %v993_v4  ;;  %280 = vst [vmem:[#allocation2 + $0x8] sm:$0xff] (!%p786_p10), %v993_v4 }
  0x27 PF: > { %v915_v5 = vld [vmem:[%s1064_s7 + $0x40] sm:$0xff]   ;;  %v919_v9 = vld [vmem:[%s1064_s7 + $0x48] sm:$0xff]   ;;  %v923_v13 = vld [vmem:[%s1064_s7 + $0x50] sm:$0xff]   ;;  %p823_p11 = scmp.ne.s32.totalorder %s983_s14, 1 }
  0x28   : > { %v916_v6 = vld [vmem:[%s1064_s7 + $0xc0] sm:$0xff]   ;;  %830 = vmatprep.subr.bf16.mxu0 %v915_v5  ;;  %v920_v10 = vld [vmem:[%s1064_s7 + $0xc8] sm:$0xff]   ;;  %v924_v14 = vld [vmem:[%s1064_s7 + $0xd0] sm:$0xff]  }
  0x29   : > { %v917_v7 = vld [vmem:[%s1064_s7] sm:$0xff]   ;;  %852 = vmatprep.subr.bf16.mxu1 %v916_v6  ;;  %v921_v11 = vld [vmem:[%s1064_s7 + $0x8] sm:$0xff]   ;;  %v925_v15 = vld [vmem:[%s1064_s7 + $0x10] sm:$0xff]  }
  0x2a   : > { %v918_v8 = vld [vmem:[%s1064_s7 + $0x80] sm:$0xff]   ;;  %831 = vmatpush3.bf16.msra.mxu0 %v917_v7  ;;  %v922_v12 = vld [vmem:[%s1064_s7 + $0x88] sm:$0xff]   ;;  %v926_v16 = vld [vmem:[%s1064_s7 + $0x90] sm:$0xff]  }
  0x2b   : > { %853 = vmatpush3.bf16.msra.mxu1 %v918_v8  ;;  %832 = vmatprep.subr.bf16.mxu0 %v919_v9  ;;  %v927_v17 = vld [vmem:[%s1064_s7 + $0x58] sm:$0xff]   ;;  %v931_v21 = vld [vmem:[%s1064_s7 + $0x60] sm:$0xff]   ;;  %v935_v25 = vld [vmem:[%s1064_s7 + $0x68] sm:$0xff]  }
  0x2c   : > { %854 = vmatprep.subr.bf16.mxu1 %v920_v10  ;;  %v928_v18 = vld [vmem:[%s1064_s7 + $0xd8] sm:$0xff]   ;;  %v932_v22 = vld [vmem:[%s1064_s7 + $0xe0] sm:$0xff]   ;;  %v936_v26 = vld [vmem:[%s1064_s7 + $0xe8] sm:$0xff]  }
  0x2d   : > { %v929_v19 = vld [vmem:[%s1064_s7 + $0x18] sm:$0xff]   ;;  %v933_v23 = vld [vmem:[%s1064_s7 + $0x20] sm:$0xff]   ;;  %v937_v27 = vld [vmem:[%s1064_s7 + $0x28] sm:$0xff]  }
  0x2e   : > { %833 = vmatpush3.bf16.msra.mxu0 %v921_v11  ;;  %v930_v20 = vld [vmem:[%s1064_s7 + $0x98] sm:$0xff]   ;;  %v934_v24 = vld [vmem:[%s1064_s7 + $0xa0] sm:$0xff]   ;;  %v938_v28 = vld [vmem:[%s1064_s7 + $0xa8] sm:$0xff]  }
  0x2f   : > { %855 = vmatpush3.bf16.msra.mxu1 %v922_v12  ;;  %834 = vmatprep.subr.bf16.mxu0 %v923_v13  ;;  %v939_v29 = vld [vmem:[%s1064_s7 + $0x70] sm:$0xff]   ;;  %v943_v33 = vld [vmem:[%s1064_s7 + $0x78] sm:$0xff]   ;;  %v281_v50 = vld [vmem:[#allocation2] sm:$0xff] }
  0x30   : > { %856 = vmatprep.subr.bf16.mxu1 %v924_v14  ;;  %v940_v30 = vld [vmem:[%s1064_s7 + $0xf0] sm:$0xff]   ;;  %v944_v34 = vld [vmem:[%s1064_s7 + $0xf8] sm:$0xff]   ;;  %v282_v55 = vld [vmem:[#allocation2 + $0x8] sm:$0xff] }
  0x31   : > { %v941_v31 = vld [vmem:[%s1064_s7 + $0x30] sm:$0xff]   ;;  %v945_v35 = vld [vmem:[%s1064_s7 + $0x38] sm:$0xff]   ;;  %v824_v60 = vld [vmem:[%s1132_s2] ss:$0 sm:$0xff] (!%p823_p11) }
  0x32   : > { %835 = vmatpush3.bf16.msra.mxu0 %v925_v15  ;;  %v942_v32 = vld [vmem:[%s1064_s7 + $0xb0] sm:$0xff]   ;;  %v946_v36 = vld [vmem:[%s1064_s7 + $0xb8] sm:$0xff]  }
  0x33   : > { %857 = vmatpush3.bf16.msra.mxu1 %v926_v16  ;;  %836 = vmatprep.subr.bf16.mxu0 %v927_v17  ;;  %v947_v37 = vld [vmem:[%s1066_s8] ss:$16 sps:$4 sm:$0xff]   ;;  %v949_v38 = vld [vmem:[%s1066_s8 + $0x4] ss:$16 sps:$4 sm:$0xff]   ;;  %v950_v39 = vld [vmem:[%s1066_s8 + $0x8] ss:$16 sps:$4 sm:$0xff]  }
  0x34   : > { %858 = vmatprep.subr.bf16.mxu1 %v928_v18  ;;  %v952_v40 = vld [vmem:[%s1066_s8 + $0xc] ss:$16 sps:$4 sm:$0xff]   ;;  %595 = vmatprep.mubr.bf16.mxu0 %v949_v38 }
  0x35   : > { %636 = vmatprep.mubr.bf16.mxu1 %v952_v40 }
  0x36   : > { %837 = vmatpush3.bf16.msra.mxu0 %v929_v19 }
  0x37   : > { %859 = vmatpush3.bf16.msra.mxu1 %v930_v20  ;;  %838 = vmatprep.subr.bf16.mxu0 %v931_v21 }
  0x38   : > { %860 = vmatprep.subr.bf16.mxu1 %v932_v22 }
  0x3a   : > { %839 = vmatpush3.bf16.msra.mxu0 %v933_v23 }
  0x3b   : > { %861 = vmatpush3.bf16.msra.mxu1 %v934_v24  ;;  %840 = vmatprep.subr.bf16.mxu0 %v935_v25 }
  0x3c   : > { %862 = vmatprep.subr.bf16.mxu1 %v936_v26 }
  0x3e   : > { %841 = vmatpush3.bf16.msra.mxu0 %v937_v27 }
  0x3f   : > { %863 = vmatpush3.bf16.msra.mxu1 %v938_v28  ;;  %842 = vmatprep.subr.bf16.mxu0 %v939_v29 }
  0x40   : > { %864 = vmatprep.subr.bf16.mxu1 %v940_v30 }
  0x42   : > { %843 = vmatpush3.bf16.msra.mxu0 %v941_v31 }
  0x43   : > { %865 = vmatpush3.bf16.msra.mxu1 %v942_v32  ;;  %844 = vmatprep.subr.bf16.mxu0 %v943_v33 }
  0x44   : > { %866 = vmatprep.subr.bf16.mxu1 %v944_v34 }
  0x46   : > { %845 = vmatpush3.bf16.msra.mxu0 %v945_v35 }
  0x47   : > { %867 = vmatpush3.bf16.msra.mxu1 %v946_v36 }
  0x49   : > { %596 = vmatmul.mubr.bf16.vlgmr.msra.gmra.mrb[0].mxu0 %v947_v37 }
  0x4a   : > { %637 = vmatmul.mubr.bf16.vlgmr.msra.gmra.mrb[0].mxu1 %v950_v39 }
 0x11c   : > { %v846_v41 = vpop.f32.mrb[0].mxu0 }
 0x11d   : > { %v868_v42 = vpop.f32.mrb[0].mxu1  ;;  %v847_v43 = vpop.f32.mrb[1].mxu0 }
 0x11e   : > { %v848_v44 = vadd.f32 %v847_v43, %v846_v41  ;;  %v869_v45 = vpop.f32.mrb[1].mxu1  ;;  %v849_v46 = vpop.f32.mrb[2].mxu0 }
 0x11f   : > { %v870_v47 = vadd.f32 %v869_v45, %v868_v42  ;;  %v871_v48 = vpop.f32.mrb[2].mxu1  ;;  %v850_v49 = vpop.f32.mrb[3].mxu0 }
 0x120   : > { %v851_v51 = vadd.f32 %v850_v49, %v849_v46  ;;  %v872_v52 = vpop.f32.mrb[3].mxu1 }
 0x121   : > { %v639_v53 = vadd.f32 %v870_v47, %v848_v44  ;;  %v873_v54 = vadd.f32 %v872_v52, %v871_v48  ;;  %652 = sbr.rel (%p823_p11) target bundleno = 306 (0x132), region = 63 }
 0x123   : > { %v645_v56 = vadd.f32 %v639_v53, %v281_v50  ;;  %v642_v57 = vadd.f32 %v873_v54, %v851_v51 }
 0x125   : > { %647 = vst [vmem:[#allocation2] sm:$0xff] %v645_v56  ;;  %v646_v58 = vadd.f32 %v642_v57, %v282_v55 }
 0x127   : > { %648 = vst [vmem:[#allocation2 + $0x8] sm:$0xff] %v646_v58 }
 0x12c   : > { %v653_v59 = vld [vmem:[#allocation2] sm:$0xff] }
 0x12d   : > { %v662_v62 = vadd.f32 %v824_v60, %v653_v59 }
 0x12e   : > { %v654_v61 = vld [vmem:[#allocation2 + $0x8] sm:$0xff] }
 0x12f   : > { %v663_v63 = vadd.f32 %v824_v60, %v654_v61  ;;  %664 = vst [vmem:[%s1133_s3] sm:$0xff] %v662_v62 }
 0x131   : > { %665 = vst [vmem:[%s1133_s3 + $0x8] sm:$0xff] %v663_v63 }
 0x132 PF: > { %s13_s16 = sadd.s32 1, %s991_s16   ;;  %s1134_s12 = smov %s979_s13 }
 0x133   : > { %p10_p12 = scmp.ge.s32.totalorder %s13_s16, 4   ;;  %s1135_s13 = smov %s1049_s20 }
 0x134   : > { %s1136_s14 = smov %s987_s15  ;;  %s1137_s15 = smov %s1139_s17 }
 0x135   :  { %12 = sbr.rel (!%p10_p12) target bundleno = 3 (0x3), region = 101 }

// kernel: _lambda_.38
= control target key start
LH: loop header
LB: loop body
LE: loop exit
PB: predicated region body
PF: predicated region fallthrough
CT: control target
= control target key end

     0   :  { %s980_s12 = smov 0   ;;  %s982_s13 = smov 0   ;;  %s1058_s0 = inlined_call_operand.vmem [shape: bf16[4,16,512], index: 0, kind: input, shape index: {}]   ;;  %s1059_s1 = inlined_call_operand.vmem [shape: bf16[4,512,128], index: 1, kind: input, shape index: {}]   ;;  %s1060_s2 = inlined_call_operand.vmem [shape: f32[1,128], index: 2, kind: input, shape index: {}]   ;;  %s1061_s3 = inlined_call_operand.vmem [shape: f32[4,16,128], index: 3, kind: output, shape index: {}]  }
   0x1   :  { %s984_s14 = smov 0  }
   0x2 LB: > { %s32_s15 = sadd.s32 1, %s954_s13  ;;  %p781_p0 = scmp.ge.s32.totalorder %s958_s14, 1  ;;  %s958_s14 = sphi %s984_s14, %s13_s14   ;;  %s954_s13 = sphi %s982_s13, %s1063_s13   ;;  %s950_s12 = sphi %s980_s12, %s1062_s12  }
   0x3   : > { %p34_p1 = scmp.ge.s32.totalorder %s32_s15, 4  ;;  %p190_p2 = scmp.lt.s32.totalorder %s958_s14, 5 }
   0x5   : > { %s1065_s15 = smov (%p34_p1, %s32_s15), 0  ;;  %p191_p3 = pnand %p781_p0, %p190_p2 }
   0x6   : > { %p238_p4 = scmp.lt.s32.totalorder (!%p191_p3), %s950_s12, 3  ;;  %v824_v45 = vld [vmem:[%s1060_s2] ss:$0 sm:$0xff] (!%p191_p3) }
   0x7   : > { %194 = sbr.rel (%p191_p3) target bundleno = 274 (0x112), region = 32 }
   0xe   : > { %s1067_s12 = smov (!%p238_p4, %s950_s12), 3 }
   0xf   : > { %s828_s16 = sshll.u32 %s1067_s12, 8  ;;  %s827_s20 = sshll.u32 %s1067_s12, 5 }
  0x10   : > { %s1004_s19 = scalar_lea.vmem %s1059_s1, %s828_s16  ;;  %s249_s23 = scalar_lea.vmem %s1058_s0, %s827_s20 }
  0x11   : > { %v898_v0 = vld [vmem:[%s1004_s19 + $0x40] sm:$0xff]   ;;  %v902_v4 = vld [vmem:[%s1004_s19 + $0x48] sm:$0xff]   ;;  %v906_v8 = vld [vmem:[%s1004_s19 + $0x50] sm:$0xff]   ;;  %s829_s24 = sshll.u32 %s1067_s12, 4 }
  0x12   : > { %v899_v1 = vld [vmem:[%s1004_s19 + $0xc0] sm:$0xff]   ;;  %830 = vmatprep.subr.bf16.mxu0 %v898_v0  ;;  %v903_v5 = vld [vmem:[%s1004_s19 + $0xc8] sm:$0xff]   ;;  %v907_v9 = vld [vmem:[%s1004_s19 + $0xd0] sm:$0xff]   ;;  %s270_s29 = scalar_lea.vmem %s1061_s3, %s829_s24 }
  0x13   : > { %v900_v2 = vld [vmem:[%s1004_s19] sm:$0xff]   ;;  %852 = vmatprep.subr.bf16.mxu1 %v899_v1  ;;  %v904_v6 = vld [vmem:[%s1004_s19 + $0x8] sm:$0xff]   ;;  %v908_v10 = vld [vmem:[%s1004_s19 + $0x10] sm:$0xff]  }
  0x14   : > { %v901_v3 = vld [vmem:[%s1004_s19 + $0x80] sm:$0xff]   ;;  %831 = vmatpush3.bf16.msra.mxu0 %v900_v2  ;;  %v905_v7 = vld [vmem:[%s1004_s19 + $0x88] sm:$0xff]   ;;  %v909_v11 = vld [vmem:[%s1004_s19 + $0x90] sm:$0xff]  }
  0x15   : > { %853 = vmatpush3.bf16.msra.mxu1 %v901_v3  ;;  %832 = vmatprep.subr.bf16.mxu0 %v902_v4  ;;  %v910_v12 = vld [vmem:[%s1004_s19 + $0x58] sm:$0xff]   ;;  %v914_v16 = vld [vmem:[%s1004_s19 + $0x60] sm:$0xff]   ;;  %v918_v20 = vld [vmem:[%s1004_s19 + $0x68] sm:$0xff]  }
  0x16   : > { %854 = vmatprep.subr.bf16.mxu1 %v903_v5  ;;  %v911_v13 = vld [vmem:[%s1004_s19 + $0xd8] sm:$0xff]   ;;  %v915_v17 = vld [vmem:[%s1004_s19 + $0xe0] sm:$0xff]   ;;  %v919_v21 = vld [vmem:[%s1004_s19 + $0xe8] sm:$0xff]  }
  0x17   : > { %v912_v14 = vld [vmem:[%s1004_s19 + $0x18] sm:$0xff]   ;;  %v916_v18 = vld [vmem:[%s1004_s19 + $0x20] sm:$0xff]   ;;  %v920_v22 = vld [vmem:[%s1004_s19 + $0x28] sm:$0xff]  }
  0x18   : > { %833 = vmatpush3.bf16.msra.mxu0 %v904_v6  ;;  %v913_v15 = vld [vmem:[%s1004_s19 + $0x98] sm:$0xff]   ;;  %v917_v19 = vld [vmem:[%s1004_s19 + $0xa0] sm:$0xff]   ;;  %v921_v23 = vld [vmem:[%s1004_s19 + $0xa8] sm:$0xff]  }
  0x19   : > { %855 = vmatpush3.bf16.msra.mxu1 %v905_v7  ;;  %834 = vmatprep.subr.bf16.mxu0 %v906_v8  ;;  %v922_v24 = vld [vmem:[%s1004_s19 + $0x70] sm:$0xff]   ;;  %v926_v28 = vld [vmem:[%s1004_s19 + $0x78] sm:$0xff]  }
  0x1a   : > { %856 = vmatprep.subr.bf16.mxu1 %v907_v9  ;;  %v923_v25 = vld [vmem:[%s1004_s19 + $0xf0] sm:$0xff]   ;;  %v927_v29 = vld [vmem:[%s1004_s19 + $0xf8] sm:$0xff]  }
  0x1b   : > { %v924_v26 = vld [vmem:[%s1004_s19 + $0x30] sm:$0xff]   ;;  %v928_v30 = vld [vmem:[%s1004_s19 + $0x38] sm:$0xff]  }
  0x1c   : > { %835 = vmatpush3.bf16.msra.mxu0 %v908_v10  ;;  %v925_v27 = vld [vmem:[%s1004_s19 + $0xb0] sm:$0xff]   ;;  %v929_v31 = vld [vmem:[%s1004_s19 + $0xb8] sm:$0xff]  }
  0x1d   : > { %857 = vmatpush3.bf16.msra.mxu1 %v909_v11  ;;  %836 = vmatprep.subr.bf16.mxu0 %v910_v12  ;;  %v930_v32 = vld [vmem:[%s249_s23] ss:$16 sps:$4 sm:$0xff]   ;;  %v932_v33 = vld [vmem:[%s249_s23 + $0x4] ss:$16 sps:$4 sm:$0xff]   ;;  %v933_v34 = vld [vmem:[%s249_s23 + $0x8] ss:$16 sps:$4 sm:$0xff]  }
  0x1e   : > { %858 = vmatprep.subr.bf16.mxu1 %v911_v13  ;;  %v935_v35 = vld [vmem:[%s249_s23 + $0xc] ss:$16 sps:$4 sm:$0xff]   ;;  %593 = vmatprep.mubr.bf16.mxu0 %v932_v33 }
  0x1f   : > { %634 = vmatprep.mubr.bf16.mxu1 %v935_v35 }
  0x20   : > { %837 = vmatpush3.bf16.msra.mxu0 %v912_v14 }
  0x21   : > { %859 = vmatpush3.bf16.msra.mxu1 %v913_v15  ;;  %838 = vmatprep.subr.bf16.mxu0 %v914_v16 }
  0x22   : > { %860 = vmatprep.subr.bf16.mxu1 %v915_v17 }
  0x24   : > { %839 = vmatpush3.bf16.msra.mxu0 %v916_v18 }
  0x25   : > { %861 = vmatpush3.bf16.msra.mxu1 %v917_v19  ;;  %840 = vmatprep.subr.bf16.mxu0 %v918_v20 }
  0x26   : > { %862 = vmatprep.subr.bf16.mxu1 %v919_v21 }
  0x28   : > { %841 = vmatpush3.bf16.msra.mxu0 %v920_v22 }
  0x29   : > { %863 = vmatpush3.bf16.msra.mxu1 %v921_v23  ;;  %842 = vmatprep.subr.bf16.mxu0 %v922_v24 }
  0x2a   : > { %864 = vmatprep.subr.bf16.mxu1 %v923_v25 }
  0x2c   : > { %843 = vmatpush3.bf16.msra.mxu0 %v924_v26 }
  0x2d   : > { %865 = vmatpush3.bf16.msra.mxu1 %v925_v27  ;;  %844 = vmatprep.subr.bf16.mxu0 %v926_v28 }
  0x2e   : > { %866 = vmatprep.subr.bf16.mxu1 %v927_v29 }
  0x30   : > { %845 = vmatpush3.bf16.msra.mxu0 %v928_v30 }
  0x31   : > { %867 = vmatpush3.bf16.msra.mxu1 %v929_v31 }
  0x33   : > { %594 = vmatmul.mubr.bf16.vlgmr.msra.gmra.mrb[0].mxu0 %v930_v32 }
  0x34   : > { %635 = vmatmul.mubr.bf16.vlgmr.msra.gmra.mrb[0].mxu1 %v933_v34 }
 0x106   : > { %v846_v36 = vpop.f32.mrb[0].mxu0 }
 0x107   : > { %v868_v37 = vpop.f32.mrb[0].mxu1  ;;  %v847_v38 = vpop.f32.mrb[1].mxu0 }
 0x108   : > { %v848_v39 = vadd.f32 %v847_v38, %v846_v36  ;;  %v869_v40 = vpop.f32.mrb[1].mxu1  ;;  %v849_v41 = vpop.f32.mrb[2].mxu0 }
 0x109   : > { %v870_v42 = vadd.f32 %v869_v40, %v868_v37  ;;  %v871_v43 = vpop.f32.mrb[2].mxu1  ;;  %v850_v44 = vpop.f32.mrb[3].mxu0 }
 0x10a   : > { %v851_v46 = vadd.f32 %v850_v44, %v849_v41  ;;  %v872_v47 = vpop.f32.mrb[3].mxu1 }
 0x10b   : > { %v637_v48 = vadd.f32 %v870_v42, %v848_v39  ;;  %v873_v49 = vadd.f32 %v872_v47, %v871_v43 }
 0x10d   : > { %v659_v50 = vadd.f32 %v824_v45, %v637_v48  ;;  %v640_v51 = vadd.f32 %v873_v49, %v851_v46 }
 0x10f   : > { %661 = vst [vmem:[%s270_s29] sm:$0xff] %v659_v50  ;;  %v660_v52 = vadd.f32 %v824_v45, %v640_v51 }
 0x111   : > { %662 = vst [vmem:[%s270_s29 + $0x8] sm:$0xff] %v660_v52 }
 0x112 PF: > { %s13_s14 = sadd.s32 1, %s958_s14   ;;  %s1062_s12 = smov %s954_s13 }
 0x113   : > { %p10_p5 = scmp.ge.s32.totalorder %s13_s14, 6   ;;  %s1063_s13 = smov %s1065_s15 }
 0x115   :  { %12 = sbr.rel (!%p10_p5) target bundleno = 2 (0x2), region = 73 }

// kernel: _lambda_.41
= control target key start
LH: loop header
LB: loop body
LE: loop exit
PB: predicated region body
PF: predicated region fallthrough
CT: control target
= control target key end

     0   :  { %s801_s12 = smov 0   ;;  %s803_s13 = smov 0   ;;  %s866_s0 = inlined_call_operand.vmem [shape: bf16[4,32,256], index: 0, kind: input, shape index: {}]   ;;  %s867_s1 = inlined_call_operand.vmem [shape: bf16[4,256,128], index: 1, kind: input, shape index: {}]   ;;  %s868_s2 = inlined_call_operand.vmem [shape: f32[1,128], index: 2, kind: input, shape index: {}]   ;;  %s869_s3 = inlined_call_operand.vmem [shape: f32[4,32,128], index: 3, kind: output, shape index: {}]  }
   0x1   :  { %s805_s14 = smov 0  }
   0x2 LB: > { %s32_s15 = sadd.s32 1, %s775_s13  ;;  %p634_p0 = scmp.ge.s32.totalorder %s779_s14, 1  ;;  %s779_s14 = sphi %s805_s14, %s13_s14   ;;  %s775_s13 = sphi %s803_s13, %s871_s13   ;;  %s771_s12 = sphi %s801_s12, %s870_s12  }
   0x3   : > { %p34_p1 = scmp.ge.s32.totalorder %s32_s15, 4  ;;  %p190_p2 = scmp.lt.s32.totalorder %s779_s14, 5 }
   0x5   : > { %s873_s15 = smov (%p34_p1, %s32_s15), 0  ;;  %p191_p3 = pnand %p634_p0, %p190_p2 }
   0x6   : > { %p238_p4 = scmp.lt.s32.totalorder (!%p191_p3), %s771_s12, 3  ;;  %v661_v23 = vld [vmem:[%s868_s2] ss:$0 sm:$0xff] (!%p191_p3) }
   0x7   : > { %194 = sbr.rel (%p191_p3) target bundleno = 270 (0x10e), region = 32 }
   0xe   : > { %s875_s12 = smov (!%p238_p4, %s771_s12), 3 }
   0xf   : > { %s665_s16 = sshll.u32 %s875_s12, 7  ;;  %s664_s20 = sshll.u32 %s875_s12, 5 }
  0x10   : > { %s825_s19 = scalar_lea.vmem %s867_s1, %s665_s16  ;;  %s249_s23 = scalar_lea.vmem %s866_s0, %s664_s20 }
  0x11   : > { %v735_v0 = vld [vmem:[%s825_s19 + $0x40] sm:$0xff]   ;;  %v737_v2 = vld [vmem:[%s825_s19 + $0x48] sm:$0xff]   ;;  %v739_v4 = vld [vmem:[%s825_s19 + $0x50] sm:$0xff]   ;;  %s270_s28 = scalar_lea.vmem %s869_s3, %s664_s20 }
  0x12   : > { %v736_v1 = vld [vmem:[%s825_s19] sm:$0xff]   ;;  %667 = vmatprep.subr.bf16.mxu0 %v735_v0  ;;  %695 = vmatprep.subr.bf16.mxu1 %v735_v0  ;;  %v738_v3 = vld [vmem:[%s825_s19 + $0x8] sm:$0xff]   ;;  %v740_v5 = vld [vmem:[%s825_s19 + $0x10] sm:$0xff]  }
  0x13   : > { %668 = vmatpush3.bf16.msra.mxu0 %v736_v1  ;;  %703 = vmatpush3.bf16.msra.mxu1 %v736_v1  ;;  %v741_v6 = vld [vmem:[%s825_s19 + $0x58] sm:$0xff]   ;;  %v743_v8 = vld [vmem:[%s825_s19 + $0x60] sm:$0xff]   ;;  %v745_v10 = vld [vmem:[%s825_s19 + $0x68] sm:$0xff]  }
  0x14   : > { %669 = vmatprep.subr.bf16.mxu0 %v737_v2  ;;  %696 = vmatprep.subr.bf16.mxu1 %v737_v2  ;;  %v742_v7 = vld [vmem:[%s825_s19 + $0x18] sm:$0xff]   ;;  %v744_v9 = vld [vmem:[%s825_s19 + $0x20] sm:$0xff]   ;;  %v746_v13 = vld [vmem:[%s825_s19 + $0x28] sm:$0xff]  }
  0x15   : > { %v753_v11 = vld [vmem:[%s249_s23 + $0x4] ss:$8 sps:$4 sm:$0xff]   ;;  %v756_v12 = vld [vmem:[%s249_s23 + $0x14] ss:$8 sps:$4 sm:$0xff]   ;;  %v751_v18 = vld [vmem:[%s249_s23] ss:$8 sps:$4 sm:$0xff]  }
  0x16   : > { %v747_v14 = vld [vmem:[%s825_s19 + $0x70] sm:$0xff]   ;;  %469 = vmatprep.mubr.bf16.mxu0 %v753_v11  ;;  %477 = vmatprep.mubr.bf16.mxu1 %v756_v12  ;;  %v749_v16 = vld [vmem:[%s825_s19 + $0x78] sm:$0xff]  }
  0x17   : > { %670 = vmatpush3.bf16.msra.mxu0 %v738_v3  ;;  %704 = vmatpush3.bf16.msra.mxu1 %v738_v3  ;;  %v748_v15 = vld [vmem:[%s825_s19 + $0x30] sm:$0xff]   ;;  %v750_v17 = vld [vmem:[%s825_s19 + $0x38] sm:$0xff]  }
  0x18   : > { %671 = vmatprep.subr.bf16.mxu0 %v739_v4  ;;  %697 = vmatprep.subr.bf16.mxu1 %v739_v4  ;;  %v754_v19 = vld [vmem:[%s249_s23 + $0x10] ss:$8 sps:$4 sm:$0xff]  }
  0x1b   : > { %672 = vmatpush3.bf16.msra.mxu0 %v740_v5  ;;  %705 = vmatpush3.bf16.msra.mxu1 %v740_v5 }
  0x1c   : > { %673 = vmatprep.subr.bf16.mxu0 %v741_v6  ;;  %698 = vmatprep.subr.bf16.mxu1 %v741_v6 }
  0x1f   : > { %674 = vmatpush3.bf16.msra.mxu0 %v742_v7  ;;  %706 = vmatpush3.bf16.msra.mxu1 %v742_v7 }
  0x20   : > { %675 = vmatprep.subr.bf16.mxu0 %v743_v8  ;;  %699 = vmatprep.subr.bf16.mxu1 %v743_v8 }
  0x23   : > { %676 = vmatpush3.bf16.msra.mxu0 %v744_v9  ;;  %707 = vmatpush3.bf16.msra.mxu1 %v744_v9 }
  0x24   : > { %677 = vmatprep.subr.bf16.mxu0 %v745_v10  ;;  %700 = vmatprep.subr.bf16.mxu1 %v745_v10 }
  0x27   : > { %678 = vmatpush3.bf16.msra.mxu0 %v746_v13  ;;  %708 = vmatpush3.bf16.msra.mxu1 %v746_v13 }
  0x28   : > { %679 = vmatprep.subr.bf16.mxu0 %v747_v14  ;;  %701 = vmatprep.subr.bf16.mxu1 %v747_v14 }
  0x2b   : > { %680 = vmatpush3.bf16.msra.mxu0 %v748_v15  ;;  %709 = vmatpush3.bf16.msra.mxu1 %v748_v15 }
  0x2c   : > { %681 = vmatprep.subr.bf16.mxu0 %v749_v16  ;;  %702 = vmatprep.subr.bf16.mxu1 %v749_v16 }
  0x2f   : > { %682 = vmatpush3.bf16.msra.mxu0 %v750_v17  ;;  %710 = vmatpush3.bf16.msra.mxu1 %v750_v17 }
  0x32   : > { %470 = vmatmul.mubr.bf16.vlgmr.msra.gmra.mrb[0].mxu0 %v751_v18  ;;  %478 = vmatmul.mubr.bf16.vlgmr.msra.gmra.mrb[0].mxu1 %v754_v19 }
 0x105   : > { %v683_v20 = vpop.f32.mrb[0].mxu0  ;;  %v689_v21 = vpop.f32.mrb[0].mxu1 }
 0x106   : > { %v684_v22 = vpop.f32.mrb[1].mxu0  ;;  %v690_v24 = vpop.f32.mrb[1].mxu1 }
 0x107   : > { %v685_v25 = vadd.f32 %v684_v22, %v683_v20  ;;  %v691_v26 = vadd.f32 %v690_v24, %v689_v21  ;;  %v686_v27 = vpop.f32.mrb[2].mxu0  ;;  %v692_v28 = vpop.f32.mrb[2].mxu1 }
 0x108   : > { %v687_v29 = vpop.f32.mrb[3].mxu0  ;;  %v693_v30 = vpop.f32.mrb[3].mxu1 }
 0x109   : > { %v508_v31 = vadd.f32 %v685_v25, %v661_v23  ;;  %v510_v32 = vadd.f32 %v691_v26, %v661_v23  ;;  %v688_v33 = vadd.f32 %v687_v29, %v686_v27  ;;  %v694_v34 = vadd.f32 %v693_v30, %v692_v28 }
 0x10b   : > { %512 = vst [vmem:[%s270_s28] sm:$0xff] %v508_v31  ;;  %514 = vst [vmem:[%s270_s28 + $0x10] sm:$0xff] %v510_v32  ;;  %v509_v35 = vadd.f32 %v688_v33, %v661_v23  ;;  %v511_v36 = vadd.f32 %v694_v34, %v661_v23 }
 0x10d   : > { %513 = vst [vmem:[%s270_s28 + $0x8] sm:$0xff] %v509_v35  ;;  %515 = vst [vmem:[%s270_s28 + $0x18] sm:$0xff] %v511_v36 }
 0x10e PF: > { %s13_s14 = sadd.s32 1, %s779_s14   ;;  %s870_s12 = smov %s775_s13 }
 0x10f   : > { %p10_p5 = scmp.ge.s32.totalorder %s13_s14, 6   ;;  %s871_s13 = smov %s873_s15 }
 0x111   :  { %12 = sbr.rel (!%p10_p5) target bundleno = 2 (0x2), region = 73 }

// kernel: _lambda_.44
= control target key start
LH: loop header
LB: loop body
LE: loop exit
PB: predicated region body
PF: predicated region fallthrough
CT: control target
= control target key end

     0   :  { %s908_s12 = smov 0   ;;  %s910_s13 = smov 0   ;;  %s989_s0 = inlined_call_operand.vmem [shape: bf16[4,128,128], index: 0, kind: input, shape index: {}]   ;;  %s990_s1 = inlined_call_operand.vmem [shape: bf16[4,128,128], index: 1, kind: input, shape index: {}]   ;;  %s991_s2 = inlined_call_operand.vmem [shape: f32[1,128], index: 2, kind: input, shape index: {}]   ;;  %s992_s3 = inlined_call_operand.vmem [shape: f32[4,128,128], index: 3, kind: output, shape index: {}]  }
   0x1   :  { %s912_s14 = smov 0  }
   0x2 LB: > { %s32_s15 = sadd.s32 1, %s882_s13  ;;  %p731_p0 = scmp.ge.s32.totalorder %s886_s14, 1  ;;  %s886_s14 = sphi %s912_s14, %s13_s14   ;;  %s882_s13 = sphi %s910_s13, %s994_s13   ;;  %s878_s12 = sphi %s908_s12, %s993_s12  }
   0x3   : > { %p34_p1 = scmp.ge.s32.totalorder %s32_s15, 4  ;;  %p187_p2 = scmp.lt.s32.totalorder %s886_s14, 5 }
   0x5   : > { %s996_s15 = smov (%p34_p1, %s32_s15), 0  ;;  %p188_p3 = pnand %p731_p0, %p187_p2 }
   0x6   : > { %p232_p4 = scmp.lt.s32.totalorder (!%p188_p3), %s878_s12, 3  ;;  %v754_v16 = vld [vmem:[%s991_s2] ss:$0 sm:$0xff] (!%p188_p3) }
   0x7   : > { %191 = sbr.rel (%p188_p3) target bundleno = 276 (0x114), region = 32 }
   0xe   : > { %s998_s12 = smov (!%p232_p4, %s878_s12), 3 }
   0xf   : > { %s757_s16 = sshll.u32 %s998_s12, 6  ;;  %s759_s23 = sshll.u32 %s998_s12, 7 }
  0x10   : > { %s932_s19 = scalar_lea.vmem %s990_s1, %s757_s16  ;;  %s940_s22 = scalar_lea.vmem %s989_s0, %s757_s16 }
  0x11   : > { %v848_v0 = vld [vmem:[%s932_s19] sm:$0xff]   ;;  %v849_v1 = vld [vmem:[%s932_s19 + $0x8] sm:$0xff]   ;;  %v850_v2 = vld [vmem:[%s932_s19 + $0x10] sm:$0xff]   ;;  %s962_s28 = scalar_lea.vmem %s992_s3, %s759_s23 }
  0x12   : > { %776 = vmatprep.subr.bf16.mxu0 %v848_v0  ;;  %808 = vmatprep.subr.bf16.mxu1 %v848_v0  ;;  %v851_v3 = vld [vmem:[%s932_s19 + $0x18] sm:$0xff]   ;;  %v856_v4 = vld [vmem:[%s940_s22] sm:$0xff]   ;;  %v853_v7 = vld [vmem:[%s932_s19 + $0x28] sm:$0xff]  }
  0x13   : > { %777 = vmatpush3.bf16.msra.mxu0 %v848_v0  ;;  %816 = vmatpush3.bf16.msra.mxu1 %v848_v0  ;;  %v857_v5 = vld [vmem:[%s940_s22 + $0x20] sm:$0xff]   ;;  %v854_v8 = vld [vmem:[%s932_s19 + $0x30] sm:$0xff]   ;;  %v855_v9 = vld [vmem:[%s932_s19 + $0x38] sm:$0xff]  }
  0x14   : > { %778 = vmatprep.subr.bf16.mxu0 %v849_v1  ;;  %809 = vmatprep.subr.bf16.mxu1 %v849_v1  ;;  %v852_v6 = vld [vmem:[%s932_s19 + $0x20] sm:$0xff]   ;;  %v858_v10 = vld [vmem:[%s940_s22 + $0x8] sm:$0xff]   ;;  %v860_v12 = vld [vmem:[%s940_s22 + $0x10] sm:$0xff]  }
  0x15   : > { %792 = vmatprep.mubr.bf16.mxu0 %v856_v4  ;;  %800 = vmatprep.mubr.bf16.mxu1 %v857_v5  ;;  %v859_v11 = vld [vmem:[%s940_s22 + $0x28] sm:$0xff]   ;;  %v861_v13 = vld [vmem:[%s940_s22 + $0x30] sm:$0xff]   ;;  %v862_v14 = vld [vmem:[%s940_s22 + $0x18] sm:$0xff]  }
  0x16   : > { %v863_v15 = vld [vmem:[%s940_s22 + $0x38] sm:$0xff]  }
  0x17   : > { %779 = vmatpush3.bf16.msra.mxu0 %v849_v1  ;;  %817 = vmatpush3.bf16.msra.mxu1 %v849_v1 }
  0x18   : > { %780 = vmatprep.subr.bf16.mxu0 %v850_v2  ;;  %810 = vmatprep.subr.bf16.mxu1 %v850_v2 }
  0x1b   : > { %781 = vmatpush3.bf16.msra.mxu0 %v850_v2  ;;  %818 = vmatpush3.bf16.msra.mxu1 %v850_v2 }
  0x1c   : > { %782 = vmatprep.subr.bf16.mxu0 %v851_v3  ;;  %811 = vmatprep.subr.bf16.mxu1 %v851_v3 }
  0x1f   : > { %783 = vmatpush3.bf16.msra.mxu0 %v851_v3  ;;  %819 = vmatpush3.bf16.msra.mxu1 %v851_v3 }
  0x20   : > { %784 = vmatprep.subr.bf16.mxu0 %v852_v6  ;;  %812 = vmatprep.subr.bf16.mxu1 %v852_v6 }
  0x23   : > { %785 = vmatpush3.bf16.msra.mxu0 %v852_v6  ;;  %820 = vmatpush3.bf16.msra.mxu1 %v852_v6 }
  0x24   : > { %786 = vmatprep.subr.bf16.mxu0 %v853_v7  ;;  %813 = vmatprep.subr.bf16.mxu1 %v853_v7 }
  0x27   : > { %787 = vmatpush3.bf16.msra.mxu0 %v853_v7  ;;  %821 = vmatpush3.bf16.msra.mxu1 %v853_v7 }
  0x28   : > { %788 = vmatprep.subr.bf16.mxu0 %v854_v8  ;;  %814 = vmatprep.subr.bf16.mxu1 %v854_v8 }
  0x2b   : > { %789 = vmatpush3.bf16.msra.mxu0 %v854_v8  ;;  %822 = vmatpush3.bf16.msra.mxu1 %v854_v8 }
  0x2c   : > { %790 = vmatprep.subr.bf16.mxu0 %v855_v9  ;;  %815 = vmatprep.subr.bf16.mxu1 %v855_v9 }
  0x2f   : > { %791 = vmatpush3.bf16.msra.mxu0 %v855_v9  ;;  %823 = vmatpush3.bf16.msra.mxu1 %v855_v9 }
  0x32   : > { %793 = vmatmul.mubr.bf16.vlgmr.msra.gmra.mrb[0].mxu0 %v858_v10  ;;  %801 = vmatmul.mubr.bf16.vlgmr.msra.gmra.mrb[0].mxu1 %v859_v11 }
  0x33   : > { %796 = vmatprep.mubr.bf16.mxu0 %v860_v12  ;;  %804 = vmatprep.mubr.bf16.mxu1 %v861_v13 }
  0x3a   : > { %797 = vmatmul.mubr.bf16.gmra.mrb[4].mxu0 %v862_v14  ;;  %805 = vmatmul.mubr.bf16.gmra.mrb[4].mxu1 %v863_v15 }
 0x105   : > { %v794_v17 = vpop.f32.mrb[0].mxu0  ;;  %v802_v18 = vpop.f32.mrb[0].mxu1 }
 0x106   : > { %v586_v19 = vadd.f32 %v794_v17, %v754_v16  ;;  %v594_v20 = vadd.f32 %v802_v18, %v754_v16  ;;  %v463_v21 = vpop.f32.mrb[1].mxu0  ;;  %v495_v22 = vpop.f32.mrb[1].mxu1 }
 0x107   : > { %v584_v23 = vadd.f32 %v754_v16, %v463_v21  ;;  %v592_v24 = vadd.f32 %v754_v16, %v495_v22  ;;  %v795_v25 = vpop.f32.mrb[2].mxu0  ;;  %v803_v26 = vpop.f32.mrb[2].mxu1 }
 0x108   : > { %602 = vst [vmem:[%s962_s28 + $0x10] sm:$0xff] %v586_v19  ;;  %610 = vst [vmem:[%s962_s28 + $0x50] sm:$0xff] %v594_v20  ;;  %v587_v27 = vadd.f32 %v795_v25, %v754_v16  ;;  %v595_v28 = vadd.f32 %v803_v26, %v754_v16  ;;  %v466_v29 = vpop.f32.mrb[3].mxu0  ;;  %v498_v30 = vpop.f32.mrb[3].mxu1 }
 0x109   : > { %600 = vst [vmem:[%s962_s28] sm:$0xff] %v584_v23  ;;  %608 = vst [vmem:[%s962_s28 + $0x40] sm:$0xff] %v592_v24  ;;  %v585_v31 = vadd.f32 %v754_v16, %v466_v29  ;;  %v593_v32 = vadd.f32 %v754_v16, %v498_v30 }
 0x10a   : > { %603 = vst [vmem:[%s962_s28 + $0x18] sm:$0xff] %v587_v27  ;;  %611 = vst [vmem:[%s962_s28 + $0x58] sm:$0xff] %v595_v28 }
 0x10b   : > { %601 = vst [vmem:[%s962_s28 + $0x8] sm:$0xff] %v585_v31  ;;  %609 = vst [vmem:[%s962_s28 + $0x48] sm:$0xff] %v593_v32 }
 0x10d   : > { %v798_v33 = vpop.f32.mrb[4].mxu0  ;;  %v806_v34 = vpop.f32.mrb[4].mxu1 }
 0x10e   : > { %v590_v35 = vadd.f32 %v798_v33, %v754_v16  ;;  %v598_v36 = vadd.f32 %v806_v34, %v754_v16  ;;  %v479_v37 = vpop.f32.mrb[5].mxu0  ;;  %v511_v38 = vpop.f32.mrb[5].mxu1 }
 0x10f   : > { %v588_v39 = vadd.f32 %v754_v16, %v479_v37  ;;  %v596_v40 = vadd.f32 %v754_v16, %v511_v38  ;;  %v799_v41 = vpop.f32.mrb[6].mxu0  ;;  %v807_v42 = vpop.f32.mrb[6].mxu1 }
 0x110   : > { %606 = vst [vmem:[%s962_s28 + $0x30] sm:$0xff] %v590_v35  ;;  %614 = vst [vmem:[%s962_s28 + $0x70] sm:$0xff] %v598_v36  ;;  %v591_v43 = vadd.f32 %v799_v41, %v754_v16  ;;  %v599_v44 = vadd.f32 %v807_v42, %v754_v16  ;;  %v482_v45 = vpop.f32.mrb[7].mxu0  ;;  %v514_v46 = vpop.f32.mrb[7].mxu1 }
 0x111   : > { %604 = vst [vmem:[%s962_s28 + $0x20] sm:$0xff] %v588_v39  ;;  %612 = vst [vmem:[%s962_s28 + $0x60] sm:$0xff] %v596_v40  ;;  %v589_v47 = vadd.f32 %v754_v16, %v482_v45  ;;  %v597_v48 = vadd.f32 %v754_v16, %v514_v46 }
 0x112   : > { %607 = vst [vmem:[%s962_s28 + $0x38] sm:$0xff] %v591_v43  ;;  %615 = vst [vmem:[%s962_s28 + $0x78] sm:$0xff] %v599_v44 }
 0x113   : > { %605 = vst [vmem:[%s962_s28 + $0x28] sm:$0xff] %v589_v47  ;;  %613 = vst [vmem:[%s962_s28 + $0x68] sm:$0xff] %v597_v48 }
 0x114 PF: > { %s13_s14 = sadd.s32 1, %s886_s14   ;;  %s993_s12 = smov %s882_s13 }
 0x115   : > { %p10_p5 = scmp.ge.s32.totalorder %s13_s14, 6   ;;  %s994_s13 = smov %s996_s15 }
 0x117   :  { %12 = sbr.rel (!%p10_p5) target bundleno = 2 (0x2), region = 73 }

// kernel: _lambda_.45
= control target key start
LH: loop header
LB: loop body
LE: loop exit
PB: predicated region body
PF: predicated region fallthrough
CT: control target
= control target key end

     0   :  { %vm12_vm0 = vcmask 58368   ;;  %vm78_vm1 = vcmask 64512   ;;  %v420_v0 = vmov 0.0   ;;  %vm409_vm2 = vcmask 1040384   ;;  %s1294_s0 = inlined_call_operand.vmem [shape: f32[512,8], index: 0, kind: input, shape index: {}]   ;;  %s1295_s1 = inlined_call_operand.vmem [shape: f32[2,8], index: 1, kind: output, shape index: {}]  }
   0x1   :  { %13 = vst.msk [vmem:[%s1295_s1] sm:$0x3] %vm12_vm0, %v420_v0  ;;  %v438_v1 = vld [vmem:[%s1294_s0] sm:$0xff]  ;;  %v443_v2 = vld [vmem:[%s1294_s0 + $0x8] sm:$0xff]  ;;  %v448_v3 = vld [vmem:[%s1294_s0 + $0x10] sm:$0xff] }
   0x2   :  { %v79_v4 = vsel %vm78_vm1, %v438_v1, 0.0  ;;  %v80_v5 = vsel %vm78_vm1, %v443_v2, 0.0  ;;  %v82_v6 = vsel %vm78_vm1, %v448_v3, 0.0  ;;  %v459_v7 = vld [vmem:[%s1294_s0 + $0x18] sm:$0xff]  ;;  %v466_v10 = vld [vmem:[%s1294_s0 + $0x20] sm:$0xff]  ;;  %v473_v13 = vld [vmem:[%s1294_s0 + $0x28] sm:$0xff] }
   0x3   :  { %v81_v8 = vadd.f32 %v80_v5, %v79_v4  ;;  %v84_v9 = vsel %vm78_vm1, %v459_v7, 0.0  ;;  %v86_v12 = vsel %vm78_vm1, %v466_v10, 0.0  ;;  %v88_v15 = vsel %vm78_vm1, %v473_v13, 0.0  ;;  %v480_v16 = vld [vmem:[%s1294_s0 + $0x30] sm:$0xff]  ;;  %v485_v18 = vld [vmem:[%s1294_s0 + $0x38] sm:$0xff]  ;;  %v490_v19 = vld [vmem:[%s1294_s0 + $0x40] sm:$0xff] }
   0x4   :  { %v90_v20 = vsel %vm78_vm1, %v480_v16, 0.0  ;;  %v497_v21 = vld [vmem:[%s1294_s0 + $0x48] sm:$0xff]  ;;  %v502_v22 = vld [vmem:[%s1294_s0 + $0x50] sm:$0xff]  ;;  %v507_v23 = vld [vmem:[%s1294_s0 + $0x58] sm:$0xff]  ;;  %v92_v25 = vsel %vm78_vm1, %v485_v18, 0.0  ;;  %v94_v26 = vsel %vm78_vm1, %v490_v19, 0.0 }
   0x5   :  { %v83_v11 = vadd.f32 %v82_v6, %v81_v8  ;;  %v516_v27 = vld [vmem:[%s1294_s0 + $0x108] sm:$0xff]  ;;  %v521_v28 = vld [vmem:[%s1294_s0 + $0x110] sm:$0xff]  ;;  %v526_v29 = vld [vmem:[%s1294_s0 + $0x118] sm:$0xff]  ;;  %v96_v30 = vsel %vm78_vm1, %v497_v21, 0.0  ;;  %v98_v31 = vsel %vm78_vm1, %v502_v22, 0.0  ;;  %v534_v32 = vsel %vm78_vm1, %v507_v23, 0.0 }
   0x6   :  { %v539_v33 = vld [vmem:[%s1294_s0 + $0x120] sm:$0xff]  ;;  %v544_v34 = vld [vmem:[%s1294_s0 + $0x128] sm:$0xff]  ;;  %v549_v35 = vld [vmem:[%s1294_s0 + $0x130] sm:$0xff]  ;;  %v553_v37 = vsel %vm78_vm1, %v516_v27, 0.0  ;;  %v557_v38 = vsel %vm78_vm1, %v521_v28, 0.0  ;;  %v561_v39 = vsel %vm78_vm1, %v526_v29, 0.0 }
   0x7   :  { %v85_v14 = vadd.f32 %v84_v9, %v83_v11  ;;  %1314 = vst [vmem:[#allocation2_spill] sm:$0xff] %v553_v37  ;;  %1315 = vst [vmem:[#allocation3_spill] sm:$0xff] %v557_v38  ;;  %v566_v40 = vld [vmem:[%s1294_s0 + $0x138] sm:$0xff]  ;;  %v571_v41 = vld [vmem:[%s1294_s0 + $0x140] sm:$0xff]  ;;  %v580_v43 = vsel %vm78_vm1, %v539_v33, 0.0  ;;  %v584_v44 = vsel %vm78_vm1, %v544_v34, 0.0  ;;  %v214_v37 = vmul.f32 %v448_v3, %v448_v3 }
   0x8   :  { %1316 = vst [vmem:[#allocation4_spill] sm:$0xff] %v561_v39  ;;  %v576_v42 = vld [vmem:[%s1294_s0 + $0x148] sm:$0xff]  ;;  %1317 = vst [vmem:[#allocation5_spill] sm:$0xff] %v580_v43  ;;  %v588_v45 = vsel %vm78_vm1, %v549_v35, 0.0  ;;  %v593_v46 = vld [vmem:[%s1294_s0 + $0x150] sm:$0xff]  ;;  %v607_v50 = vsel %vm78_vm1, %v566_v40, 0.0 }
   0x9   :  { %v87_v17 = vadd.f32 %v86_v12, %v85_v14  ;;  %1318 = vst [vmem:[#allocation6_spill] sm:$0xff] %v584_v44  ;;  %1319 = vst [vmem:[#allocation7_spill] sm:$0xff] %v588_v45  ;;  %v598_v47 = vld [vmem:[%s1294_s0 + $0x158] sm:$0xff]  ;;  %v603_v48 = vld [vmem:[%s1294_s0 + $0x160] sm:$0xff]  ;;  %v611_v51 = vsel %vm78_vm1, %v571_v41, 0.0  ;;  %v615_v52 = vsel %vm78_vm1, %v576_v42, 0.0 }
   0xa   :  { %1320 = vst [vmem:[#allocation8_spill] sm:$0xff] %v607_v50  ;;  %1321 = vst [vmem:[#allocation9_spill] sm:$0xff] %v611_v51  ;;  %v620_v53 = vld [vmem:[%s1294_s0 + $0x168] sm:$0xff]  ;;  %v625_v54 = vld [vmem:[%s1294_s0 + $0x170] sm:$0xff]  ;;  %v634_v56 = vsel %vm78_vm1, %v593_v46, 0.0  ;;  %v638_v57 = vsel %vm78_vm1, %v598_v47, 0.0 }
   0xb   :  { %v89_v24 = vadd.f32 %v88_v15, %v87_v17  ;;  %1322 = vst [vmem:[#allocation10_spill] sm:$0xff] %v615_v52  ;;  %v630_v55 = vld [vmem:[%s1294_s0 + $0x178] sm:$0xff]  ;;  %1323 = vst [vmem:[#allocation11_spill] sm:$0xff] %v634_v56  ;;  %v642_v58 = vsel %vm78_vm1, %v603_v48, 0.0  ;;  %v647_v59 = vld [vmem:[%s1294_s0 + $0x180] sm:$0xff]  ;;  %v661_v63 = vsel %vm78_vm1, %v620_v53, 0.0 }
   0xc   :  { %1324 = vst [vmem:[#allocation12_spill] sm:$0xff] %v638_v57  ;;  %1325 = vst [vmem:[#allocation13_spill] sm:$0xff] %v642_v58  ;;  %v652_v60 = vld [vmem:[%s1294_s0 + $0x188] sm:$0xff]  ;;  %v657_v61 = vld [vmem:[%s1294_s0 + $0x190] sm:$0xff]  ;;  %v665_v0 = vsel %vm78_vm1, %v625_v54, 0.0  ;;  %v669_v4 = vsel %vm78_vm1, %v630_v55, 0.0 }
   0xd   :  { %v91_v36 = vadd.f32 %v90_v20, %v89_v24  ;;  %1326 = vst [vmem:[#allocation14_spill] sm:$0xff] %v661_v63  ;;  %1327 = vst [vmem:[#allocation15_spill] sm:$0xff] %v665_v0  ;;  %v674_v5 = vld [vmem:[%s1294_s0 + $0x198] sm:$0xff]  ;;  %v679_v6 = vld [vmem:[%s1294_s0 + $0x1a0] sm:$0xff]  ;;  %v688_v9 = vsel %vm78_vm1, %v647_v59, 0.0  ;;  %v692_v11 = vsel %vm78_vm1, %v652_v60, 0.0 }
   0xe   :  { %1328 = vst [vmem:[#allocation16_spill] sm:$0xff] %v669_v4  ;;  %v684_v8 = vld [vmem:[%s1294_s0 + $0x1a8] sm:$0xff]  ;;  %1329 = vst [vmem:[#allocation17_spill] sm:$0xff] %v688_v9  ;;  %v696_v12 = vsel %vm78_vm1, %v657_v61, 0.0  ;;  %v701_v14 = vld [vmem:[%s1294_s0 + $0x60] sm:$0xff] }
   0xf   :  { %v93_v49 = vadd.f32 %v92_v25, %v91_v36  ;;  %1330 = vst [vmem:[#allocation18_spill] sm:$0xff] %v692_v11  ;;  %1331 = vst [vmem:[#allocation19_spill] sm:$0xff] %v696_v12  ;;  %v706_v15 = vld [vmem:[%s1294_s0 + $0x1b0] sm:$0xff]  ;;  %v711_v17 = vld [vmem:[%s1294_s0 + $0x1b8] sm:$0xff]  ;;  %v720_v25 = vsel %vm78_vm1, %v674_v5, 0.0  ;;  %v728_v36 = vsel %vm78_vm1, %v684_v8, 0.0 }
  0x10   :  { %v716_v20 = vld [vmem:[%s1294_s0 + $0x1c0] sm:$0xff]  ;;  %1332 = vst [vmem:[#allocation20_spill] sm:$0xff] %v720_v25  ;;  %1334 = vst [vmem:[#allocation22_spill] sm:$0xff] %v728_v36  ;;  %v751_v36 = vsel %vm78_vm1, %v711_v17, 0.0  ;;  %v765_v11 = vld [vmem:[%s1294_s0 + $0x1e8] sm:$0xff] }
  0x11   :  { %v95_v62 = vadd.f32 %v94_v26, %v93_v49  ;;  %v724_v26 = vsel %vm78_vm1, %v679_v6, 0.0  ;;  %v733_v49 = vld [vmem:[%s1294_s0 + $0x1c8] sm:$0xff]  ;;  %1336 = vst [vmem:[#allocation24_spill] sm:$0xff] %v751_v36  ;;  %v755_v25 = vsel %vm78_vm1, %v716_v20, 0.0  ;;  %v760_v12 = vld [vmem:[%s1294_s0 + $0x1e0] sm:$0xff]  ;;  %v787_v0 = vld [vmem:[%s1294_s0 + $0x1f8] sm:$0xff] }
  0x12   :  { %1333 = vst [vmem:[#allocation21_spill] sm:$0xff] %v724_v26  ;;  %v747_v26 = vsel %vm78_vm1, %v706_v15, 0.0  ;;  %1337 = vst [vmem:[#allocation25_spill] sm:$0xff] %v755_v25  ;;  %v774_v9 = vsel %vm78_vm1, %v733_v49, 0.0  ;;  %v809_v58 = vsel %vm78_vm1, %v787_v0, 0.0  ;;  %v838_v56 = vld [vmem:[%s1294_s0 + $0x90] sm:$0xff] }
  0x13   :  { %v97_v24 = vadd.f32 %v96_v30, %v95_v62  ;;  %v738_v30 = vld [vmem:[%s1294_s0 + $0x1d0] sm:$0xff]  ;;  %v743_v62 = vld [vmem:[%s1294_s0 + $0x1d8] sm:$0xff]  ;;  %1335 = vst [vmem:[#allocation23_spill] sm:$0xff] %v747_v26  ;;  %1339 = vst [vmem:[#allocation27_spill] sm:$0xff] %v774_v9  ;;  %v797_v9 = vsel %vm78_vm1, %v765_v11, 0.0 }
  0x14   :  { %v770_v26 = vld [vmem:[%s1294_s0 + $0x1f0] sm:$0xff]  ;;  %v778_v25 = vsel %vm78_vm1, %v738_v30, 0.0  ;;  %v782_v4 = vsel %vm78_vm1, %v743_v62, 0.0  ;;  %1342 = vst [vmem:[#allocation30_spill] sm:$0xff] %v787_v0  ;;  %1344 = vst [vmem:[#allocation32_spill] sm:$0xff] %v797_v9  ;;  %v843_v52 = vld [vmem:[%s1294_s0 + $0x98] sm:$0xff] }
  0x15   :  { %1338 = vst [vmem:[#allocation26_spill] sm:$0xff] %v770_v26  ;;  %v99_v36 = vadd.f32 %v98_v31, %v97_v24  ;;  %1340 = vst [vmem:[#allocation28_spill] sm:$0xff] %v778_v25  ;;  %v102_v31 = vsel %vm78_vm1, %v701_v14, 0.0  ;;  %v793_v24 = vsel %vm78_vm1, %v760_v12, 0.0  ;;  %v801_v25 = vsel %vm78_vm1, %v770_v26, 0.0  ;;  %v28_v9 = vld [vmem:[%s1294_s0 + $0x70] sm:$0xff] }
  0x16   :  { %1341 = vst [vmem:[#allocation29_spill] sm:$0xff] %v782_v4  ;;  %1343 = vst [vmem:[#allocation31_spill] sm:$0xff] %v793_v24  ;;  %v27_v4 = vld [vmem:[%s1294_s0 + $0x68] sm:$0xff]  ;;  %v848_v51 = vld [vmem:[%s1294_s0 + $0xa0] sm:$0xff]  ;;  %v116_v39 = vsel %vm78_vm1, %v843_v52, 0.0 }
  0x17   :  { %1345 = vst [vmem:[#allocation33_spill] sm:$0xff] %v801_v25  ;;  %v101_v63 = vadd.f32 %v534_v32, %v99_v36  ;;  %1346 = vst [vmem:[#allocation34_spill] sm:$0xff] %v809_v58  ;;  %v104_v24 = vsel %vm78_vm1, %v27_v4, 0.0  ;;  %v818_v25 = vld [vmem:[%s1294_s0 + $0x78] sm:$0xff]  ;;  %v823_v32 = vld [vmem:[%s1294_s0 + $0x80] sm:$0xff]  ;;  %v106_v58 = vsel %vm78_vm1, %v28_v9, 0.0 }
  0x18   :  { %1347 = vst [vmem:[#allocation35_spill] sm:$0xff] %v818_v25  ;;  %1348 = vst [vmem:[#allocation36_spill] sm:$0xff] %v823_v32  ;;  %v828_v36 = vld [vmem:[%s1294_s0 + $0x88] sm:$0xff]  ;;  %v864_v43 = vld [vmem:[%s1294_s0 + $0xb0] sm:$0xff]  ;;  %v118_v38 = vsel %vm78_vm1, %v848_v51, 0.0 }
  0x19   :  { %v103_v57 = vadd.f32 %v102_v31, %v101_v63  ;;  %1349 = vst [vmem:[#allocation37_spill] sm:$0xff] %v828_v36  ;;  %v212_v63 = vmul.f32 %v438_v1, %v438_v1  ;;  %v213_v31 = vmul.f32 %v443_v2, %v443_v2  ;;  %1350 = vst [vmem:[#allocation38_spill] sm:$0xff] %v838_v56  ;;  %v108_v1 = vsel %vm78_vm1, %v818_v25, 0.0  ;;  %v859_v44 = vld [vmem:[%s1294_s0 + $0xa8] sm:$0xff]  ;;  %v905_v0 = vld [vmem:[%s1294_s0 + $0xd8] sm:$0xff] }
  0x1a   :  { %1351 = vst [vmem:[#allocation39_spill] sm:$0xff] %v843_v52  ;;  %1352 = vst [vmem:[#allocation40_spill] sm:$0xff] %v848_v51  ;;  %v110_v2 = vsel %vm78_vm1, %v823_v32, 0.0  ;;  %v112_v45 = vsel %vm78_vm1, %v828_v36, 0.0  ;;  %v882_v36 = vld [vmem:[%s1294_s0 + $0xc0] sm:$0xff]  ;;  %v887_v32 = vld [vmem:[%s1294_s0 + $0xc8] sm:$0xff]  ;;  %v215_v25 = vmul.f32 %v459_v7, %v459_v7 }
  0x1b   :  { %v105_v50 = vadd.f32 %v104_v24, %v103_v57  ;;  %1353 = vst [vmem:[#allocation41_spill] sm:$0xff] %v859_v44  ;;  %1354 = vst [vmem:[#allocation42_spill] sm:$0xff] %v864_v43  ;;  %v869_v57 = vld [vmem:[%s1294_s0 + $0xb8] sm:$0xff]  ;;  %v114_v24 = vsel %vm78_vm1, %v838_v56, 0.0  ;;  %v892_v52 = vld [vmem:[%s1294_s0 + $0xd0] sm:$0xff]  ;;  %v120_v51 = vsel %vm78_vm1, %v859_v44, 0.0 }
  0x1c   :  { %1355 = vst [vmem:[#allocation43_spill] sm:$0xff] %v869_v57  ;;  %1356 = vst [vmem:[#allocation44_spill] sm:$0xff] %v882_v36  ;;  %v898_v3 = vsel %vm78_vm1, %v864_v43, 0.0  ;;  %v910_v26 = vld [vmem:[%s1294_s0 + $0xe0] sm:$0xff]  ;;  %v922_v7 = vsel %vm78_vm1, %v887_v32, 0.0  ;;  %v926_v43 = vsel %vm78_vm1, %v892_v52, 0.0 }
  0x1d   :  { %1357 = vst [vmem:[#allocation45_spill] sm:$0xff] %v887_v32  ;;  %1358 = vst [vmem:[#allocation46_spill] sm:$0xff] %v892_v52  ;;  %v107_v56 = vadd.f32 %v106_v58, %v105_v50  ;;  %v914_v50 = vsel %vm78_vm1, %v869_v57, 0.0  ;;  %v918_v58 = vsel %vm78_vm1, %v882_v36, 0.0  ;;  %v931_v44 = vld [vmem:[%s1294_s0 + $0xe8] sm:$0xff]  ;;  %v936_v57 = vld [vmem:[%s1294_s0 + $0xf0] sm:$0xff]  ;;  %v216_v52 = vmul.f32 %v466_v10, %v466_v10 }
  0x1e   :  { %1359 = vst [vmem:[#allocation47_spill] sm:$0xff] %v905_v0  ;;  %1360 = vst [vmem:[#allocation48_spill] sm:$0xff] %v910_v26  ;;  %v944_v32 = vsel %vm78_vm1, %v910_v26, 0.0  ;;  %v219_v26 = vmul.f32 %v485_v18, %v485_v18  ;;  %v220_v10 = vmul.f32 %v490_v19, %v490_v19  ;;  %v245_v18 = vmul.f32 %v516_v27, %v516_v27 }
  0x1f   :  { %1361 = vst [vmem:[#allocation49_spill] sm:$0xff] %v918_v58  ;;  %1362 = vst [vmem:[#allocation50_spill] sm:$0xff] %v922_v7  ;;  %v109_v36 = vadd.f32 %v108_v1, %v107_v56  ;;  %v940_v58 = vsel %vm78_vm1, %v905_v0, 0.0  ;;  %v954_v7 = vsel %vm78_vm1, %v936_v57, 0.0  ;;  %v217_v56 = vmul.f32 %v473_v13, %v473_v13 }
  0x20   :  { %1363 = vst [vmem:[#allocation51_spill] sm:$0xff] %v926_v43  ;;  %1364 = vst [vmem:[#allocation52_spill] sm:$0xff] %v931_v44  ;;  %v950_v43 = vsel %vm78_vm1, %v931_v44, 0.0  ;;  %v218_v1 = vmul.f32 %v480_v16, %v480_v16  ;;  %v221_v44 = vmul.f32 %v497_v21, %v497_v21  ;;  %v224_v13 = vmul.f32 %v701_v14, %v701_v14 }
  0x21   :  { %1365 = vst [vmem:[#allocation53_spill] sm:$0xff] %v936_v57  ;;  %1366 = vst [vmem:[#allocation54_spill] sm:$0xff] %v954_v7  ;;  %v111_v0 = vadd.f32 %v110_v2, %v109_v36  ;;  %v222_v57 = vmul.f32 %v502_v22, %v502_v22  ;;  %v223_v7 = vmul.f32 %v507_v23, %v507_v23 }
  0x22   :  { %v972_v16 = vmul.f32 %v27_v4, %v27_v4  ;;  %v974_v2 = vmul.f32 %v28_v9, %v28_v9  ;;  %v246_v19 = vmul.f32 %v521_v28, %v521_v28  ;;  %v247_v21 = vmul.f32 %v526_v29, %v526_v29 }
  0x23   :  { %v113_v36 = vadd.f32 %v112_v45, %v111_v0  ;;  %v248_v22 = vmul.f32 %v539_v33, %v539_v33  ;;  %v249_v23 = vmul.f32 %v544_v34, %v544_v34  ;;  %v250_v45 = vmul.f32 %v549_v35, %v549_v35 }
  0x24   :  { %v251_v4 = vmul.f32 %v566_v40, %v566_v40  ;;  %v252_v27 = vmul.f32 %v571_v41, %v571_v41  ;;  %v253_v28 = vmul.f32 %v576_v42, %v576_v42  ;;  %v254_v29 = vmul.f32 %v593_v46, %v593_v46 }
  0x25   :  { %v115_v0 = vadd.f32 %v114_v24, %v113_v36  ;;  %v255_v33 = vmul.f32 %v598_v47, %v598_v47  ;;  %v276_v34 = vsel %vm78_vm1, %v212_v63, 0.0  ;;  %v277_v35 = vsel %vm78_vm1, %v213_v31, 0.0 }
  0x26   :  { %v256_v40 = vmul.f32 %v603_v48, %v603_v48  ;;  %v278_v14 = vadd.f32 %v277_v35, %v276_v34  ;;  %v279_v41 = vsel %vm78_vm1, %v214_v37, 0.0  ;;  %v257_v42 = vmul.f32 %v620_v53, %v620_v53  ;;  %v1368_v34 = vld [vmem:[#allocation30_spill] sm:$0xff] }
  0x27   :  { %v117_v9 = vadd.f32 %v116_v39, %v115_v0  ;;  %v258_v46 = vmul.f32 %v625_v54, %v625_v54  ;;  %v259_v47 = vmul.f32 %v630_v55, %v630_v55  ;;  %v281_v63 = vsel %vm78_vm1, %v215_v25, 0.0  ;;  %v1367_v0 = vld [vmem:[#allocation26_spill] sm:$0xff] }
  0x28   :  { %v260_v39 = vmul.f32 %v647_v59, %v647_v59  ;;  %v261_v48 = vmul.f32 %v652_v60, %v652_v60  ;;  %v280_v31 = vadd.f32 %v279_v41, %v278_v14  ;;  %v262_v37 = vmul.f32 %v657_v61, %v657_v61  ;;  %v1369_v41 = vld [vmem:[#allocation49_spill] sm:$0xff] }
  0x29   :  { %v119_v24 = vadd.f32 %v118_v38, %v117_v9  ;;  %v263_v53 = vmul.f32 %v674_v5, %v674_v5  ;;  %v264_v54 = vmul.f32 %v679_v6, %v679_v6  ;;  %v283_v55 = vsel %vm78_vm1, %v216_v52, 0.0 }
  0x2a   :  { %v265_v38 = vmul.f32 %v684_v8, %v684_v8  ;;  %v266_v59 = vmul.f32 %v706_v15, %v706_v15  ;;  %v282_v60 = vadd.f32 %v281_v63, %v280_v31  ;;  %v267_v36 = vmul.f32 %v711_v17, %v711_v17 }
  0x2b   :  { %v121_v25 = vadd.f32 %v120_v51, %v119_v24  ;;  %v268_v61 = vmul.f32 %v716_v20, %v716_v20  ;;  %v269_v5 = vmul.f32 %v733_v49, %v733_v49  ;;  %v285_v6 = vsel %vm78_vm1, %v217_v56, 0.0 }
  0x2c   :  { %v270_v52 = vmul.f32 %v738_v30, %v738_v30  ;;  %v271_v8 = vmul.f32 %v743_v62, %v743_v62  ;;  %v284_v15 = vadd.f32 %v283_v55, %v282_v60  ;;  %v272_v17 = vmul.f32 %v760_v12, %v760_v12 }
  0x2d   :  { %v123_v51 = vadd.f32 %v898_v3, %v121_v25  ;;  %v273_v20 = vmul.f32 %v765_v11, %v765_v11  ;;  %v274_v49 = vmul.f32 %v1367_v0, %v1367_v0  ;;  %v287_v56 = vsel %vm78_vm1, %v218_v1, 0.0  ;;  %v1371_v25 = vld [vmem:[#allocation51_spill] sm:$0xff] }
  0x2e   :  { %v275_v30 = vmul.f32 %v1368_v34, %v1368_v34  ;;  %v286_v35 = vadd.f32 %v285_v6, %v284_v15  ;;  %v289_v62 = vsel %vm78_vm1, %v219_v26, 0.0  ;;  %v291_v9 = vsel %vm78_vm1, %v220_v10, 0.0  ;;  %v1373_v34 = vld [vmem:[#allocation54_spill] sm:$0xff] }
  0x2f   :  { %v125_v3 = vadd.f32 %v914_v50, %v123_v51  ;;  %v293_v12 = vsel %vm78_vm1, %v221_v44, 0.0  ;;  %v295_v14 = vsel %vm78_vm1, %v222_v57, 0.0  ;;  %v297_v11 = vsel %vm78_vm1, %v223_v7, 0.0  ;;  %v1370_v7 = vld [vmem:[#allocation50_spill] sm:$0xff] }
  0x30   :  { %v288_v24 = vadd.f32 %v287_v56, %v286_v35  ;;  %v299_v1 = vsel %vm78_vm1, %v224_v13, 0.0  ;;  %v1055_v50 = vsel %vm78_vm1, %v245_v18, 0.0  ;;  %v1058_v31 = vsel %vm78_vm1, %v246_v19, 0.0  ;;  %v1372_v56 = vld [vmem:[#allocation35_spill] sm:$0xff] }
  0x31   :  { %v127_v63 = vadd.f32 %v1369_v41, %v125_v3  ;;  %v1061_v26 = vsel %vm78_vm1, %v247_v21, 0.0  ;;  %v1064_v44 = vsel %vm78_vm1, %v248_v22, 0.0  ;;  %v1067_v57 = vsel %vm78_vm1, %v249_v23, 0.0 }
  0x32   :  { %v290_v55 = vadd.f32 %v289_v62, %v288_v24  ;;  %v1071_v13 = vsel %vm78_vm1, %v250_v45, 0.0  ;;  %v1074_v18 = vsel %vm78_vm1, %v251_v4, 0.0  ;;  %v1077_v19 = vsel %vm78_vm1, %v252_v27, 0.0  ;;  %v1374_v62 = vld [vmem:[#allocation36_spill] sm:$0xff] }
  0x33   :  { %v129_v10 = vadd.f32 %v1370_v7, %v127_v63  ;;  %v1080_v21 = vsel %vm78_vm1, %v253_v28, 0.0  ;;  %v1083_v22 = vsel %vm78_vm1, %v254_v29, 0.0  ;;  %v1086_v23 = vsel %vm78_vm1, %v255_v33, 0.0 }
  0x34   :  { %v292_v6 = vadd.f32 %v291_v9, %v290_v55  ;;  %v1090_v45 = vsel %vm78_vm1, %v256_v40, 0.0  ;;  %v1093_v4 = vsel %vm78_vm1, %v257_v42, 0.0  ;;  %v1096_v27 = vsel %vm78_vm1, %v258_v46, 0.0 }
  0x35   :  { %v131_v60 = vadd.f32 %v1371_v25, %v129_v10  ;;  %v1099_v28 = vsel %vm78_vm1, %v259_v47, 0.0  ;;  %v1102_v29 = vsel %vm78_vm1, %v260_v39, 0.0  ;;  %v1105_v33 = vsel %vm78_vm1, %v261_v48, 0.0  ;;  %v1376_v10 = vld [vmem:[#allocation38_spill] sm:$0xff] }
  0x36   :  { %v294_v15 = vadd.f32 %v293_v12, %v292_v6  ;;  %v1109_v40 = vsel %vm78_vm1, %v262_v37, 0.0  ;;  %v1112_v42 = vsel %vm78_vm1, %v263_v53, 0.0  ;;  %v1115_v46 = vsel %vm78_vm1, %v264_v54, 0.0  ;;  %v1377_v25 = vld [vmem:[#allocation2_spill] sm:$0xff] }
  0x37   :  { %v133_v51 = vadd.f32 %v940_v58, %v131_v60  ;;  %v1118_v47 = vsel %vm78_vm1, %v265_v38, 0.0  ;;  %v1121_v39 = vsel %vm78_vm1, %v266_v59, 0.0  ;;  %v1124_v48 = vsel %vm78_vm1, %v267_v36, 0.0 }
  0x38   :  { %v296_v0 = vadd.f32 %v295_v14, %v294_v15  ;;  %v1128_v37 = vsel %vm78_vm1, %v268_v61, 0.0  ;;  %v1131_v53 = vsel %vm78_vm1, %v269_v5, 0.0  ;;  %v1134_v54 = vsel %vm78_vm1, %v270_v52, 0.0 }
  0x39   :  { %v135_v58 = vadd.f32 %v944_v32, %v133_v51  ;;  %v1137_v38 = vsel %vm78_vm1, %v271_v8, 0.0  ;;  %v1140_v59 = vsel %vm78_vm1, %v272_v17, 0.0  ;;  %v1143_v36 = vsel %vm78_vm1, %v273_v20, 0.0  ;;  %v1148_v32 = vld [vmem:[%s1294_s0 + $0xf8] sm:$0xff]  ;;  %v1378_v51 = vld [vmem:[#allocation39_spill] sm:$0xff] }
  0x3a   :  { %v298_v5 = vadd.f32 %v297_v11, %v296_v0  ;;  %v1152_v52 = vsel %vm78_vm1, %v274_v49, 0.0  ;;  %v1155_v8 = vsel %vm78_vm1, %v275_v30, 0.0  ;;  %v140_v17 = vsel %vm78_vm1, %v1148_v32, 0.0 }
  0x3b   :  { %v137_v61 = vadd.f32 %v950_v43, %v135_v58  ;;  %v227_v20 = vmul.f32 %v1372_v56, %v1372_v56  ;;  %v301_v3 = vsel %vm78_vm1, %v972_v16, 0.0  ;;  %v1166_v43 = vld [vmem:[%s1294_s0 + $0x100] sm:$0xff]  ;;  %v228_v9 = vmul.f32 %v1374_v62, %v1374_v62  ;;  %v1375_v16 = vld [vmem:[#allocation37_spill] sm:$0xff]  ;;  %v1379_v58 = vld [vmem:[#allocation3_spill] sm:$0xff] }
  0x3c   :  { %v300_v35 = vadd.f32 %v299_v1, %v298_v5  ;;  %v142_v30 = vsel %vm78_vm1, %v1166_v43, 0.0  ;;  %v303_v12 = vsel %vm78_vm1, %v974_v2, 0.0  ;;  %v229_v41 = vmul.f32 %v1375_v16, %v1375_v16  ;;  %v1380_v5 = vld [vmem:[#allocation40_spill] sm:$0xff]  ;;  %v1383_v62 = vld [vmem:[#allocation5_spill] sm:$0xff] }
  0x3d   :  { %v139_v49 = vadd.f32 %v1373_v34, %v137_v61  ;;  %v305_v63 = vsel %vm78_vm1, %v227_v20, 0.0  ;;  %v230_v1 = vmul.f32 %v1376_v10, %v1376_v10  ;;  %v307_v55 = vsel %vm78_vm1, %v228_v9, 0.0  ;;  %v1381_v20 = vld [vmem:[#allocation4_spill] sm:$0xff] }
  0x3e   :  { %v302_v11 = vadd.f32 %v301_v3, %v300_v35  ;;  %v231_v2 = vmul.f32 %v1378_v51, %v1378_v51  ;;  %v309_v15 = vsel %vm78_vm1, %v229_v41, 0.0  ;;  %v1385_v41 = vld [vmem:[#allocation6_spill] sm:$0xff] }
  0x3f   :  { %v141_v14 = vadd.f32 %v140_v17, %v139_v49  ;;  %v232_v17 = vmul.f32 %v1380_v5, %v1380_v5  ;;  %v311_v56 = vsel %vm78_vm1, %v230_v1, 0.0  ;;  %v1382_v49 = vld [vmem:[#allocation41_spill] sm:$0xff] }
  0x40   :  { %v304_v7 = vadd.f32 %v303_v12, %v302_v11  ;;  %v233_v35 = vmul.f32 %v1382_v49, %v1382_v49 }
  0x41   :  { %v143_v24 = vadd.f32 %v142_v30, %v141_v14  ;;  %v313_v30 = vsel %vm78_vm1, %v231_v2, 0.0  ;;  %v1384_v14 = vld [vmem:[#allocation42_spill] sm:$0xff]  ;;  %v315_v16 = vsel %vm78_vm1, %v232_v17, 0.0 }
  0x42   :  { %v306_v6 = vadd.f32 %v305_v63, %v304_v7  ;;  %v234_v11 = vmul.f32 %v1384_v14, %v1384_v14  ;;  %v1386_v7 = vld [vmem:[#allocation43_spill] sm:$0xff]  ;;  %v317_v1 = vsel %vm78_vm1, %v233_v35, 0.0 }
  0x43   :  { %v145_v60 = vadd.f32 %v1377_v25, %v143_v24  ;;  %v235_v10 = vmul.f32 %v1386_v7, %v1386_v7 }
  0x44   :  { %v308_v61 = vadd.f32 %v307_v55, %v306_v6  ;;  %v1387_v55 = vld [vmem:[#allocation7_spill] sm:$0xff]  ;;  %v1388_v6 = vld [vmem:[#allocation44_spill] sm:$0xff]  ;;  %v319_v2 = vsel %vm78_vm1, %v234_v11, 0.0 }
  0x45   :  { %v147_v0 = vadd.f32 %v1379_v58, %v145_v60  ;;  %v236_v51 = vmul.f32 %v1388_v6, %v1388_v6  ;;  %v321_v17 = vsel %vm78_vm1, %v235_v10, 0.0 }
  0x46   :  { %v310_v34 = vadd.f32 %v309_v15, %v308_v61  ;;  %v1389_v15 = vld [vmem:[#allocation8_spill] sm:$0xff]  ;;  %v1390_v61 = vld [vmem:[#allocation45_spill] sm:$0xff] }
  0x47   :  { %v149_v3 = vadd.f32 %v1381_v20, %v147_v0  ;;  %v237_v5 = vmul.f32 %v1390_v61, %v1390_v61  ;;  %v323_v35 = vsel %vm78_vm1, %v236_v51, 0.0 }
  0x48   :  { %v312_v12 = vadd.f32 %v311_v56, %v310_v34  ;;  %v1391_v56 = vld [vmem:[#allocation9_spill] sm:$0xff]  ;;  %v1392_v34 = vld [vmem:[#allocation46_spill] sm:$0xff] }
  0x49   :  { %v151_v9 = vadd.f32 %v1383_v62, %v149_v3  ;;  %v238_v49 = vmul.f32 %v1392_v34, %v1392_v34  ;;  %v325_v11 = vsel %vm78_vm1, %v237_v5, 0.0 }
  0x4a   :  { %v314_v24 = vadd.f32 %v313_v30, %v312_v12  ;;  %v1393_v30 = vld [vmem:[#allocation10_spill] sm:$0xff]  ;;  %v1394_v12 = vld [vmem:[#allocation47_spill] sm:$0xff] }
  0x4b   :  { %v153_v63 = vadd.f32 %v1385_v41, %v151_v9  ;;  %v239_v14 = vmul.f32 %v1394_v12, %v1394_v12  ;;  %v327_v10 = vsel %vm78_vm1, %v238_v49, 0.0  ;;  %v1402_v49 = vld [vmem:[#allocation15_spill] sm:$0xff]  ;;  %v1403_v12 = vld [vmem:[#allocation16_spill] sm:$0xff] }
  0x4c   :  { %v316_v60 = vadd.f32 %v315_v16, %v314_v24  ;;  %v1395_v16 = vld [vmem:[#allocation11_spill] sm:$0xff]  ;;  %v1396_v24 = vld [vmem:[#allocation48_spill] sm:$0xff] }
  0x4d   :  { %v155_v25 = vadd.f32 %v1387_v55, %v153_v63  ;;  %v240_v7 = vmul.f32 %v1396_v24, %v1396_v24  ;;  %v329_v51 = vsel %vm78_vm1, %v239_v14, 0.0 }
  0x4e   :  { %v318_v0 = vadd.f32 %v317_v1, %v316_v60  ;;  %v1397_v1 = vld [vmem:[#allocation12_spill] sm:$0xff] }
  0x4f   :  { %v157_v58 = vadd.f32 %v1389_v15, %v155_v25  ;;  %v1398_v60 = vld [vmem:[#allocation52_spill] sm:$0xff]  ;;  %v331_v5 = vsel %vm78_vm1, %v240_v7, 0.0  ;;  %v1405_v7 = vld [vmem:[#allocation18_spill] sm:$0xff] }
  0x50   :  { %v320_v3 = vadd.f32 %v319_v2, %v318_v0  ;;  %v241_v6 = vmul.f32 %v1398_v60, %v1398_v60  ;;  %v1399_v2 = vld [vmem:[#allocation13_spill] sm:$0xff] }
  0x51   :  { %v159_v20 = vadd.f32 %v1391_v56, %v157_v58  ;;  %v1400_v0 = vld [vmem:[#allocation53_spill] sm:$0xff] }
  0x52   :  { %v322_v9 = vadd.f32 %v321_v17, %v320_v3  ;;  %v242_v61 = vmul.f32 %v1400_v0, %v1400_v0  ;;  %v1401_v17 = vld [vmem:[#allocation14_spill] sm:$0xff]  ;;  %v243_v3 = vmul.f32 %v1148_v32, %v1148_v32  ;;  %v333_v34 = vsel %vm78_vm1, %v241_v6, 0.0  ;;  %v1407_v6 = vld [vmem:[#allocation20_spill] sm:$0xff] }
  0x53   :  { %v161_v62 = vadd.f32 %v1393_v30, %v159_v20  ;;  %v1409_v0 = vld [vmem:[#allocation22_spill] sm:$0xff] }
  0x54   :  { %v324_v63 = vadd.f32 %v323_v35, %v322_v9  ;;  %v335_v9 = vsel %vm78_vm1, %v242_v61, 0.0 }
  0x55   :  { %v163_v41 = vadd.f32 %v1395_v16, %v161_v62  ;;  %v244_v62 = vmul.f32 %v1166_v43, %v1166_v43  ;;  %v337_v16 = vsel %vm78_vm1, %v243_v3, 0.0  ;;  %v1411_v3 = vld [vmem:[#allocation24_spill] sm:$0xff] }
  0x56   :  { %v326_v25 = vadd.f32 %v325_v11, %v324_v63 }
  0x57   :  { %v165_v55 = vadd.f32 %v1397_v1, %v163_v41  ;;  %v1404_v41 = vld [vmem:[#allocation17_spill] sm:$0xff]  ;;  %v339_v32 = vsel %vm78_vm1, %v244_v62, 0.0  ;;  %v1413_v62 = vld [vmem:[#allocation27_spill] sm:$0xff] }
  0x58   :  { %v328_v58 = vadd.f32 %v327_v10, %v326_v25 }
  0x59   :  { %v167_v15 = vadd.f32 %v1399_v2, %v165_v55  ;;  %v1406_v55 = vld [vmem:[#allocation19_spill] sm:$0xff]  ;;  %v1408_v2 = vld [vmem:[#allocation21_spill] sm:$0xff] }
  0x5a   :  { %v330_v20 = vadd.f32 %v329_v51, %v328_v58 }
  0x5b   :  { %v169_v56 = vadd.f32 %v1401_v17, %v167_v15  ;;  %v1410_v17 = vld [vmem:[#allocation23_spill] sm:$0xff] }
  0x5c   :  { %v332_v30 = vadd.f32 %v331_v5, %v330_v20 }
  0x5d   :  { %v171_v35 = vadd.f32 %v1402_v49, %v169_v56 }
  0x5e   :  { %v334_v11 = vadd.f32 %v333_v34, %v332_v30 }
  0x5f   :  { %v173_v14 = vadd.f32 %v1403_v12, %v171_v35  ;;  %v1412_v35 = vld [vmem:[#allocation25_spill] sm:$0xff]  ;;  %v1414_v12 = vld [vmem:[#allocation28_spill] sm:$0xff] }
  0x60   :  { %v336_v24 = vadd.f32 %v335_v9, %v334_v11  ;;  %v1415_v11 = vld [vmem:[#allocation29_spill] sm:$0xff] }
  0x61   :  { %v175_v63 = vadd.f32 %v1404_v41, %v173_v14  ;;  %v1416_v41 = vld [vmem:[#allocation31_spill] sm:$0xff] }
  0x62   :  { %v338_v1 = vadd.f32 %v337_v16, %v336_v24  ;;  %v1417_v24 = vld [vmem:[#allocation32_spill] sm:$0xff] }
  0x63   :  { %v177_v10 = vadd.f32 %v1405_v7, %v175_v63  ;;  %v1418_v7 = vld [vmem:[#allocation33_spill] sm:$0xff] }
  0x64   :  { %v340_v60 = vadd.f32 %v339_v32, %v338_v1  ;;  %v1419_v1 = vld [vmem:[#allocation34_spill] sm:$0xff] }
  0x65   :  { %v179_v25 = vadd.f32 %v1406_v55, %v177_v10 }
  0x66   :  { %v342_v51 = vadd.f32 %v1055_v50, %v340_v60 }
  0x67   :  { %v181_v43 = vadd.f32 %v1407_v6, %v179_v25 }
  0x68   :  { %v344_v58 = vadd.f32 %v1058_v31, %v342_v51 }
  0x69   :  { %v183_v15 = vadd.f32 %v1408_v2, %v181_v43 }
  0x6a   :  { %v346_v5 = vadd.f32 %v1061_v26, %v344_v58 }
  0x6b   :  { %v185_v61 = vadd.f32 %v1409_v0, %v183_v15 }
  0x6c   :  { %v348_v20 = vadd.f32 %v1064_v44, %v346_v5 }
  0x6d   :  { %v187_v56 = vadd.f32 %v1410_v17, %v185_v61 }
  0x6e   :  { %v350_v49 = vadd.f32 %v1067_v57, %v348_v20 }
  0x6f   :  { %v189_v34 = vadd.f32 %v1411_v3, %v187_v56 }
  0x70   :  { %v352_v50 = vadd.f32 %v1071_v13, %v350_v49 }
  0x71   :  { %v191_v30 = vadd.f32 %v1412_v35, %v189_v34 }
  0x72   :  { %v354_v31 = vadd.f32 %v1074_v18, %v352_v50 }
  0x73   :  { %v193_v9 = vadd.f32 %v1413_v62, %v191_v30 }
  0x74   :  { %v356_v26 = vadd.f32 %v1077_v19, %v354_v31 }
  0x75   :  { %v195_v14 = vadd.f32 %v1414_v12, %v193_v9 }
  0x76   :  { %v358_v44 = vadd.f32 %v1080_v21, %v356_v26 }
  0x77   :  { %v197_v16 = vadd.f32 %v1415_v11, %v195_v14 }
  0x78   :  { %v360_v57 = vadd.f32 %v1083_v22, %v358_v44 }
  0x79   :  { %v199_v63 = vadd.f32 %v1416_v41, %v197_v16 }
  0x7a   :  { %v362_v13 = vadd.f32 %v1086_v23, %v360_v57 }
  0x7b   :  { %v201_v32 = vadd.f32 %v1417_v24, %v199_v63 }
  0x7c   :  { %v364_v18 = vadd.f32 %v1090_v45, %v362_v13 }
  0x7d   :  { %v203_v10 = vadd.f32 %v1418_v7, %v201_v32 }
  0x7e   :  { %v366_v19 = vadd.f32 %v1093_v4, %v364_v18 }
  0x7f   :  { %v205_v55 = vadd.f32 %v1419_v1, %v203_v10 }
  0x80   :  { %v368_v25 = vadd.f32 %v1096_v27, %v366_v19 }
  0x81   :  { %v206_v2 = vrot.slane %v205_v55, 4 }
  0x82   :  { %v370_v21 = vadd.f32 %v1099_v28, %v368_v25 }
  0x84   :  { %v372_v60 = vadd.f32 %v1102_v29, %v370_v21 }
  0x86   :  { %v374_v22 = vadd.f32 %v1105_v33, %v372_v60 }
  0x88   :  { %v376_v6 = vadd.f32 %v1109_v40, %v374_v22  ;;  %v207_v40 = vadd.f32 %v206_v2, %v205_v55 }
  0x8a   :  { %v378_v23 = vadd.f32 %v1112_v42, %v376_v6  ;;  %v208_v15 = vrot.slane %v207_v40, 2 }
  0x8c   :  { %v380_v43 = vadd.f32 %v1115_v46, %v378_v23 }
  0x8e   :  { %v382_v45 = vadd.f32 %v1118_v47, %v380_v43 }
  0x90   :  { %v384_v51 = vadd.f32 %v1121_v39, %v382_v45 }
  0x92   :  { %v386_v4 = vadd.f32 %v1124_v48, %v384_v51  ;;  %v209_v48 = vadd.f32 %v208_v15, %v207_v40 }
  0x94   :  { %v388_v27 = vadd.f32 %v1128_v37, %v386_v4  ;;  %v210_v0 = vrot.slane %v209_v48, 1 }
  0x96   :  { %v390_v28 = vadd.f32 %v1131_v53, %v388_v27  ;;  %v211_v5 = vadd.f32 %v210_v0, %v209_v48 }
  0x98   :  { %v392_v29 = vadd.f32 %v1134_v54, %v390_v28 }
  0x9a   :  { %v394_v33 = vadd.f32 %v1137_v38, %v392_v29 }
  0x9c   :  { %v396_v42 = vadd.f32 %v1140_v59, %v394_v33  ;;  %v411_v59 = vld [vmem:[%s1295_s1] sm:$0x3] }
  0x9e   :  { %v398_v46 = vadd.f32 %v1143_v36, %v396_v42 }
  0xa0   :  { %v400_v47 = vadd.f32 %v1152_v52, %v398_v46 }
  0xa2   :  { %v402_v39 = vadd.f32 %v1155_v8, %v400_v47 }
  0xa4   :  { %v403_v58 = vrot.slane %v402_v39, 4 }
  0xa6   :  { %v404_v37 = vadd.f32 %v403_v58, %v402_v39 }
  0xa8   :  { %v405_v53 = vrot.slane %v404_v37, 2 }
  0xaa   :  { %v406_v61 = vadd.f32 %v405_v53, %v404_v37 }
  0xac   :  { %v407_v54 = vrot.slane %v406_v61, 1 }
  0xae   :  { %v408_v38 = vadd.f32 %v407_v54, %v406_v61 }
  0xb0   :  { %v410_v36 = vsel %vm409_vm2, %v211_v5, %v408_v38 }
  0xb1   :  { %v412_v17 = vadd.f32 %v411_v59, %v410_v36 }
  0xb3   :  { %414 = vst.msk [vmem:[%s1295_s1] sm:$0x3] %vm12_vm0, %v412_v17 }

// kernel: _lambda_.46
= control target key start
LH: loop header
LB: loop body
LE: loop exit
PB: predicated region body
PF: predicated region fallthrough
CT: control target
= control target key end

     0   :  { %vm220_vm0 = vcmask 64512   ;;  %s897_s0 = inlined_call_operand.vmem [shape: f32[512,8], index: 0, kind: input, shape index: {}]   ;;  %s898_s1 = inlined_call_operand.vmem [shape: f32[1,8], index: 1, kind: input, shape index: {}]   ;;  %s899_s2 = inlined_call_operand.vmem [shape: f32[1,8], index: 2, kind: input, shape index: {}]   ;;  %s900_s3 = inlined_call_operand.vmem [shape: f32[512,8], index: 3, kind: output, shape index: {}]  }
   0x1   :  { %v14_v0 = vld [vmem:[%s897_s0] sm:$0xff]  ;;  %v15_v4 = vld [vmem:[%s897_s0 + $0x8] sm:$0xff]  ;;  %v16_v5 = vld [vmem:[%s897_s0 + $0x10] sm:$0xff] }
   0x2   :  { %v317_v1 = vld [vmem:[%s898_s1] ss:$0 sm:$0xff]  ;;  %v17_v6 = vld [vmem:[%s897_s0 + $0x18] sm:$0xff]  ;;  %v19_v11 = vld [vmem:[%s897_s0 + $0x28] sm:$0xff] }
   0x3   :  { %v322_v2 = vld [vmem:[%s899_s2] ss:$0 sm:$0xff]  ;;  %v85_v3 = vmul.f32 %v317_v1, %v14_v0  ;;  %v86_v7 = vmul.f32 %v317_v1, %v15_v4  ;;  %v87_v8 = vmul.f32 %v317_v1, %v16_v5  ;;  %v88_v9 = vmul.f32 %v317_v1, %v17_v6  ;;  %v20_v12 = vld [vmem:[%s897_s0 + $0x30] sm:$0xff]  ;;  %v21_v17 = vld [vmem:[%s897_s0 + $0x38] sm:$0xff] }
   0x4   :  { %v18_v10 = vld [vmem:[%s897_s0 + $0x20] sm:$0xff]  ;;  %v90_v15 = vmul.f32 %v317_v1, %v19_v11  ;;  %v91_v16 = vmul.f32 %v317_v1, %v20_v12  ;;  %v23_v19 = vld [vmem:[%s897_s0 + $0x48] sm:$0xff]  ;;  %v92_v23 = vmul.f32 %v317_v1, %v21_v17  ;;  %v24_v24 = vld [vmem:[%s897_s0 + $0x50] sm:$0xff] }
   0x5   :  { %v156_v13 = vadd.f32 %v322_v2, %v85_v3  ;;  %v89_v14 = vmul.f32 %v317_v1, %v18_v10  ;;  %v22_v18 = vld [vmem:[%s897_s0 + $0x40] sm:$0xff]  ;;  %v157_v20 = vadd.f32 %v322_v2, %v86_v7  ;;  %v158_v21 = vadd.f32 %v322_v2, %v87_v8  ;;  %v25_v25 = vld [vmem:[%s897_s0 + $0x58] sm:$0xff]  ;;  %v27_v31 = vld [vmem:[%s897_s0 + $0x68] sm:$0xff] }
   0x6   :  { %v159_v22 = vadd.f32 %v322_v2, %v88_v9  ;;  %v26_v26 = vld [vmem:[%s897_s0 + $0x60] sm:$0xff]  ;;  %v161_v28 = vadd.f32 %v322_v2, %v90_v15  ;;  %v162_v29 = vadd.f32 %v322_v2, %v91_v16  ;;  %v93_v30 = vmul.f32 %v317_v1, %v22_v18  ;;  %v28_v32 = vld [vmem:[%s897_s0 + $0x70] sm:$0xff]  ;;  %v29_v33 = vld [vmem:[%s897_s0 + $0x78] sm:$0xff] }
   0x7   :  { %221 = vst.msk [vmem:[%s900_s3] sm:$0xff] %vm220_vm0, %v156_v13  ;;  %v160_v27 = vadd.f32 %v322_v2, %v89_v14  ;;  %222 = vst.msk [vmem:[%s900_s3 + $0x8] sm:$0xff] %vm220_vm0, %v157_v20  ;;  %v163_v34 = vadd.f32 %v322_v2, %v92_v23  ;;  %v94_v35 = vmul.f32 %v317_v1, %v23_v19  ;;  %v30_v38 = vld [vmem:[%s897_s0 + $0x80] sm:$0xff]  ;;  %v31_v43 = vld [vmem:[%s897_s0 + $0x88] sm:$0xff] }
   0x8   :  { %223 = vst.msk [vmem:[%s900_s3 + $0x10] sm:$0xff] %vm220_vm0, %v158_v21  ;;  %224 = vst.msk [vmem:[%s900_s3 + $0x18] sm:$0xff] %vm220_vm0, %v159_v22  ;;  %v95_v36 = vmul.f32 %v317_v1, %v24_v24  ;;  %v96_v37 = vmul.f32 %v317_v1, %v25_v25  ;;  %v164_v39 = vadd.f32 %v322_v2, %v93_v30  ;;  %v32_v44 = vld [vmem:[%s897_s0 + $0x90] sm:$0xff]  ;;  %v33_v45 = vld [vmem:[%s897_s0 + $0x98] sm:$0xff] }
   0x9   :  { %225 = vst.msk [vmem:[%s900_s3 + $0x20] sm:$0xff] %vm220_vm0, %v160_v27  ;;  %226 = vst.msk [vmem:[%s900_s3 + $0x28] sm:$0xff] %vm220_vm0, %v161_v28  ;;  %v97_v40 = vmul.f32 %v317_v1, %v26_v26  ;;  %v98_v41 = vmul.f32 %v317_v1, %v27_v31  ;;  %v99_v42 = vmul.f32 %v317_v1, %v28_v32  ;;  %v34_v50 = vld [vmem:[%s897_s0 + $0xa0] sm:$0xff]  ;;  %v35_v51 = vld [vmem:[%s897_s0 + $0xa8] sm:$0xff] }
   0xa   :  { %227 = vst.msk [vmem:[%s900_s3 + $0x30] sm:$0xff] %vm220_vm0, %v162_v29  ;;  %228 = vst.msk [vmem:[%s900_s3 + $0x38] sm:$0xff] %vm220_vm0, %v163_v34  ;;  %v165_v46 = vadd.f32 %v322_v2, %v94_v35  ;;  %v166_v47 = vadd.f32 %v322_v2, %v95_v36  ;;  %v167_v48 = vadd.f32 %v322_v2, %v96_v37  ;;  %v36_v52 = vld [vmem:[%s897_s0 + $0xb0] sm:$0xff]  ;;  %v37_v57 = vld [vmem:[%s897_s0 + $0xb8] sm:$0xff] }
   0xb   :  { %v100_v49 = vmul.f32 %v317_v1, %v29_v33  ;;  %229 = vst.msk [vmem:[%s900_s3 + $0x40] sm:$0xff] %vm220_vm0, %v164_v39  ;;  %v168_v53 = vadd.f32 %v322_v2, %v97_v40  ;;  %v169_v54 = vadd.f32 %v322_v2, %v98_v41  ;;  %v170_v55 = vadd.f32 %v322_v2, %v99_v42  ;;  %v38_v62 = vld [vmem:[%s897_s0 + $0xc0] sm:$0xff]  ;;  %v39_v5 = vld [vmem:[%s897_s0 + $0xc8] sm:$0xff]  ;;  %v40_v6 = vld [vmem:[%s897_s0 + $0xd0] sm:$0xff] }
   0xc   :  { %v101_v56 = vmul.f32 %v317_v1, %v30_v38  ;;  %230 = vst.msk [vmem:[%s900_s3 + $0x48] sm:$0xff] %vm220_vm0, %v165_v46  ;;  %231 = vst.msk [vmem:[%s900_s3 + $0x50] sm:$0xff] %vm220_vm0, %v166_v47  ;;  %v102_v59 = vmul.f32 %v317_v1, %v31_v43  ;;  %v103_v60 = vmul.f32 %v317_v1, %v32_v44  ;;  %v41_v7 = vld [vmem:[%s897_s0 + $0xd8] sm:$0xff]  ;;  %v42_v12 = vld [vmem:[%s897_s0 + $0xe0] sm:$0xff] }
   0xd   :  { %232 = vst.msk [vmem:[%s900_s3 + $0x58] sm:$0xff] %vm220_vm0, %v167_v48  ;;  %v171_v58 = vadd.f32 %v322_v2, %v100_v49  ;;  %v104_v61 = vmul.f32 %v317_v1, %v33_v45  ;;  %233 = vst.msk [vmem:[%s900_s3 + $0x60] sm:$0xff] %vm220_vm0, %v168_v53  ;;  %v105_v0 = vmul.f32 %v317_v1, %v34_v50  ;;  %v43_v13 = vld [vmem:[%s897_s0 + $0xe8] sm:$0xff]  ;;  %v44_v14 = vld [vmem:[%s897_s0 + $0xf0] sm:$0xff] }
   0xe   :  { %234 = vst.msk [vmem:[%s900_s3 + $0x68] sm:$0xff] %vm220_vm0, %v169_v54  ;;  %235 = vst.msk [vmem:[%s900_s3 + $0x70] sm:$0xff] %vm220_vm0, %v170_v55  ;;  %v172_v63 = vadd.f32 %v322_v2, %v101_v56  ;;  %v106_v3 = vmul.f32 %v317_v1, %v35_v51  ;;  %v107_v4 = vmul.f32 %v317_v1, %v36_v52  ;;  %v45_v19 = vld [vmem:[%s897_s0 + $0xf8] sm:$0xff]  ;;  %v46_v24 = vld [vmem:[%s897_s0 + $0x100] sm:$0xff] }
   0xf   :  { %236 = vst.msk [vmem:[%s900_s3 + $0x78] sm:$0xff] %vm220_vm0, %v171_v58  ;;  %v173_v8 = vadd.f32 %v322_v2, %v102_v59  ;;  %v174_v9 = vadd.f32 %v322_v2, %v103_v60  ;;  %v175_v10 = vadd.f32 %v322_v2, %v104_v61  ;;  %v108_v11 = vmul.f32 %v317_v1, %v37_v57  ;;  %v47_v29 = vld [vmem:[%s897_s0 + $0x108] sm:$0xff]  ;;  %v48_v30 = vld [vmem:[%s897_s0 + $0x110] sm:$0xff]  ;;  %v49_v31 = vld [vmem:[%s897_s0 + $0x118] sm:$0xff] }
  0x10   :  { %237 = vst.msk [vmem:[%s900_s3 + $0x80] sm:$0xff] %vm220_vm0, %v172_v63  ;;  %v176_v15 = vadd.f32 %v322_v2, %v105_v0  ;;  %v177_v16 = vadd.f32 %v322_v2, %v106_v3  ;;  %v178_v17 = vadd.f32 %v322_v2, %v107_v4  ;;  %v109_v18 = vmul.f32 %v317_v1, %v38_v62  ;;  %v50_v36 = vld [vmem:[%s897_s0 + $0x120] sm:$0xff]  ;;  %v51_v37 = vld [vmem:[%s897_s0 + $0x128] sm:$0xff]  ;;  %v52_v38 = vld [vmem:[%s897_s0 + $0x130] sm:$0xff] }
  0x11   :  { %238 = vst.msk [vmem:[%s900_s3 + $0x88] sm:$0xff] %vm220_vm0, %v173_v8  ;;  %239 = vst.msk [vmem:[%s900_s3 + $0x90] sm:$0xff] %vm220_vm0, %v174_v9  ;;  %v179_v20 = vadd.f32 %v322_v2, %v108_v11  ;;  %v110_v21 = vmul.f32 %v317_v1, %v39_v5  ;;  %v111_v22 = vmul.f32 %v317_v1, %v40_v6  ;;  %v53_v43 = vld [vmem:[%s897_s0 + $0x138] sm:$0xff]  ;;  %v54_v48 = vld [vmem:[%s897_s0 + $0x140] sm:$0xff] }
  0x12   :  { %240 = vst.msk [vmem:[%s900_s3 + $0x98] sm:$0xff] %vm220_vm0, %v175_v10  ;;  %v112_v23 = vmul.f32 %v317_v1, %v41_v7  ;;  %241 = vst.msk [vmem:[%s900_s3 + $0xa0] sm:$0xff] %vm220_vm0, %v176_v15  ;;  %v180_v25 = vadd.f32 %v322_v2, %v109_v18  ;;  %v113_v26 = vmul.f32 %v317_v1, %v42_v12  ;;  %v55_v53 = vld [vmem:[%s897_s0 + $0x148] sm:$0xff]  ;;  %v56_v54 = vld [vmem:[%s897_s0 + $0x150] sm:$0xff] }
  0x13   :  { %242 = vst.msk [vmem:[%s900_s3 + $0xa8] sm:$0xff] %vm220_vm0, %v177_v16  ;;  %243 = vst.msk [vmem:[%s900_s3 + $0xb0] sm:$0xff] %vm220_vm0, %v178_v17  ;;  %v114_v27 = vmul.f32 %v317_v1, %v43_v13  ;;  %v115_v28 = vmul.f32 %v317_v1, %v44_v14  ;;  %v181_v32 = vadd.f32 %v322_v2, %v110_v21  ;;  %v57_v55 = vld [vmem:[%s897_s0 + $0x158] sm:$0xff]  ;;  %v58_v60 = vld [vmem:[%s897_s0 + $0x160] sm:$0xff] }
  0x14   :  { %244 = vst.msk [vmem:[%s900_s3 + $0xb8] sm:$0xff] %vm220_vm0, %v179_v20  ;;  %v182_v33 = vadd.f32 %v322_v2, %v111_v22  ;;  %v183_v34 = vadd.f32 %v322_v2, %v112_v23  ;;  %v116_v35 = vmul.f32 %v317_v1, %v45_v19  ;;  %245 = vst.msk [vmem:[%s900_s3 + $0xc0] sm:$0xff] %vm220_vm0, %v180_v25  ;;  %v59_v61 = vld [vmem:[%s897_s0 + $0x168] sm:$0xff]  ;;  %v60_v62 = vld [vmem:[%s897_s0 + $0x170] sm:$0xff] }
  0x15   :  { %v184_v39 = vadd.f32 %v322_v2, %v113_v26  ;;  %v185_v40 = vadd.f32 %v322_v2, %v114_v27  ;;  %v186_v41 = vadd.f32 %v322_v2, %v115_v28  ;;  %v117_v42 = vmul.f32 %v317_v1, %v46_v24  ;;  %246 = vst.msk [vmem:[%s900_s3 + $0xc8] sm:$0xff] %vm220_vm0, %v181_v32  ;;  %v61_v5 = vld [vmem:[%s897_s0 + $0x178] sm:$0xff]  ;;  %v62_v10 = vld [vmem:[%s897_s0 + $0x180] sm:$0xff]  ;;  %v63_v15 = vld [vmem:[%s897_s0 + $0x188] sm:$0xff] }
  0x16   :  { %247 = vst.msk [vmem:[%s900_s3 + $0xd0] sm:$0xff] %vm220_vm0, %v182_v33  ;;  %248 = vst.msk [vmem:[%s900_s3 + $0xd8] sm:$0xff] %vm220_vm0, %v183_v34  ;;  %v187_v44 = vadd.f32 %v322_v2, %v116_v35  ;;  %v118_v45 = vmul.f32 %v317_v1, %v47_v29  ;;  %v119_v46 = vmul.f32 %v317_v1, %v48_v30  ;;  %v64_v16 = vld [vmem:[%s897_s0 + $0x190] sm:$0xff]  ;;  %v65_v17 = vld [vmem:[%s897_s0 + $0x198] sm:$0xff] }
  0x17   :  { %v120_v47 = vmul.f32 %v317_v1, %v49_v31  ;;  %249 = vst.msk [vmem:[%s900_s3 + $0xe0] sm:$0xff] %vm220_vm0, %v184_v39  ;;  %250 = vst.msk [vmem:[%s900_s3 + $0xe8] sm:$0xff] %vm220_vm0, %v185_v40  ;;  %v188_v49 = vadd.f32 %v322_v2, %v117_v42  ;;  %v121_v50 = vmul.f32 %v317_v1, %v50_v36  ;;  %v66_v22 = vld [vmem:[%s897_s0 + $0x1a0] sm:$0xff]  ;;  %v67_v23 = vld [vmem:[%s897_s0 + $0x1a8] sm:$0xff] }
  0x18   :  { %251 = vst.msk [vmem:[%s900_s3 + $0xf0] sm:$0xff] %vm220_vm0, %v186_v41  ;;  %v122_v51 = vmul.f32 %v317_v1, %v51_v37  ;;  %v123_v52 = vmul.f32 %v317_v1, %v52_v38  ;;  %252 = vst.msk [vmem:[%s900_s3 + $0xf8] sm:$0xff] %vm220_vm0, %v187_v44  ;;  %v189_v56 = vadd.f32 %v322_v2, %v118_v45  ;;  %v68_v24 = vld [vmem:[%s897_s0 + $0x1b0] sm:$0xff]  ;;  %v69_v29 = vld [vmem:[%s897_s0 + $0x1b8] sm:$0xff] }
  0x19   :  { %v190_v57 = vadd.f32 %v322_v2, %v119_v46  ;;  %v191_v58 = vadd.f32 %v322_v2, %v120_v47  ;;  %v124_v59 = vmul.f32 %v317_v1, %v53_v43  ;;  %253 = vst.msk [vmem:[%s900_s3 + $0x100] sm:$0xff] %vm220_vm0, %v188_v49  ;;  %v192_v63 = vadd.f32 %v322_v2, %v121_v50  ;;  %v70_v34 = vld [vmem:[%s897_s0 + $0x1c0] sm:$0xff]  ;;  %v71_v39 = vld [vmem:[%s897_s0 + $0x1c8] sm:$0xff]  ;;  %v72_v40 = vld [vmem:[%s897_s0 + $0x1d0] sm:$0xff] }
  0x1a   :  { %v193_v0 = vadd.f32 %v322_v2, %v122_v51  ;;  %v194_v3 = vadd.f32 %v322_v2, %v123_v52  ;;  %v125_v4 = vmul.f32 %v317_v1, %v54_v48  ;;  %254 = vst.msk [vmem:[%s900_s3 + $0x108] sm:$0xff] %vm220_vm0, %v189_v56  ;;  %v126_v7 = vmul.f32 %v317_v1, %v55_v53  ;;  %v73_v41 = vld [vmem:[%s897_s0 + $0x1d8] sm:$0xff]  ;;  %v74_v46 = vld [vmem:[%s897_s0 + $0x1e0] sm:$0xff]  ;;  %v75_v47 = vld [vmem:[%s897_s0 + $0x1e8] sm:$0xff] }
  0x1b   :  { %255 = vst.msk [vmem:[%s900_s3 + $0x110] sm:$0xff] %vm220_vm0, %v190_v57  ;;  %256 = vst.msk [vmem:[%s900_s3 + $0x118] sm:$0xff] %vm220_vm0, %v191_v58  ;;  %v195_v6 = vadd.f32 %v322_v2, %v124_v59  ;;  %v127_v8 = vmul.f32 %v317_v1, %v56_v54  ;;  %v128_v9 = vmul.f32 %v317_v1, %v57_v55  ;;  %v76_v48 = vld [vmem:[%s897_s0 + $0x1f0] sm:$0xff]  ;;  %v77_v53 = vld [vmem:[%s897_s0 + $0x1f8] sm:$0xff] }
  0x1c   :  { %257 = vst.msk [vmem:[%s900_s3 + $0x120] sm:$0xff] %vm220_vm0, %v192_v63  ;;  %258 = vst.msk [vmem:[%s900_s3 + $0x128] sm:$0xff] %vm220_vm0, %v193_v0  ;;  %v196_v11 = vadd.f32 %v322_v2, %v125_v4  ;;  %v129_v12 = vmul.f32 %v317_v1, %v58_v60  ;;  %v130_v13 = vmul.f32 %v317_v1, %v59_v61 }
  0x1d   :  { %259 = vst.msk [vmem:[%s900_s3 + $0x130] sm:$0xff] %vm220_vm0, %v194_v3  ;;  %v131_v14 = vmul.f32 %v317_v1, %v60_v62  ;;  %260 = vst.msk [vmem:[%s900_s3 + $0x138] sm:$0xff] %vm220_vm0, %v195_v6  ;;  %v197_v18 = vadd.f32 %v322_v2, %v126_v7  ;;  %v198_v19 = vadd.f32 %v322_v2, %v127_v8 }
  0x1e   :  { %v199_v20 = vadd.f32 %v322_v2, %v128_v9  ;;  %v132_v21 = vmul.f32 %v317_v1, %v61_v5  ;;  %261 = vst.msk [vmem:[%s900_s3 + $0x140] sm:$0xff] %vm220_vm0, %v196_v11  ;;  %v200_v25 = vadd.f32 %v322_v2, %v129_v12  ;;  %v201_v26 = vadd.f32 %v322_v2, %v130_v13 }
  0x1f   :  { %v202_v27 = vadd.f32 %v322_v2, %v131_v14  ;;  %v133_v28 = vmul.f32 %v317_v1, %v62_v10  ;;  %262 = vst.msk [vmem:[%s900_s3 + $0x148] sm:$0xff] %vm220_vm0, %v197_v18  ;;  %263 = vst.msk [vmem:[%s900_s3 + $0x150] sm:$0xff] %vm220_vm0, %v198_v19  ;;  %v134_v31 = vmul.f32 %v317_v1, %v63_v15 }
  0x20   :  { %264 = vst.msk [vmem:[%s900_s3 + $0x158] sm:$0xff] %vm220_vm0, %v199_v20  ;;  %v203_v30 = vadd.f32 %v322_v2, %v132_v21  ;;  %v135_v32 = vmul.f32 %v317_v1, %v64_v16  ;;  %v136_v33 = vmul.f32 %v317_v1, %v65_v17  ;;  %265 = vst.msk [vmem:[%s900_s3 + $0x160] sm:$0xff] %vm220_vm0, %v200_v25 }
  0x21   :  { %266 = vst.msk [vmem:[%s900_s3 + $0x168] sm:$0xff] %vm220_vm0, %v201_v26  ;;  %267 = vst.msk [vmem:[%s900_s3 + $0x170] sm:$0xff] %vm220_vm0, %v202_v27  ;;  %v204_v35 = vadd.f32 %v322_v2, %v133_v28  ;;  %v137_v36 = vmul.f32 %v317_v1, %v66_v22  ;;  %v138_v37 = vmul.f32 %v317_v1, %v67_v23 }
  0x22   :  { %v139_v38 = vmul.f32 %v317_v1, %v68_v24  ;;  %268 = vst.msk [vmem:[%s900_s3 + $0x178] sm:$0xff] %vm220_vm0, %v203_v30  ;;  %v205_v42 = vadd.f32 %v322_v2, %v134_v31  ;;  %v206_v43 = vadd.f32 %v322_v2, %v135_v32  ;;  %v207_v44 = vadd.f32 %v322_v2, %v136_v33 }
  0x23   :  { %v140_v45 = vmul.f32 %v317_v1, %v69_v29  ;;  %269 = vst.msk [vmem:[%s900_s3 + $0x180] sm:$0xff] %vm220_vm0, %v204_v35  ;;  %v208_v49 = vadd.f32 %v322_v2, %v137_v36  ;;  %v209_v50 = vadd.f32 %v322_v2, %v138_v37  ;;  %v141_v52 = vmul.f32 %v317_v1, %v70_v34 }
  0x24   :  { %v210_v51 = vadd.f32 %v322_v2, %v139_v38  ;;  %270 = vst.msk [vmem:[%s900_s3 + $0x188] sm:$0xff] %vm220_vm0, %v205_v42  ;;  %271 = vst.msk [vmem:[%s900_s3 + $0x190] sm:$0xff] %vm220_vm0, %v206_v43  ;;  %v142_v55 = vmul.f32 %v317_v1, %v71_v39  ;;  %v143_v56 = vmul.f32 %v317_v1, %v72_v40 }
  0x25   :  { %272 = vst.msk [vmem:[%s900_s3 + $0x198] sm:$0xff] %vm220_vm0, %v207_v44  ;;  %v211_v54 = vadd.f32 %v322_v2, %v140_v45  ;;  %v144_v57 = vmul.f32 %v317_v1, %v73_v41  ;;  %273 = vst.msk [vmem:[%s900_s3 + $0x1a0] sm:$0xff] %vm220_vm0, %v208_v49  ;;  %v212_v58 = vadd.f32 %v322_v2, %v141_v52 }
  0x26   :  { %274 = vst.msk [vmem:[%s900_s3 + $0x1a8] sm:$0xff] %vm220_vm0, %v209_v50  ;;  %275 = vst.msk [vmem:[%s900_s3 + $0x1b0] sm:$0xff] %vm220_vm0, %v210_v51  ;;  %v145_v59 = vmul.f32 %v317_v1, %v74_v46  ;;  %v146_v60 = vmul.f32 %v317_v1, %v75_v47  ;;  %v147_v61 = vmul.f32 %v317_v1, %v76_v48 }
  0x27   :  { %276 = vst.msk [vmem:[%s900_s3 + $0x1b8] sm:$0xff] %vm220_vm0, %v211_v54  ;;  %v213_v62 = vadd.f32 %v322_v2, %v142_v55  ;;  %v214_v63 = vadd.f32 %v322_v2, %v143_v56  ;;  %v215_v0 = vadd.f32 %v322_v2, %v144_v57  ;;  %v148_v3 = vmul.f32 %v317_v1, %v77_v53 }
  0x28   :  { %277 = vst.msk [vmem:[%s900_s3 + $0x1c0] sm:$0xff] %vm220_vm0, %v212_v58  ;;  %v216_v4 = vadd.f32 %v322_v2, %v145_v59  ;;  %v217_v5 = vadd.f32 %v322_v2, %v146_v60  ;;  %v218_v6 = vadd.f32 %v322_v2, %v147_v61 }
  0x29   :  { %278 = vst.msk [vmem:[%s900_s3 + $0x1c8] sm:$0xff] %vm220_vm0, %v213_v62  ;;  %279 = vst.msk [vmem:[%s900_s3 + $0x1d0] sm:$0xff] %vm220_vm0, %v214_v63  ;;  %v219_v1 = vadd.f32 %v322_v2, %v148_v3 }
  0x2a   :  { %280 = vst.msk [vmem:[%s900_s3 + $0x1d8] sm:$0xff] %vm220_vm0, %v215_v0  ;;  %281 = vst.msk [vmem:[%s900_s3 + $0x1e0] sm:$0xff] %vm220_vm0, %v216_v4 }
  0x2b   :  { %282 = vst.msk [vmem:[%s900_s3 + $0x1e8] sm:$0xff] %vm220_vm0, %v217_v5  ;;  %283 = vst.msk [vmem:[%s900_s3 + $0x1f0] sm:$0xff] %vm220_vm0, %v218_v6 }
  0x2c   :  { %284 = vst.msk [vmem:[%s900_s3 + $0x1f8] sm:$0xff] %vm220_vm0, %v219_v1 }

// kernel: _lambda_.47
= control target key start
LH: loop header
LB: loop body
LE: loop exit
PB: predicated region body
PF: predicated region fallthrough
CT: control target
= control target key end

     0   :  { %s1940_s12 = smov 0   ;;  %s1942_s13 = smov 0   ;;  %s2160_s0 = inlined_call_operand.vmem [shape: bf16[4,512,128], index: 0, kind: input, shape index: {}]   ;;  %s2161_s1 = inlined_call_operand.vmem [shape: bf16[4,128,128], index: 1, kind: input, shape index: {}]   ;;  %s2162_s2 = inlined_call_operand.vmem [shape: f32[1,128], index: 2, kind: input, shape index: {}]   ;;  %s2163_s3 = inlined_call_operand.vmem [shape: f32[4,512,128], index: 3, kind: output, shape index: {}]  }
   0x1   :  { %s1944_s14 = smov 0  }
   0x2 LB: > { %s32_s15 = sadd.s32 1, %s1914_s13  ;;  %p1515_p0 = scmp.ge.s32.totalorder %s1918_s14, 1  ;;  %s1918_s14 = sphi %s1944_s14, %s13_s14   ;;  %s1914_s13 = sphi %s1942_s13, %s2165_s13   ;;  %s1910_s12 = sphi %s1940_s12, %s2164_s12  }
   0x3   : > { %p34_p1 = scmp.ge.s32.totalorder %s32_s15, 4  ;;  %p187_p2 = scmp.lt.s32.totalorder %s1918_s14, 5 }
   0x5   : > { %s2167_s15 = smov (%p34_p1, %s32_s15), 0  ;;  %p188_p3 = pnand %p1515_p0, %p187_p2 }
   0x6   : > { %p232_p4 = scmp.lt.s32.totalorder (!%p188_p3), %s1910_s12, 3  ;;  %v2015_v40 = vld [vmem:[%s2162_s2] ss:$0 sm:$0xff] (!%p188_p3) }
   0x7   : > { %191 = sbr.rel (%p188_p3) target bundleno = 342 (0x156), region = 32 }
   0xe   : > { %s2169_s12 = smov (!%p232_p4, %s1910_s12), 3 }
   0xf   : > { %s1566_s16 = sshll.u32 %s2169_s12, 6  ;;  %s1565_s20 = sshll.u32 %s2169_s12, 8 }
  0x10   : > { %s1964_s19 = scalar_lea.vmem %s2161_s1, %s1566_s16  ;;  %s1973_s23 = scalar_lea.vmem %s2160_s0, %s1565_s20 }
  0x11   : > { %v1728_v0 = vld [vmem:[%s1964_s19] sm:$0xff]   ;;  %v1729_v1 = vld [vmem:[%s1964_s19 + $0x8] sm:$0xff]   ;;  %v1730_v2 = vld [vmem:[%s1964_s19 + $0x10] sm:$0xff]   ;;  %s1567_s26 = sshll.u32 %s2169_s12, 9 }
  0x12   : > { %1608 = vmatprep.subr.bf16.mxu0 %v1728_v0  ;;  %1688 = vmatprep.subr.bf16.mxu1 %v1728_v0  ;;  %v1731_v3 = vld [vmem:[%s1964_s19 + $0x18] sm:$0xff]   ;;  %v1736_v4 = vld [vmem:[%s1973_s23] sm:$0xff]   ;;  %v1733_v7 = vld [vmem:[%s1964_s19 + $0x28] sm:$0xff]   ;;  %s2033_s29 = scalar_lea.vmem %s2163_s3, %s1567_s26 }
  0x13   : > { %1609 = vmatpush3.bf16.msra.mxu0 %v1728_v0  ;;  %1696 = vmatpush3.bf16.msra.mxu1 %v1728_v0  ;;  %v1737_v5 = vld [vmem:[%s1973_s23 + $0x80] sm:$0xff]   ;;  %v1734_v8 = vld [vmem:[%s1964_s19 + $0x30] sm:$0xff]   ;;  %v1735_v9 = vld [vmem:[%s1964_s19 + $0x38] sm:$0xff]  }
  0x14   : > { %1610 = vmatprep.subr.bf16.mxu0 %v1729_v1  ;;  %1689 = vmatprep.subr.bf16.mxu1 %v1729_v1  ;;  %v1732_v6 = vld [vmem:[%s1964_s19 + $0x20] sm:$0xff]   ;;  %v1738_v10 = vld [vmem:[%s1973_s23 + $0x8] sm:$0xff]   ;;  %v1740_v12 = vld [vmem:[%s1973_s23 + $0x10] sm:$0xff]  }
  0x15   : > { %1624 = vmatprep.mubr.bf16.mxu0 %v1736_v4  ;;  %1656 = vmatprep.mubr.bf16.mxu1 %v1737_v5  ;;  %v1739_v11 = vld [vmem:[%s1973_s23 + $0x88] sm:$0xff]   ;;  %v1741_v13 = vld [vmem:[%s1973_s23 + $0x90] sm:$0xff]   ;;  %v1742_v14 = vld [vmem:[%s1973_s23 + $0x18] sm:$0xff]  }
  0x16   : > { %v1743_v15 = vld [vmem:[%s1973_s23 + $0x98] sm:$0xff]   ;;  %v1744_v16 = vld [vmem:[%s1973_s23 + $0x20] sm:$0xff]   ;;  %v1746_v18 = vld [vmem:[%s1973_s23 + $0x28] sm:$0xff]  }
  0x17   : > { %1611 = vmatpush3.bf16.msra.mxu0 %v1729_v1  ;;  %1697 = vmatpush3.bf16.msra.mxu1 %v1729_v1  ;;  %v1745_v17 = vld [vmem:[%s1973_s23 + $0xa0] sm:$0xff]   ;;  %v1747_v19 = vld [vmem:[%s1973_s23 + $0xa8] sm:$0xff]   ;;  %v1748_v20 = vld [vmem:[%s1973_s23 + $0x30] sm:$0xff]  }
  0x18   : > { %1612 = vmatprep.subr.bf16.mxu0 %v1730_v2  ;;  %1690 = vmatprep.subr.bf16.mxu1 %v1730_v2  ;;  %v1749_v21 = vld [vmem:[%s1973_s23 + $0xb0] sm:$0xff]   ;;  %v1750_v22 = vld [vmem:[%s1973_s23 + $0x38] sm:$0xff]   ;;  %v1752_v24 = vld [vmem:[%s1973_s23 + $0x40] sm:$0xff]  }
  0x19   : > { %v1751_v23 = vld [vmem:[%s1973_s23 + $0xb8] sm:$0xff]   ;;  %v1753_v25 = vld [vmem:[%s1973_s23 + $0xc0] sm:$0xff]   ;;  %v1754_v26 = vld [vmem:[%s1973_s23 + $0x48] sm:$0xff]  }
  0x1a   : > { %v1755_v27 = vld [vmem:[%s1973_s23 + $0xc8] sm:$0xff]   ;;  %v1756_v28 = vld [vmem:[%s1973_s23 + $0x50] sm:$0xff]   ;;  %v1758_v30 = vld [vmem:[%s1973_s23 + $0x58] sm:$0xff]  }
  0x1b   : > { %1613 = vmatpush3.bf16.msra.mxu0 %v1730_v2  ;;  %1698 = vmatpush3.bf16.msra.mxu1 %v1730_v2  ;;  %v1757_v29 = vld [vmem:[%s1973_s23 + $0xd0] sm:$0xff]   ;;  %v1759_v31 = vld [vmem:[%s1973_s23 + $0xd8] sm:$0xff]   ;;  %v1760_v32 = vld [vmem:[%s1973_s23 + $0x60] sm:$0xff]  }
  0x1c   : > { %1614 = vmatprep.subr.bf16.mxu0 %v1731_v3  ;;  %1691 = vmatprep.subr.bf16.mxu1 %v1731_v3  ;;  %v1761_v33 = vld [vmem:[%s1973_s23 + $0xe0] sm:$0xff]   ;;  %v1762_v34 = vld [vmem:[%s1973_s23 + $0x68] sm:$0xff]   ;;  %v1764_v36 = vld [vmem:[%s1973_s23 + $0x70] sm:$0xff]  }
  0x1d   : > { %v1763_v35 = vld [vmem:[%s1973_s23 + $0xe8] sm:$0xff]   ;;  %v1765_v37 = vld [vmem:[%s1973_s23 + $0xf0] sm:$0xff]   ;;  %v1766_v38 = vld [vmem:[%s1973_s23 + $0x78] sm:$0xff]  }
  0x1e   : > { %v1767_v39 = vld [vmem:[%s1973_s23 + $0xf8] sm:$0xff]  }
  0x1f   : > { %1615 = vmatpush3.bf16.msra.mxu0 %v1731_v3  ;;  %1699 = vmatpush3.bf16.msra.mxu1 %v1731_v3 }
  0x20   : > { %1616 = vmatprep.subr.bf16.mxu0 %v1732_v6  ;;  %1692 = vmatprep.subr.bf16.mxu1 %v1732_v6 }
  0x23   : > { %1617 = vmatpush3.bf16.msra.mxu0 %v1732_v6  ;;  %1700 = vmatpush3.bf16.msra.mxu1 %v1732_v6 }
  0x24   : > { %1618 = vmatprep.subr.bf16.mxu0 %v1733_v7  ;;  %1693 = vmatprep.subr.bf16.mxu1 %v1733_v7 }
  0x27   : > { %1619 = vmatpush3.bf16.msra.mxu0 %v1733_v7  ;;  %1701 = vmatpush3.bf16.msra.mxu1 %v1733_v7 }
  0x28   : > { %1620 = vmatprep.subr.bf16.mxu0 %v1734_v8  ;;  %1694 = vmatprep.subr.bf16.mxu1 %v1734_v8 }
  0x2b   : > { %1621 = vmatpush3.bf16.msra.mxu0 %v1734_v8  ;;  %1702 = vmatpush3.bf16.msra.mxu1 %v1734_v8 }
  0x2c   : > { %1622 = vmatprep.subr.bf16.mxu0 %v1735_v9  ;;  %1695 = vmatprep.subr.bf16.mxu1 %v1735_v9 }
  0x2f   : > { %1623 = vmatpush3.bf16.msra.mxu0 %v1735_v9  ;;  %1703 = vmatpush3.bf16.msra.mxu1 %v1735_v9 }
  0x32   : > { %1625 = vmatmul.mubr.bf16.vlgmr.msra.gmra.mrb[0].mxu0 %v1738_v10  ;;  %1657 = vmatmul.mubr.bf16.vlgmr.msra.gmra.mrb[0].mxu1 %v1739_v11 }
  0x33   : > { %1628 = vmatprep.mubr.bf16.mxu0 %v1740_v12  ;;  %1660 = vmatprep.mubr.bf16.mxu1 %v1741_v13 }
  0x3a   : > { %1629 = vmatmul.mubr.bf16.gmra.mrb[4].mxu0 %v1742_v14  ;;  %1661 = vmatmul.mubr.bf16.gmra.mrb[4].mxu1 %v1743_v15 }
  0x3b   : > { %1632 = vmatprep.mubr.bf16.mxu0 %v1744_v16  ;;  %1664 = vmatprep.mubr.bf16.mxu1 %v1745_v17 }
  0x42   : > { %1633 = vmatmul.mubr.bf16.gmra.mrb[8].mxu0 %v1746_v18  ;;  %1665 = vmatmul.mubr.bf16.gmra.mrb[8].mxu1 %v1747_v19 }
  0x43   : > { %1636 = vmatprep.mubr.bf16.mxu0 %v1748_v20  ;;  %1668 = vmatprep.mubr.bf16.mxu1 %v1749_v21 }
  0x4a   : > { %1637 = vmatmul.mubr.bf16.gmra.mrb[12].mxu0 %v1750_v22  ;;  %1669 = vmatmul.mubr.bf16.gmra.mrb[12].mxu1 %v1751_v23 }
  0x4b   : > { %1640 = vmatprep.mubr.bf16.mxu0 %v1752_v24  ;;  %1672 = vmatprep.mubr.bf16.mxu1 %v1753_v25 }
  0x52   : > { %1641 = vmatmul.mubr.bf16.gmra.mrb[16].mxu0 %v1754_v26  ;;  %1673 = vmatmul.mubr.bf16.gmra.mrb[16].mxu1 %v1755_v27 }
  0x53   : > { %1644 = vmatprep.mubr.bf16.mxu0 %v1756_v28  ;;  %1676 = vmatprep.mubr.bf16.mxu1 %v1757_v29 }
  0x5a   : > { %1645 = vmatmul.mubr.bf16.gmra.mrb[20].mxu0 %v1758_v30  ;;  %1677 = vmatmul.mubr.bf16.gmra.mrb[20].mxu1 %v1759_v31 }
  0x5b   : > { %1648 = vmatprep.mubr.bf16.mxu0 %v1760_v32  ;;  %1680 = vmatprep.mubr.bf16.mxu1 %v1761_v33 }
  0x62   : > { %1649 = vmatmul.mubr.bf16.gmra.mrb[24].mxu0 %v1762_v34  ;;  %1681 = vmatmul.mubr.bf16.gmra.mrb[24].mxu1 %v1763_v35 }
  0x63   : > { %1652 = vmatprep.mubr.bf16.mxu0 %v1764_v36  ;;  %1684 = vmatprep.mubr.bf16.mxu1 %v1765_v37 }
  0x6a   : > { %1653 = vmatmul.mubr.bf16.gmra.mrb[28].mxu0 %v1766_v38  ;;  %1685 = vmatmul.mubr.bf16.gmra.mrb[28].mxu1 %v1767_v39 }
 0x105   : > { %v1626_v41 = vpop.f32.mrb[0].mxu0  ;;  %v1658_v42 = vpop.f32.mrb[0].mxu1 }
 0x106   : > { %v1210_v43 = vadd.f32 %v1626_v41, %v2015_v40  ;;  %v1242_v44 = vadd.f32 %v1658_v42, %v2015_v40  ;;  %v751_v45 = vpop.f32.mrb[1].mxu0  ;;  %v879_v46 = vpop.f32.mrb[1].mxu1 }
 0x107   : > { %v1208_v47 = vadd.f32 %v2015_v40, %v751_v45  ;;  %v1240_v48 = vadd.f32 %v2015_v40, %v879_v46  ;;  %v1627_v49 = vpop.f32.mrb[2].mxu0  ;;  %v1659_v50 = vpop.f32.mrb[2].mxu1 }
 0x108   : > { %1768 = vtanh.f32 %v1210_v43  ;;  %v1211_v51 = vadd.f32 %v1627_v49, %v2015_v40  ;;  %v754_v52 = vpop.f32.mrb[3].mxu0  ;;  %v882_v53 = vpop.f32.mrb[3].mxu1  ;;  %v1243_v54 = vadd.f32 %v1659_v50, %v2015_v40 }
 0x109   : > { %1770 = vtanh.f32 %v1242_v44  ;;  %v1209_v55 = vadd.f32 %v2015_v40, %v754_v52  ;;  %v1241_v56 = vadd.f32 %v2015_v40, %v882_v53 }
 0x10a   : > { %1772 = vtanh.f32 %v1208_v47 }
 0x10b   : > { %1774 = vtanh.f32 %v1240_v48 }
 0x10c   : > { %1776 = vtanh.f32 %v1211_v51 }
 0x10d   : > { %1778 = vtanh.f32 %v1243_v54  ;;  %v1630_v57 = vpop.f32.mrb[4].mxu0  ;;  %v1662_v58 = vpop.f32.mrb[4].mxu1 }
 0x10e   : > { %1780 = vtanh.f32 %v1209_v55  ;;  %v1214_v59 = vadd.f32 %v1630_v57, %v2015_v40  ;;  %v1246_v60 = vadd.f32 %v1662_v58, %v2015_v40  ;;  %v767_v61 = vpop.f32.mrb[5].mxu0  ;;  %v895_v62 = vpop.f32.mrb[5].mxu1 }
 0x10f   : > { %1782 = vtanh.f32 %v1241_v56  ;;  %v1212_v63 = vadd.f32 %v2015_v40, %v767_v61  ;;  %v1244_v0 = vadd.f32 %v2015_v40, %v895_v62  ;;  %v1631_v1 = vpop.f32.mrb[6].mxu0  ;;  %v1663_v2 = vpop.f32.mrb[6].mxu1 }
 0x110   : > { %1784 = vtanh.f32 %v1214_v59  ;;  %v1215_v3 = vadd.f32 %v1631_v1, %v2015_v40  ;;  %v770_v4 = vpop.f32.mrb[7].mxu0  ;;  %v898_v5 = vpop.f32.mrb[7].mxu1  ;;  %v1247_v6 = vadd.f32 %v1663_v2, %v2015_v40 }
 0x111   : > { %1786 = vtanh.f32 %v1246_v60  ;;  %v1213_v8 = vadd.f32 %v2015_v40, %v770_v4  ;;  %v1245_v10 = vadd.f32 %v2015_v40, %v898_v5 }
 0x112   : > { %v1769_v7 = vpop.eup %1768  ;;  %1788 = vtanh.f32 %v1212_v63 }
 0x113   : > { %v1771_v9 = vpop.eup %1770  ;;  %1338 = vst [vmem:[%s2033_s29 + $0x10] sm:$0xff] %v1769_v7  ;;  %1790 = vtanh.f32 %v1244_v0 }
 0x114   : > { %v1773_v11 = vpop.eup %1772  ;;  %1370 = vst [vmem:[%s2033_s29 + $0x110] sm:$0xff] %v1771_v9  ;;  %1792 = vtanh.f32 %v1215_v3 }
 0x115   : > { %v1775_v12 = vpop.eup %1774  ;;  %1336 = vst [vmem:[%s2033_s29] sm:$0xff] %v1773_v11  ;;  %1794 = vtanh.f32 %v1247_v6  ;;  %v1634_v13 = vpop.f32.mrb[8].mxu0 }
 0x116   : > { %v1666_v14 = vpop.f32.mrb[8].mxu1  ;;  %v1777_v15 = vpop.eup %1776  ;;  %1368 = vst [vmem:[%s2033_s29 + $0x100] sm:$0xff] %v1775_v12  ;;  %1796 = vtanh.f32 %v1213_v8  ;;  %v1218_v16 = vadd.f32 %v1634_v13, %v2015_v40 }
 0x117   : > { %v1250_v17 = vadd.f32 %v1666_v14, %v2015_v40  ;;  %v783_v18 = vpop.f32.mrb[9].mxu0  ;;  %v911_v19 = vpop.f32.mrb[9].mxu1  ;;  %1339 = vst [vmem:[%s2033_s29 + $0x18] sm:$0xff] %v1777_v15  ;;  %1798 = vtanh.f32 %v1245_v10 }
 0x118   : > { %v1779_v20 = vpop.eup %1778  ;;  %v1216_v21 = vadd.f32 %v2015_v40, %v783_v18  ;;  %v1248_v22 = vadd.f32 %v2015_v40, %v911_v19  ;;  %v1635_v23 = vpop.f32.mrb[10].mxu0  ;;  %1800 = vtanh.f32 %v1218_v16 }
 0x119   : > { %v1667_v24 = vpop.f32.mrb[10].mxu1  ;;  %v1781_v25 = vpop.eup %1780  ;;  %1371 = vst [vmem:[%s2033_s29 + $0x118] sm:$0xff] %v1779_v20  ;;  %v1219_v26 = vadd.f32 %v1635_v23, %v2015_v40  ;;  %1802 = vtanh.f32 %v1250_v17 }
 0x11a   : > { %v786_v27 = vpop.f32.mrb[11].mxu0  ;;  %v914_v28 = vpop.f32.mrb[11].mxu1  ;;  %1337 = vst [vmem:[%s2033_s29 + $0x8] sm:$0xff] %v1781_v25  ;;  %v1251_v30 = vadd.f32 %v1667_v24, %v2015_v40  ;;  %1804 = vtanh.f32 %v1216_v21 }
 0x11b   : > { %v1783_v29 = vpop.eup %1782  ;;  %v1217_v32 = vadd.f32 %v2015_v40, %v786_v27  ;;  %1806 = vtanh.f32 %v1248_v22  ;;  %v1249_v34 = vadd.f32 %v2015_v40, %v914_v28 }
 0x11c   : > { %v1785_v31 = vpop.eup %1784  ;;  %1369 = vst [vmem:[%s2033_s29 + $0x108] sm:$0xff] %v1783_v29  ;;  %1808 = vtanh.f32 %v1219_v26 }
 0x11d   : > { %v1787_v33 = vpop.eup %1786  ;;  %1342 = vst [vmem:[%s2033_s29 + $0x30] sm:$0xff] %v1785_v31  ;;  %1810 = vtanh.f32 %v1251_v30  ;;  %v1638_v37 = vpop.f32.mrb[12].mxu0 }
 0x11e   : > { %v1789_v35 = vpop.eup %1788  ;;  %1374 = vst [vmem:[%s2033_s29 + $0x130] sm:$0xff] %v1787_v33  ;;  %v1670_v38 = vpop.f32.mrb[12].mxu1  ;;  %1812 = vtanh.f32 %v1217_v32  ;;  %v1222_v41 = vadd.f32 %v1638_v37, %v2015_v40 }
 0x11f   : > { %v1791_v36 = vpop.eup %1790  ;;  %1340 = vst [vmem:[%s2033_s29 + $0x20] sm:$0xff] %v1789_v35  ;;  %v1254_v42 = vadd.f32 %v1670_v38, %v2015_v40  ;;  %v799_v43 = vpop.f32.mrb[13].mxu0  ;;  %1814 = vtanh.f32 %v1249_v34 }
 0x120   : > { %v1793_v39 = vpop.eup %1792  ;;  %1372 = vst [vmem:[%s2033_s29 + $0x120] sm:$0xff] %v1791_v36  ;;  %v927_v44 = vpop.f32.mrb[13].mxu1  ;;  %v1220_v46 = vadd.f32 %v2015_v40, %v799_v43  ;;  %1816 = vtanh.f32 %v1222_v41 }
 0x121   : > { %v1795_v45 = vpop.eup %1794  ;;  %1343 = vst [vmem:[%s2033_s29 + $0x38] sm:$0xff] %v1793_v39  ;;  %v1252_v47 = vadd.f32 %v2015_v40, %v927_v44  ;;  %v1639_v48 = vpop.f32.mrb[14].mxu0  ;;  %1818 = vtanh.f32 %v1254_v42 }
 0x122   : > { %v1671_v49 = vpop.f32.mrb[14].mxu1  ;;  %v1797_v50 = vpop.eup %1796  ;;  %1375 = vst [vmem:[%s2033_s29 + $0x138] sm:$0xff] %v1795_v45  ;;  %v1223_v51 = vadd.f32 %v1639_v48, %v2015_v40  ;;  %1820 = vtanh.f32 %v1220_v46 }
 0x123   : > { %v802_v52 = vpop.f32.mrb[15].mxu0  ;;  %v930_v53 = vpop.f32.mrb[15].mxu1  ;;  %1341 = vst [vmem:[%s2033_s29 + $0x28] sm:$0xff] %v1797_v50  ;;  %v1255_v55 = vadd.f32 %v1671_v49, %v2015_v40  ;;  %1822 = vtanh.f32 %v1252_v47 }
 0x124   : > { %v1799_v54 = vpop.eup %1798  ;;  %v1221_v57 = vadd.f32 %v2015_v40, %v802_v52  ;;  %v1253_v59 = vadd.f32 %v2015_v40, %v930_v53  ;;  %1824 = vtanh.f32 %v1223_v51 }
 0x125   : > { %v1801_v56 = vpop.eup %1800  ;;  %1373 = vst [vmem:[%s2033_s29 + $0x128] sm:$0xff] %v1799_v54  ;;  %1826 = vtanh.f32 %v1255_v55  ;;  %v1642_v62 = vpop.f32.mrb[16].mxu0 }
 0x126   : > { %v1803_v58 = vpop.eup %1802  ;;  %1346 = vst [vmem:[%s2033_s29 + $0x50] sm:$0xff] %v1801_v56  ;;  %v1674_v63 = vpop.f32.mrb[16].mxu1  ;;  %1828 = vtanh.f32 %v1221_v57  ;;  %v1226_v1 = vadd.f32 %v1642_v62, %v2015_v40 }
 0x127   : > { %v1805_v60 = vpop.eup %1804  ;;  %1378 = vst [vmem:[%s2033_s29 + $0x150] sm:$0xff] %v1803_v58  ;;  %v1258_v2 = vadd.f32 %v1674_v63, %v2015_v40  ;;  %v815_v3 = vpop.f32.mrb[17].mxu0  ;;  %1830 = vtanh.f32 %v1253_v59 }
 0x128   : > { %v1807_v61 = vpop.eup %1806  ;;  %1344 = vst [vmem:[%s2033_s29 + $0x40] sm:$0xff] %v1805_v60  ;;  %v943_v4 = vpop.f32.mrb[17].mxu1  ;;  %v1224_v6 = vadd.f32 %v2015_v40, %v815_v3  ;;  %1832 = vtanh.f32 %v1226_v1 }
 0x129   : > { %v1809_v0 = vpop.eup %1808  ;;  %1376 = vst [vmem:[%s2033_s29 + $0x140] sm:$0xff] %v1807_v61  ;;  %v1256_v7 = vadd.f32 %v2015_v40, %v943_v4  ;;  %v1643_v8 = vpop.f32.mrb[18].mxu0  ;;  %1834 = vtanh.f32 %v1258_v2 }
 0x12a   : > { %v1811_v5 = vpop.eup %1810  ;;  %1347 = vst [vmem:[%s2033_s29 + $0x58] sm:$0xff] %v1809_v0  ;;  %v1675_v9 = vpop.f32.mrb[18].mxu1  ;;  %v1227_v11 = vadd.f32 %v1643_v8, %v2015_v40  ;;  %1836 = vtanh.f32 %v1224_v6 }
 0x12b   : > { %v1813_v10 = vpop.eup %1812  ;;  %1379 = vst [vmem:[%s2033_s29 + $0x158] sm:$0xff] %v1811_v5  ;;  %v818_v12 = vpop.f32.mrb[19].mxu0  ;;  %v1259_v15 = vadd.f32 %v1675_v9, %v2015_v40  ;;  %1838 = vtanh.f32 %v1256_v7 }
 0x12c   : > { %v946_v13 = vpop.f32.mrb[19].mxu1  ;;  %v1815_v14 = vpop.eup %1814  ;;  %1345 = vst [vmem:[%s2033_s29 + $0x48] sm:$0xff] %v1813_v10  ;;  %v1225_v17 = vadd.f32 %v2015_v40, %v818_v12  ;;  %1840 = vtanh.f32 %v1227_v11 }
 0x12d   : > { %v1817_v16 = vpop.eup %1816  ;;  %1377 = vst [vmem:[%s2033_s29 + $0x148] sm:$0xff] %v1815_v14  ;;  %v1257_v19 = vadd.f32 %v2015_v40, %v946_v13  ;;  %1842 = vtanh.f32 %v1259_v15  ;;  %v1646_v22 = vpop.f32.mrb[20].mxu0 }
 0x12e   : > { %v1819_v18 = vpop.eup %1818  ;;  %1350 = vst [vmem:[%s2033_s29 + $0x70] sm:$0xff] %v1817_v16  ;;  %v1678_v23 = vpop.f32.mrb[20].mxu1  ;;  %1844 = vtanh.f32 %v1225_v17  ;;  %v1230_v25 = vadd.f32 %v1646_v22, %v2015_v40 }
 0x12f   : > { %v1821_v20 = vpop.eup %1820  ;;  %1382 = vst [vmem:[%s2033_s29 + $0x170] sm:$0xff] %v1819_v18  ;;  %v1262_v26 = vadd.f32 %v1678_v23, %v2015_v40  ;;  %v831_v27 = vpop.f32.mrb[21].mxu0  ;;  %1846 = vtanh.f32 %v1257_v19 }
 0x130   : > { %v1823_v21 = vpop.eup %1822  ;;  %1348 = vst [vmem:[%s2033_s29 + $0x60] sm:$0xff] %v1821_v20  ;;  %v959_v28 = vpop.f32.mrb[21].mxu1  ;;  %v1228_v30 = vadd.f32 %v2015_v40, %v831_v27  ;;  %1848 = vtanh.f32 %v1230_v25 }
 0x131   : > { %v1825_v24 = vpop.eup %1824  ;;  %1380 = vst [vmem:[%s2033_s29 + $0x160] sm:$0xff] %v1823_v21  ;;  %v1260_v31 = vadd.f32 %v2015_v40, %v959_v28  ;;  %v1647_v32 = vpop.f32.mrb[22].mxu0  ;;  %1850 = vtanh.f32 %v1262_v26 }
 0x132   : > { %v1827_v29 = vpop.eup %1826  ;;  %1351 = vst [vmem:[%s2033_s29 + $0x78] sm:$0xff] %v1825_v24  ;;  %v1679_v33 = vpop.f32.mrb[22].mxu1  ;;  %v1231_v35 = vadd.f32 %v1647_v32, %v2015_v40  ;;  %1852 = vtanh.f32 %v1228_v30 }
 0x133   : > { %v1829_v34 = vpop.eup %1828  ;;  %1383 = vst [vmem:[%s2033_s29 + $0x178] sm:$0xff] %v1827_v29  ;;  %v834_v36 = vpop.f32.mrb[23].mxu0  ;;  %v1263_v39 = vadd.f32 %v1679_v33, %v2015_v40  ;;  %1854 = vtanh.f32 %v1260_v31 }
 0x134   : > { %v962_v37 = vpop.f32.mrb[23].mxu1  ;;  %v1831_v38 = vpop.eup %1830  ;;  %1349 = vst [vmem:[%s2033_s29 + $0x68] sm:$0xff] %v1829_v34  ;;  %v1229_v42 = vadd.f32 %v2015_v40, %v834_v36  ;;  %1856 = vtanh.f32 %v1231_v35 }
 0x135   : > { %v1833_v41 = vpop.eup %1832  ;;  %1381 = vst [vmem:[%s2033_s29 + $0x168] sm:$0xff] %v1831_v38  ;;  %v1261_v44 = vadd.f32 %v2015_v40, %v962_v37  ;;  %1858 = vtanh.f32 %v1263_v39  ;;  %v1650_v47 = vpop.f32.mrb[24].mxu0 }
 0x136   : > { %v1835_v43 = vpop.eup %1834  ;;  %1354 = vst [vmem:[%s2033_s29 + $0x90] sm:$0xff] %v1833_v41  ;;  %v1682_v48 = vpop.f32.mrb[24].mxu1  ;;  %1860 = vtanh.f32 %v1229_v42  ;;  %v1234_v50 = vadd.f32 %v1650_v47, %v2015_v40 }
 0x137   : > { %v1837_v45 = vpop.eup %1836  ;;  %1386 = vst [vmem:[%s2033_s29 + $0x190] sm:$0xff] %v1835_v43  ;;  %v1266_v51 = vadd.f32 %v1682_v48, %v2015_v40  ;;  %v847_v52 = vpop.f32.mrb[25].mxu0  ;;  %1862 = vtanh.f32 %v1261_v44 }
 0x138   : > { %v1839_v46 = vpop.eup %1838  ;;  %1352 = vst [vmem:[%s2033_s29 + $0x80] sm:$0xff] %v1837_v45  ;;  %v975_v53 = vpop.f32.mrb[25].mxu1  ;;  %v1232_v55 = vadd.f32 %v2015_v40, %v847_v52  ;;  %1864 = vtanh.f32 %v1234_v50 }
 0x139   : > { %v1841_v49 = vpop.eup %1840  ;;  %1384 = vst [vmem:[%s2033_s29 + $0x180] sm:$0xff] %v1839_v46  ;;  %v1264_v56 = vadd.f32 %v2015_v40, %v975_v53  ;;  %v1651_v57 = vpop.f32.mrb[26].mxu0  ;;  %1866 = vtanh.f32 %v1266_v51 }
 0x13a   : > { %v1843_v54 = vpop.eup %1842  ;;  %1355 = vst [vmem:[%s2033_s29 + $0x98] sm:$0xff] %v1841_v49  ;;  %v1683_v58 = vpop.f32.mrb[26].mxu1  ;;  %v1235_v60 = vadd.f32 %v1651_v57, %v2015_v40  ;;  %1868 = vtanh.f32 %v1232_v55 }
 0x13b   : > { %v1845_v59 = vpop.eup %1844  ;;  %1387 = vst [vmem:[%s2033_s29 + $0x198] sm:$0xff] %v1843_v54  ;;  %v850_v61 = vpop.f32.mrb[27].mxu0  ;;  %v1267_v0 = vadd.f32 %v1683_v58, %v2015_v40  ;;  %1870 = vtanh.f32 %v1264_v56 }
 0x13c   : > { %v978_v62 = vpop.f32.mrb[27].mxu1  ;;  %v1847_v63 = vpop.eup %1846  ;;  %1353 = vst [vmem:[%s2033_s29 + $0x88] sm:$0xff] %v1845_v59  ;;  %v1233_v2 = vadd.f32 %v2015_v40, %v850_v61  ;;  %1872 = vtanh.f32 %v1235_v60 }
 0x13d   : > { %v1849_v1 = vpop.eup %1848  ;;  %1385 = vst [vmem:[%s2033_s29 + $0x188] sm:$0xff] %v1847_v63  ;;  %v1265_v4 = vadd.f32 %v2015_v40, %v978_v62  ;;  %1874 = vtanh.f32 %v1267_v0  ;;  %v1654_v7 = vpop.f32.mrb[28].mxu0 }
 0x13e   : > { %v1851_v3 = vpop.eup %1850  ;;  %1358 = vst [vmem:[%s2033_s29 + $0xb0] sm:$0xff] %v1849_v1  ;;  %v1686_v8 = vpop.f32.mrb[28].mxu1  ;;  %1876 = vtanh.f32 %v1233_v2  ;;  %v1238_v10 = vadd.f32 %v1654_v7, %v2015_v40 }
 0x13f   : > { %v1853_v5 = vpop.eup %1852  ;;  %1390 = vst [vmem:[%s2033_s29 + $0x1b0] sm:$0xff] %v1851_v3  ;;  %v1270_v11 = vadd.f32 %v1686_v8, %v2015_v40  ;;  %v863_v12 = vpop.f32.mrb[29].mxu0  ;;  %1878 = vtanh.f32 %v1265_v4 }
 0x140   : > { %v1855_v6 = vpop.eup %1854  ;;  %1356 = vst [vmem:[%s2033_s29 + $0xa0] sm:$0xff] %v1853_v5  ;;  %v991_v13 = vpop.f32.mrb[29].mxu1  ;;  %v1236_v15 = vadd.f32 %v2015_v40, %v863_v12  ;;  %1880 = vtanh.f32 %v1238_v10 }
 0x141   : > { %v1857_v9 = vpop.eup %1856  ;;  %1388 = vst [vmem:[%s2033_s29 + $0x1a0] sm:$0xff] %v1855_v6  ;;  %v1268_v16 = vadd.f32 %v2015_v40, %v991_v13  ;;  %v1655_v17 = vpop.f32.mrb[30].mxu0  ;;  %1882 = vtanh.f32 %v1270_v11 }
 0x142   : > { %v1859_v14 = vpop.eup %1858  ;;  %1359 = vst [vmem:[%s2033_s29 + $0xb8] sm:$0xff] %v1857_v9  ;;  %v1687_v18 = vpop.f32.mrb[30].mxu1  ;;  %v1239_v20 = vadd.f32 %v1655_v17, %v2015_v40  ;;  %1884 = vtanh.f32 %v1236_v15 }
 0x143   : > { %v1861_v19 = vpop.eup %1860  ;;  %1391 = vst [vmem:[%s2033_s29 + $0x1b8] sm:$0xff] %v1859_v14  ;;  %v866_v21 = vpop.f32.mrb[31].mxu0  ;;  %v1271_v24 = vadd.f32 %v1687_v18, %v2015_v40  ;;  %1886 = vtanh.f32 %v1268_v16 }
 0x144   : > { %v994_v22 = vpop.f32.mrb[31].mxu1  ;;  %v1863_v23 = vpop.eup %1862  ;;  %1357 = vst [vmem:[%s2033_s29 + $0xa8] sm:$0xff] %v1861_v19  ;;  %v1237_v26 = vadd.f32 %v2015_v40, %v866_v21  ;;  %1888 = vtanh.f32 %v1239_v20 }
 0x145   : > { %v1865_v25 = vpop.eup %1864  ;;  %1389 = vst [vmem:[%s2033_s29 + $0x1a8] sm:$0xff] %v1863_v23  ;;  %v1269_v28 = vadd.f32 %v2015_v40, %v994_v22  ;;  %1890 = vtanh.f32 %v1271_v24 }
 0x146   : > { %v1867_v27 = vpop.eup %1866  ;;  %1362 = vst [vmem:[%s2033_s29 + $0xd0] sm:$0xff] %v1865_v25  ;;  %1892 = vtanh.f32 %v1237_v26 }
 0x147   : > { %v1869_v29 = vpop.eup %1868  ;;  %1394 = vst [vmem:[%s2033_s29 + $0x1d0] sm:$0xff] %v1867_v27  ;;  %1894 = vtanh.f32 %v1269_v28 }
 0x148   : > { %v1871_v30 = vpop.eup %1870  ;;  %1360 = vst [vmem:[%s2033_s29 + $0xc0] sm:$0xff] %v1869_v29 }
 0x149   : > { %v1873_v31 = vpop.eup %1872  ;;  %1392 = vst [vmem:[%s2033_s29 + $0x1c0] sm:$0xff] %v1871_v30 }
 0x14a   : > { %v1875_v32 = vpop.eup %1874  ;;  %1363 = vst [vmem:[%s2033_s29 + $0xd8] sm:$0xff] %v1873_v31 }
 0x14b   : > { %v1877_v40 = vpop.eup %1876  ;;  %1395 = vst [vmem:[%s2033_s29 + $0x1d8] sm:$0xff] %v1875_v32 }
 0x14c   : > { %v1879_v33 = vpop.eup %1878  ;;  %1361 = vst [vmem:[%s2033_s29 + $0xc8] sm:$0xff] %v1877_v40 }
 0x14d   : > { %v1881_v34 = vpop.eup %1880  ;;  %1393 = vst [vmem:[%s2033_s29 + $0x1c8] sm:$0xff] %v1879_v33 }
 0x14e   : > { %v1883_v35 = vpop.eup %1882  ;;  %1366 = vst [vmem:[%s2033_s29 + $0xf0] sm:$0xff] %v1881_v34 }
 0x14f   : > { %v1885_v36 = vpop.eup %1884  ;;  %1398 = vst [vmem:[%s2033_s29 + $0x1f0] sm:$0xff] %v1883_v35 }
 0x150   : > { %v1887_v37 = vpop.eup %1886  ;;  %1364 = vst [vmem:[%s2033_s29 + $0xe0] sm:$0xff] %v1885_v36 }
 0x151   : > { %v1889_v38 = vpop.eup %1888  ;;  %1396 = vst [vmem:[%s2033_s29 + $0x1e0] sm:$0xff] %v1887_v37 }
 0x152   : > { %v1891_v39 = vpop.eup %1890  ;;  %1367 = vst [vmem:[%s2033_s29 + $0xf8] sm:$0xff] %v1889_v38 }
 0x153   : > { %v1893_v41 = vpop.eup %1892  ;;  %1399 = vst [vmem:[%s2033_s29 + $0x1f8] sm:$0xff] %v1891_v39 }
 0x154   : > { %v1895_v42 = vpop.eup %1894  ;;  %1365 = vst [vmem:[%s2033_s29 + $0xe8] sm:$0xff] %v1893_v41 }
 0x155   : > { %1397 = vst [vmem:[%s2033_s29 + $0x1e8] sm:$0xff] %v1895_v42 }
 0x156 PF: > { %s13_s14 = sadd.s32 1, %s1918_s14   ;;  %s2164_s12 = smov %s1914_s13 }
 0x157   : > { %p10_p5 = scmp.ge.s32.totalorder %s13_s14, 6   ;;  %s2165_s13 = smov %s2167_s15 }
 0x159   :  { %12 = sbr.rel (!%p10_p5) target bundleno = 2 (0x2), region = 73 }

</bundles_post_ra>
